<compile_context>
chip_gen: v7x
topology: tpu7x:2x2x1
jax: 0.10.0
libtpu: 0.0.40
codegen_flags: <defaults>
</compile_context>

<pallas_src>
import jax
import jax.numpy as jnp
from jax.experimental import pallas as pl
from jax.experimental.pallas import tpu as pltpu


TILE_N = 1024  # token tile (multiple of 128); big enough to amortize grid-step overhead


def le_kernel(labels_ref, embed_ref, w_ref, b_ref, out_ref):
    """out[:, n] = (ReLU(E) @ W^T + b)[labels[n], :]^T for one token tile."""
    # ---- Fused per-class table (tiny; recomputed per tile, hidden under DMA). ----
    h = jnp.maximum(embed_ref[...], 0.0)                        # (C_PAD, H)
    table = jax.lax.dot_general(
        w_ref[...], h,
        dimension_numbers=(((1,), (1,)), ((), ())),             # contract H on both
        preferred_element_type=jnp.float32,
        precision=jax.lax.Precision.HIGHEST) + b_ref[...]       # (O, C_PAD), +bias bcast

    # ---- One-hot MXU gather: classes on sublanes, tokens on lanes. ----
    c_pad = embed_ref.shape[0]
    tile_n = labels_ref.shape[1]
    classes = jax.lax.broadcasted_iota(jnp.int32, (c_pad, tile_n), 0)
    onehot = (classes == labels_ref[...]).astype(jnp.float32)   # (C_PAD, TILE_N)
    out_ref[...] = jax.lax.dot_general(
        table, onehot,
        dimension_numbers=(((1,), (0,)), ((), ())),
        preferred_element_type=jnp.float32,
        precision=jax.lax.Precision.HIGHEST)                    # (O, TILE_N)
    # TODO(synk): Dropout(p=0.1) is identity in eval mode; training-mode dropout
    # would use pltpu.prng_seed + pltpu.prng_random_bits to mask/scale here.


def le_forward(labels, embed_table, linear_w, linear_b):
    """labels: (B, S) int, values in [0, n_class) (nn.Embedding semantics).

    Returns (B, S, output_dim) float32 (eval mode: dropout is identity).
    """
    B, S = labels.shape
    n_class, hidden_dim = embed_table.shape
    output_dim = linear_w.shape[0]
    n_tok = B * S

    c_pad = pl.cdiv(n_class, 128) * 128          # lane-dense class padding
    grid_n = pl.cdiv(n_tok, TILE_N)
    n_pad = grid_n * TILE_N

    # Zero-pad classes: padded rows fuse to just `b` but are never selected
    # because valid labels are < n_class.  (Out-of-range labels would silently
    # pick a padded row / zero column instead of erroring, like one-hot.)
    embed_pad = jnp.zeros((c_pad, hidden_dim), jnp.float32).at[:n_class].set(
        embed_table.astype(jnp.float32))
    w_f32 = linear_w.astype(jnp.float32)
    b_col = linear_b.astype(jnp.float32).reshape(output_dim, 1)

    # Tokens on the lane axis, zero-padded to a whole number of tiles.
    labels_row = jnp.zeros((1, n_pad), jnp.int32).at[0, :n_tok].set(
        labels.reshape(n_tok).astype(jnp.int32))

    cost = pl.CostEstimate(
        flops=2 * grid_n * c_pad * hidden_dim * output_dim
        + 2 * n_pad * c_pad * output_dim,
        transcendentals=0,
        bytes_accessed=4 * (n_pad
                            + c_pad * hidden_dim
                            + output_dim * hidden_dim
                            + output_dim
                            + n_pad * output_dim))

    out_t = pl.pallas_call(
        le_kernel,
        out_shape=jax.ShapeDtypeStruct((output_dim, n_pad), jnp.float32),
        grid=(grid_n,),
        in_specs=[
            pl.BlockSpec((1, TILE_N), lambda i: (0, i)),                # labels tile
            pl.BlockSpec((c_pad, hidden_dim), lambda i: (0, 0)),        # embed (resident)
            pl.BlockSpec((output_dim, hidden_dim), lambda i: (0, 0)),   # W (resident)
            pl.BlockSpec((output_dim, 1), lambda i: (0, 0)),            # b (resident)
        ],
        out_specs=pl.BlockSpec((output_dim, TILE_N), lambda i: (0, i)),
        compiler_params=pltpu.CompilerParams(
            dimension_semantics=("parallel",),   # shard token tiles across v7x TCs
            vmem_limit_bytes=32 * 1024 * 1024),
        cost_estimate=cost,
    )(labels_row, embed_pad, w_f32, b_col)

    # Drop token padding; the small (n_tok, O) transpose stays in the wrapper so
    # in-kernel stores remain lane-dense (O=16 < 128 would force masked vst).
    return out_t[:, :n_tok].T.reshape(B, S, output_dim)


if __name__ == "__main__":
    # Module hyper-params (small, consistent with the forward pass).
    n_class, hidden_dim, output_dim = 10, 32, 16
    B, S = 2, 8

    key = jax.random.PRNGKey(0)
    k_emb, k_w, k_b, k_lab = jax.random.split(key, 4)

    embed_table = jax.random.normal(k_emb, (n_class, hidden_dim), jnp.float32)
    linear_w = jax.random.normal(k_w, (output_dim, hidden_dim), jnp.float32) * 0.1
    linear_b = jax.random.normal(k_b, (output_dim,), jnp.float32) * 0.1

    labels = jax.random.randint(k_lab, (B, S), 0, n_class, jnp.int32)

    out = le_forward(labels, embed_table, linear_w, linear_b)
    out = jax.block_until_ready(out)

    # Reference in plain JAX (eval mode: dropout is identity).
    ref = jnp.maximum(embed_table[labels], 0.0) @ linear_w.T + linear_b
    assert out.shape == (B, S, output_dim)
    assert jnp.allclose(out, ref, atol=1e-5), "mismatch vs reference"

    print("KERNEL_OK")
</pallas_src>

<mosaic_0001>
module attributes {stable_mosaic.version = 11 : i64} {
  func.func @le_kernel(%arg0: i32, %arg1: memref<1x1024xi32, #tpu.memory_space<vmem>>, %arg2: memref<128x32xf32, #tpu.memory_space<vmem>>, %arg3: memref<16x32xf32, #tpu.memory_space<vmem>>, %arg4: memref<16x1xf32, #tpu.memory_space<vmem>>, %arg5: memref<16x1024xf32, #tpu.memory_space<vmem>>) attributes {dimension_semantics = [#tpu.dimension_semantics<parallel>], iteration_bounds = array<i64: 1>, scalar_prefetch = 0 : i64, scratch_operands = 0 : i64, tpu.core_type = #tpu.core_type<tc>, window_params = [{transform_indices = @transform_0, window_bounds = array<i64: 1, 1024>}, {pipeline_mode = #tpu.pipeline_mode<synchronous>, transform_indices = @transform_1, window_bounds = array<i64: 128, 32>}, {pipeline_mode = #tpu.pipeline_mode<synchronous>, transform_indices = @transform_2, window_bounds = array<i64: 16, 32>}, {pipeline_mode = #tpu.pipeline_mode<synchronous>, transform_indices = @transform_3, window_bounds = array<i64: 16, 1>}, {transform_indices = @transform_4, window_bounds = array<i64: 16, 1024>}]} {
    %c0 = arith.constant 0 : index
    %c0_0 = arith.constant 0 : index
    %0 = vector.load %arg2[%c0, %c0_0] : memref<128x32xf32, #tpu.memory_space<vmem>>, vector<128x32xf32>
    %cst = arith.constant 0.000000e+00 : f32
    %1 = vector.broadcast %cst : f32 to vector<128x32xf32>
    %2 = arith.maximumf %0, %1 : vector<128x32xf32>
    %c0_1 = arith.constant 0 : index
    %c0_2 = arith.constant 0 : index
    %3 = vector.load %arg3[%c0_1, %c0_2] : memref<16x32xf32, #tpu.memory_space<vmem>>, vector<16x32xf32>
    %cst_3 = arith.constant dense<0.000000e+00> : vector<16x128xf32>
    %4 = tpu.matmul %3, %2, %cst_3 {dimension_numbers = #tpu.dot_dimension_numbers<[1], [1], [0], [0], [0, 0, 1, 0], [], []>, precision = #tpu.contract_precision<fp32>} : vector<16x32xf32>, vector<128x32xf32>, vector<16x128xf32> -> vector<16x128xf32>
    %c0_4 = arith.constant 0 : index
    %c0_5 = arith.constant 0 : index
    %5 = vector.load %arg4[%c0_4, %c0_5] : memref<16x1xf32, #tpu.memory_space<vmem>>, vector<16x1xf32>
    %6 = vector.broadcast %5 : vector<16x1xf32> to vector<16x128xf32>
    %7 = arith.addf %4, %6 : vector<16x128xf32>
    %8 = tpu.iota {dimensions = array<i32: 0>} : vector<128x1024xi32>
    %c0_6 = arith.constant 0 : index
    %c0_7 = arith.constant 0 : index
    %9 = vector.load %arg1[%c0_6, %c0_7] : memref<1x1024xi32, #tpu.memory_space<vmem>>, vector<1x1024xi32>
    %10 = vector.broadcast %9 : vector<1x1024xi32> to vector<128x1024xi32>
    %11 = arith.cmpi eq, %8, %10 : vector<128x1024xi32>
    %12 = arith.extui %11 : vector<128x1024xi1> to vector<128x1024xi32>
    %13 = arith.sitofp %12 : vector<128x1024xi32> to vector<128x1024xf32>
    %cst_8 = arith.constant dense<0.000000e+00> : vector<16x1024xf32>
    %14 = tpu.matmul %7, %13, %cst_8 {dimension_numbers = #tpu.dot_dimension_numbers<[1], [0], [0], [1], [0, 0, 1, 1], [], []>, precision = #tpu.contract_precision<fp32>} : vector<16x128xf32>, vector<128x1024xf32>, vector<16x1024xf32> -> vector<16x1024xf32>
    %c0_9 = arith.constant 0 : index
    %c0_10 = arith.constant 0 : index
    %15 = vector.load %arg5[%c0_9, %c0_10] : memref<16x1024xf32, #tpu.memory_space<vmem>>, vector<16x1024xf32>
    tpu.vector_store %arg5[%c0_9, %c0_10], %14 {strides = array<i32>} : memref<16x1024xf32, #tpu.memory_space<vmem>>, vector<16x1024xf32>,
    return
  }
  func.func @transform_0(%arg0: i32) -> (i32, i32) {
    %c0_i32 = arith.constant 0 : i32
    %c0_i32_0 = arith.constant 0 : i32
    return %c0_i32, %arg0 : i32, i32
  }
  func.func @transform_1(%arg0: i32) -> (i32, i32) {
    %c0_i32 = arith.constant 0 : i32
    %c0_i32_0 = arith.constant 0 : i32
    %c0_i32_1 = arith.constant 0 : i32
    return %c0_i32, %c0_i32_0 : i32, i32
  }
  func.func @transform_2(%arg0: i32) -> (i32, i32) {
    %c0_i32 = arith.constant 0 : i32
    %c0_i32_0 = arith.constant 0 : i32
    %c0_i32_1 = arith.constant 0 : i32
    return %c0_i32, %c0_i32_0 : i32, i32
  }
  func.func @transform_3(%arg0: i32) -> (i32, i32) {
    %c0_i32 = arith.constant 0 : i32
    %c0_i32_0 = arith.constant 0 : i32
    %c0_i32_1 = arith.constant 0 : i32
    return %c0_i32, %c0_i32_0 : i32, i32
  }
  func.func @transform_4(%arg0: i32) -> (i32, i32) {
    %c0_i32 = arith.constant 0 : i32
    %c0_i32_0 = arith.constant 0 : i32
    return %c0_i32, %arg0 : i32, i32
  }
}

</mosaic_0001>

<bundles_post_ra>
// kernel: tpu_custom_call.1
= control target key start
LH: loop header
LB: loop body
LE: loop exit
PB: predicated region body
PF: predicated region fallthrough
CT: control target
= control target key end

     0   :  { %vm64_vm0 = vcmask 261120   ;;  %s10572_s0 = inlined_call_operand.vmem [shape: s32[1,1024], index: 0, kind: input, shape index: {}]   ;;  %s10573_s1 = inlined_call_operand.vmem [shape: f32[128,32], index: 1, kind: input, shape index: {}]   ;;  %s10574_s2 = inlined_call_operand.vmem [shape: f32[16,32], index: 2, kind: input, shape index: {}]   ;;  %s10575_s3 = inlined_call_operand.vmem [shape: f32[16,1], index: 3, kind: input, shape index: {}]   ;;  %s10576_s4 = inlined_call_operand.hbm [shape: f32[16,1024], index: 4, kind: output, shape index: {}]  }
   0x1   :  { %v18_v0 = vld [vmem:[%s10573_s1] sm:$0xff]  ;;  %v19_v1 = vld [vmem:[%s10573_s1 + $0x8] sm:$0xff]  ;;  %v20_v2 = vld [vmem:[%s10573_s1 + $0x10] sm:$0xff] }
   0x2   :  { %v34_v3 = vmax.f32 %v18_v0, 0.0  ;;  %v35_v4 = vmax.f32 %v19_v1, 0.0  ;;  %v21_v5 = vld [vmem:[%s10573_s1 + $0x18] sm:$0xff]  ;;  %v36_v6 = vmax.f32 %v20_v2, 0.0  ;;  %v22_v7 = vld [vmem:[%s10573_s1 + $0x20] sm:$0xff]  ;;  %v23_v8 = vld [vmem:[%s10573_s1 + $0x28] sm:$0xff] }
   0x3   :  { %v37_v9 = vmax.f32 %v21_v5, 0.0  ;;  %v38_v10 = vmax.f32 %v22_v7, 0.0  ;;  %v39_v14 = vmax.f32 %v23_v8, 0.0 }
   0x4   :  { %v72_v11 = vsel %vm64_vm0, %v34_v3, 0  ;;  %v75_v12 = vsel %vm64_vm0, %v35_v4, 0  ;;  %v78_v13 = vsel %vm64_vm0, %v36_v6, 0 }
   0x5   :  { %v120_v15 = vand.u32 4294901760, %v72_v11  ;;  %v123_v16 = vand.u32 4294901760, %v75_v12  ;;  %v81_v17 = vsel %vm64_vm0, %v37_v9, 0  ;;  %v126_v18 = vand.u32 4294901760, %v78_v13 }
   0x6   :  { %v129_v19 = vand.u32 4294901760, %v81_v17  ;;  %v84_v22 = vsel %vm64_vm0, %v38_v10, 0  ;;  %v87_v23 = vsel %vm64_vm0, %v39_v14, 0 }
   0x7   :  { %v6852_v20 = vpack.c.bf16 %v123_v16, %v120_v15 }
   0x8   :  { %v6854_v21 = vpack.c.bf16 %v129_v19, %v126_v18 }
   0x9   :  { %9 = vsyncpa [#allocation3], 0  ;;  %5716 = vmatprep.subr.bf16.mxu0 %v6852_v20  ;;  %v24_v24 = vld [vmem:[%s10573_s1 + $0x30] sm:$0xff]  ;;  %v25_v25 = vld [vmem:[%s10573_s1 + $0x38] sm:$0xff]  ;;  %v132_v26 = vand.u32 4294901760, %v84_v22  ;;  %v135_v27 = vand.u32 4294901760, %v87_v23  ;;  %v6914_v62 = vsub.f32 %v72_v11, %v120_v15  ;;  %v6916_v63 = vsub.f32 %v75_v12, %v123_v16 }
   0xa   :  { %5718 = vmatpush3.bf16.xpose.msra.mxu0 %v6852_v20  ;;  %v50_v28 = vld [vmem:[%s10574_s2] sm:$0xff]  ;;  %v40_v29 = vmax.f32 %v24_v24, 0.0  ;;  %v41_v30 = vmax.f32 %v25_v25, 0.0  ;;  %v27_v37 = vld [vmem:[%s10573_s1 + $0x48] sm:$0xff]  ;;  %v28_v45 = vld [vmem:[%s10573_s1 + $0x50] sm:$0xff]  ;;  %v6918_v0 = vsub.f32 %v78_v13, %v126_v18  ;;  %v6920_v1 = vsub.f32 %v81_v17, %v129_v19 }
   0xb   :  { %5720 = vmatprep.subr.bf16.mxu0 %v6854_v21  ;;  %v66_v31 = vsel %vm64_vm0, %v50_v28, 0  ;;  %v6871_v32 = vpack.c.bf16 %v135_v27, %v132_v26  ;;  %v26_v36 = vld [vmem:[%s10573_s1 + $0x40] sm:$0xff]  ;;  %v43_v43 = vmax.f32 %v27_v37, 0.0  ;;  %v29_v46 = vld [vmem:[%s10573_s1 + $0x58] sm:$0xff]  ;;  %v44_v51 = vmax.f32 %v28_v45, 0.0  ;;  %v31_v61 = vld [vmem:[%s10573_s1 + $0x68] sm:$0xff] }
   0xc   :  { %v6873_v33 = vand.u32 4294901760, %v66_v31  ;;  %v90_v34 = vsel %vm64_vm0, %v40_v29, 0  ;;  %v93_v35 = vsel %vm64_vm0, %v41_v30, 0  ;;  %v42_v42 = vmax.f32 %v26_v36, 0.0  ;;  %v30_v60 = vld [vmem:[%s10573_s1 + $0x60] sm:$0xff]  ;;  %v51_v30 = vld [vmem:[%s10574_s2 + $0x8] sm:$0xff] }
   0xd   :  { %v138_v39 = vand.u32 4294901760, %v90_v34  ;;  %v141_v40 = vand.u32 4294901760, %v93_v35  ;;  %v99_v50 = vsel %vm64_vm0, %v43_v43, 0  ;;  %v45_v52 = vmax.f32 %v29_v46, 0.0 }
   0xe   :  { %v6884_v38 = vsub.f32 %v66_v31, %v6873_v33  ;;  %v96_v49 = vsel %vm64_vm0, %v42_v42, 0  ;;  %v147_v54 = vand.u32 4294901760, %v99_v50  ;;  %v102_v55 = vsel %vm64_vm0, %v44_v51, 0 }
   0xf   :  { %v6898_v47 = vpack.c.bf16 %v141_v40, %v138_v39  ;;  %v144_v53 = vand.u32 4294901760, %v96_v49  ;;  %v105_v56 = vsel %vm64_vm0, %v45_v52, 0  ;;  %v150_v58 = vand.u32 4294901760, %v102_v55 }
  0x10   :  { %v202_v41 = vand.u32 4294901760, %v6884_v38  ;;  %v153_v59 = vand.u32 4294901760, %v105_v56  ;;  %v6923_v2 = vsub.f32 %v84_v22, %v132_v26  ;;  %v6925_v3 = vsub.f32 %v87_v23, %v135_v27  ;;  %v32_v22 = vld [vmem:[%s10573_s1 + $0x70] sm:$0xff]  ;;  %v33_v23 = vld [vmem:[%s10573_s1 + $0x78] sm:$0xff] }
  0x11   :  { %v6906_v57 = vpack.c.bf16 %v147_v54, %v144_v53  ;;  %v6927_v4 = vsub.f32 %v90_v34, %v138_v39  ;;  %v6929_v5 = vsub.f32 %v93_v35, %v141_v40  ;;  %v6932_v6 = vsub.f32 %v96_v49, %v144_v53 }
  0x12   :  { %5722 = vmatpush3.bf16.xpose.msra.mxu0 %v6854_v21  ;;  %v203_v44 = vsub.f32 %v6884_v38, %v202_v41  ;;  %v6934_v7 = vsub.f32 %v99_v50, %v147_v54  ;;  %v6938_v8 = vpack.c.bf16 %v6916_v63, %v6914_v62  ;;  %v6942_v9 = vpack.c.bf16 %v6920_v1, %v6918_v0 }
  0x13   :  { %5724 = vmatprep.subr.bf16.mxu0 %v6871_v32  ;;  %v46_v10 = vmax.f32 %v30_v60, 0.0  ;;  %v47_v11 = vmax.f32 %v31_v61, 0.0  ;;  %v6946_v12 = vpack.c.bf16 %v6925_v3, %v6923_v2  ;;  %v6950_v13 = vpack.c.bf16 %v6929_v5, %v6927_v4 }
  0x14   :  { %v204_v48 = vand.u32 4294901760, %v203_v44  ;;  %v6954_v14 = vpack.c.bf16 %v6934_v7, %v6932_v6  ;;  %v6956_v15 = vpack.c.bf16 %v153_v59, %v150_v58  ;;  %v6960_v18 = vsub.f32 %v102_v55, %v150_v58 }
  0x15   :  { %v108_v16 = vsel %vm64_vm0, %v46_v10, 0  ;;  %v111_v17 = vsel %vm64_vm0, %v47_v11, 0  ;;  %v6962_v19 = vsub.f32 %v105_v56, %v153_v59  ;;  %v48_v27 = vmax.f32 %v32_v22, 0.0 }
  0x16   :  { %5537 = vmatprep.mubr.f32.mxu0 %v204_v48  ;;  %v156_v25 = vand.u32 4294901760, %v108_v16  ;;  %v159_v26 = vand.u32 4294901760, %v111_v17  ;;  %v49_v28 = vmax.f32 %v33_v23, 0.0  ;;  %v69_v37 = vsel %vm64_vm0, %v51_v30, 0 }
  0x17   :  { %v6973_v24 = vpack.c.bf16 %v6962_v19, %v6960_v18  ;;  %v114_v31 = vsel %vm64_vm0, %v48_v27, 0  ;;  %v223_v43 = vand.u32 4294901760, %v6914_v62  ;;  %v230_v44 = vand.u32 4294901760, %v6916_v63 }
  0x18   :  { %v6976_v29 = vpack.c.bf16 %v159_v26, %v156_v25  ;;  %v117_v34 = vsel %vm64_vm0, %v49_v28, 0  ;;  %v6983_v35 = vsub.f32 %v108_v16, %v156_v25  ;;  %v6985_v36 = vsub.f32 %v111_v17, %v159_v26 }
  0x19   :  { %v162_v40 = vand.u32 4294901760, %v114_v31  ;;  %v165_v42 = vand.u32 4294901760, %v117_v34  ;;  %v6996_v45 = vand.u32 4294901760, %v69_v37  ;;  %v224_v48 = vsub.f32 %v6914_v62, %v223_v43 }
  0x1a   :  { %5726 = vmatpush3.bf16.xpose.msra.mxu0 %v6871_v32  ;;  %v6991_v39 = vpack.c.bf16 %v6985_v36, %v6983_v35  ;;  %v231_v49 = vsub.f32 %v6916_v63, %v230_v44  ;;  %v237_v56 = vand.u32 4294901760, %v6918_v0  ;;  %v244_v58 = vand.u32 4294901760, %v6920_v1 }
  0x1b   :  { %5728 = vmatprep.subr.bf16.mxu0 %v6898_v47  ;;  %v6998_v46 = vpack.c.bf16 %v165_v42, %v162_v40  ;;  %v7006_v50 = vsub.f32 %v114_v31, %v162_v40  ;;  %v7008_v51 = vsub.f32 %v117_v34, %v165_v42  ;;  %v7011_v52 = vsub.f32 %v69_v37, %v6996_v45 }
  0x1c   :  { %v225_v54 = vand.u32 4294901760, %v224_v48  ;;  %v232_v55 = vand.u32 4294901760, %v231_v49  ;;  %v238_v61 = vsub.f32 %v6918_v0, %v237_v56  ;;  %v245_v10 = vsub.f32 %v6920_v1, %v244_v58  ;;  %v7137_v0 = vld [vmem:[%s10572_s0] sm:$0xff] }
  0x1d   :  { %v7016_v53 = vpack.c.bf16 %v7008_v51, %v7006_v50  ;;  %v212_v59 = vand.u32 4294901760, %v7011_v52  ;;  %v251_v22 = vand.u32 4294901760, %v6923_v2  ;;  %v258_v23 = vand.u32 4294901760, %v6925_v3 }
  0x1e   :  { %v5747_v60 = vpack.c.bf16 %v232_v55, %v225_v54  ;;  %v239_v16 = vand.u32 4294901760, %v238_v61  ;;  %v246_v17 = vand.u32 4294901760, %v245_v10  ;;  %v265_v34 = vand.u32 4294901760, %v6927_v4 }
  0x1f   :  { %v213_v11 = vsub.f32 %v7011_v52, %v212_v59  ;;  %v252_v27 = vsub.f32 %v6923_v2, %v251_v22  ;;  %v259_v28 = vsub.f32 %v6925_v3, %v258_v23  ;;  %v272_v37 = vand.u32 4294901760, %v6929_v5 }
  0x20   :  { %v5751_v26 = vpack.c.bf16 %v246_v17, %v239_v16  ;;  %v266_v42 = vsub.f32 %v6927_v4, %v265_v34  ;;  %v279_v55 = vand.u32 4294901760, %v6932_v6  ;;  %v6799_v62 = vmov 0  }
  0x21   :  { %v214_v25 = vand.u32 4294901760, %v213_v11  ;;  %v253_v30 = vand.u32 4294901760, %v252_v27  ;;  %v260_v31 = vand.u32 4294901760, %v259_v28  ;;  %v273_v48 = vsub.f32 %v6929_v5, %v272_v37  ;;  %6773 = vset.pattern.permute.xlu0 %v6799_v62 }
  0x22   :  { %5730 = vmatpush3.bf16.xpose.msra.mxu0 %v6898_v47  ;;  %v267_v49 = vand.u32 4294901760, %v266_v42  ;;  %v280_v10 = vsub.f32 %v6932_v6, %v279_v55  ;;  %v307_v42 = vand.u32 4294901760, %v6983_v35  ;;  %v10677_v1 = vmov 0.0  }
  0x23   :  { %5732 = vmatprep.subr.bf16.mxu0 %v6906_v57  ;;  %v5755_v40 = vpack.c.bf16 %v260_v31, %v253_v30  ;;  %v274_v54 = vand.u32 4294901760, %v273_v48  ;;  %v10577_v48 = vand.u32 4294901760, %v6985_v36  ;;  %1333 = vmatprep.mubr.f32.mxu1 %v10677_v1  ;;  %v11024_v2 = vmov 0 }
  0x24   :  { %v281_v16 = vand.u32 4294901760, %v280_v10  ;;  %v10637_v3 = vmov 1.0|1.0  }
  0x25   :  { %v5759_v61 = vpack.c.bf16 %v274_v54, %v267_v49  ;;  %v308_v54 = vsub.f32 %v6983_v35, %v307_v42  ;;  %v315_v10 = vsub.f32 %v6985_v36, %v10577_v48  ;;  %v11060_v35 = vmov 0 }
  0x2a   :  { %5734 = vmatpush3.bf16.xpose.msra.mxu0 %v6906_v57 }
  0x2b   :  { %5736 = vmatprep.subr.bf16.mxu0 %v6956_v15 }
  0x32   :  { %5738 = vmatpush3.bf16.xpose.msra.mxu0 %v6956_v15 }
  0x33   :  { %5740 = vmatprep.subr.bf16.mxu0 %v6976_v29 }
  0x3a   :  { %5742 = vmatpush3.bf16.xpose.msra.mxu0 %v6976_v29 }
  0x3b   :  { %5744 = vmatprep.subr.bf16.mxu0 %v6998_v46 }
  0x42   :  { %5746 = vmatpush3.bf16.xpose.msra.mxu0 %v6998_v46 }
  0x43   :  { %5748 = vmatprep.subr.bf16.mxu0 %v5747_v60 }
  0x49   :  { %5538 = vmatmul.mubr.f32.vlgmr.msra.gmra.mrb[0].mxu0 %v214_v25  ;;  %v293_v25 = vand.u32 4294901760, %v6960_v18 }
  0x4a   :  { %5750 = vmatpush3.bf16.xpose.msra.mxu0 %v5747_v60  ;;  %5572 = vmatprep.mubr.f32.mxu0 %v6873_v33  ;;  %v286_v60 = vand.u32 4294901760, %v6934_v7 }
  0x4b   :  { %5752 = vmatprep.subr.bf16.mxu0 %v5751_v26  ;;  %v294_v28 = vsub.f32 %v6960_v18, %v293_v25  ;;  %v11051_v18 = vmov 0 }
  0x4c   :  { %v287_v11 = vsub.f32 %v6934_v7, %v286_v60  ;;  %v11044_v7 = vmov 0 }
  0x4d   :  { %v295_v31 = vand.u32 4294901760, %v294_v28 }
  0x4e   :  { %v288_v17 = vand.u32 4294901760, %v287_v11  ;;  %v309_v11 = vand.u32 4294901760, %v308_v54  ;;  %v11090_v54 = vmov 0 }
  0x50   :  { %v5763_v27 = vpack.c.bf16 %v288_v17, %v281_v16  ;;  %v321_v16 = vand.u32 4294901760, %v7006_v50  ;;  %v328_v17 = vand.u32 4294901760, %v7008_v51 }
  0x52   :  { %5754 = vmatpush3.bf16.xpose.msra.mxu0 %v5751_v26  ;;  %v300_v26 = vand.u32 4294901760, %v6962_v19 }
  0x53   :  { %5756 = vmatprep.subr.bf16.mxu0 %v5755_v40 }
  0x54   :  { %v301_v30 = vsub.f32 %v6962_v19, %v300_v26 }
  0x5a   :  { %5758 = vmatpush3.bf16.xpose.msra.mxu0 %v5755_v40  ;;  %v302_v40 = vand.u32 4294901760, %v301_v30  ;;  %v322_v30 = vsub.f32 %v7006_v50, %v321_v16  ;;  %v11081_v50 = vmov 0 }
  0x5b   :  { %5760 = vmatprep.subr.bf16.mxu0 %v5759_v61 }
  0x5c   :  { %v5767_v49 = vpack.c.bf16 %v302_v40, %v295_v31  ;;  %v329_v31 = vsub.f32 %v7008_v51, %v328_v17  ;;  %v323_v40 = vand.u32 4294901760, %v322_v30  ;;  %v11084_v51 = vmov 0 }
  0x62   :  { %5762 = vmatpush3.bf16.xpose.msra.mxu0 %v5759_v61  ;;  %v316_v61 = vand.u32 4294901760, %v315_v10 }
  0x63   :  { %5764 = vmatprep.subr.bf16.mxu0 %v5763_v27 }
  0x64   :  { %v5771_v28 = vpack.c.bf16 %v316_v61, %v309_v11 }
  0x6a   :  { %5766 = vmatpush3.bf16.xpose.msra.mxu0 %v5763_v27  ;;  %v330_v27 = vand.u32 4294901760, %v329_v31 }
  0x6b   :  { %5768 = vmatprep.subr.bf16.mxu0 %v5767_v49 }
  0x6c   :  { %v5775_v48 = vpack.c.bf16 %v330_v27, %v323_v40 }
  0x72   :  { %5770 = vmatpush3.bf16.xpose.msra.mxu0 %v5767_v49  ;;  %v11057_v49 = vmov 0 }
  0x73   :  { %5772 = vmatprep.subr.bf16.mxu0 %v5771_v28 }
  0x7a   :  { %5774 = vmatpush3.bf16.xpose.msra.mxu0 %v5771_v28 }
  0x7b   :  { %5776 = vmatprep.subr.bf16.mxu0 %v5775_v48 }
  0x82   :  { %5778 = vmatpush3.bf16.xpose.msra.mxu0 %v5775_v48 }
  0x83   :  { %5780 = vmatprep.subr.bf16.mxu0 %v6938_v8 }
  0x89   :  { %5573 = vmatmul.mubr.f32.vlgmr.msra.gmra.mrb[0].mxu0 %v6996_v45 }
  0x8a   :  { %5782 = vmatpush3.bf16.xpose.msra.mxu0 %v6938_v8  ;;  %5607 = vmatprep.mubr.f32.mxu0 %v6884_v38  ;;  %v5843_v38 = vpack.c.bf16 %v230_v44, %v223_v43  ;;  %v52_v8 = vld [vmem:[%s10575_s3] sm:$0xff] }
  0x8b   :  { %5784 = vmatprep.subr.bf16.mxu0 %v6942_v9  ;;  %56 = vperm.xlu0 %6773, %v52_v8  }
  0x92   :  { %5786 = vmatpush3.bf16.xpose.msra.mxu0 %v6942_v9  ;;  %v803_v9 = vlaneseq }
  0x93   :  { %5788 = vmatprep.subr.bf16.mxu0 %v6946_v12 }
  0x94   :  { %v7132_v63 = vshrl.u32 %v803_v9, 7 }
  0x96   :  { %11022 = vst [vmem:[#allocation5_spill] sm:$0xff] %v7132_v63  ;;  %v7220_v4 = vadd.s32 32, %v7132_v63  ;;  %v7223_v5 = vadd.s32 40, %v7132_v63  ;;  %v7266_v6 = vadd.s32 48, %v7132_v63  ;;  %v7325_v19 = vadd.s32 64, %v7132_v63 }
  0x98   :  { %11035 = vst [vmem:[#allocation12_spill] sm:$0xff] %v7220_v4  ;;  %11036 = vst [vmem:[#allocation13_spill] sm:$0xff] %v7223_v5 }
  0x99   :  { %11043 = vst [vmem:[#allocation16_spill] sm:$0xff] %v7266_v6  ;;  %11054 = vst [vmem:[#allocation21_spill] sm:$0xff] %v7325_v19 }
  0x9a   :  { %5790 = vmatpush3.bf16.xpose.msra.mxu0 %v6946_v12  ;;  %v53_v12 = vld [vmem:[%s10575_s3 + $0x8] sm:$0xff] }
  0x9b   :  { %5792 = vmatprep.subr.bf16.mxu0 %v6950_v13  ;;  %61 = vperm.xlu0 %6773, %v53_v12  }
  0xa2   :  { %5794 = vmatpush3.bf16.xpose.msra.mxu0 %v6950_v13  ;;  %v7144_v13 = vadd.s32 8, %v7132_v63 }
  0xa3   :  { %5796 = vmatprep.subr.bf16.mxu0 %v6954_v14 }
  0xa4   :  { %11023 = vst [vmem:[#allocation6_spill] sm:$0xff] %v7144_v13 }
  0xaa   :  { %5798 = vmatpush3.bf16.xpose.msra.mxu0 %v6954_v14  ;;  %v827_v14 = vsub.s32 1, %v7132_v63 }
  0xab   :  { %5800 = vmatprep.subr.bf16.mxu0 %v6973_v24 }
  0xac   :  { %v7153_v43 = vrot.slane %v7137_v0, %v827_v14 }
  0xae   :  { %vm10591_vm1 = vcmp.eq.s32.totalorder %v7132_v63, %v7153_v43  ;;  %vm10590_vm2 = vcmp.eq.s32.totalorder %v7144_v13, %v7153_v43  ;;  %vm10580_vm13 = vcmp.eq.s32.totalorder %v7220_v4, %v7153_v43  ;;  %vm10579_vm14 = vcmp.eq.s32.totalorder %v7223_v5, %v7153_v43 }
  0xaf   :  { %vm7168_vm3 = vmpackc.low %vm10590_vm2, %vm10591_vm1 }
  0xb0   :  { %v11025_v2 = vsel %vm7168_vm3, 4294967295, %v11024_v2  ;;  %5908 = vmatprep.subr.msk.bf16.mxu1 %vm7168_vm3, %v10637_v3  ;;  %vm7256_vm15 = vmpackc.low %vm10579_vm14, %vm10580_vm13  ;;  %vm10586_vm13 = vcmp.eq.s32.totalorder %v7266_v6, %v7153_v43 }
  0xb1   :  { %11026 = vst [vmem:[#allocation7_spill] sm:$0xff] %v11025_v2 }
  0xb2   :  { %5802 = vmatpush3.bf16.xpose.msra.mxu0 %v6973_v24  ;;  %v823_v24 = vsub.s32 0, %v7132_v63 }
  0xb3   :  { %5804 = vmatprep.subr.bf16.mxu0 %v6991_v39 }
  0xb4   :  { %v7156_v44 = vrot.slane %v7137_v0, %v823_v24 }
  0xb6   :  { %vm10599_vm4 = vcmp.eq.s32.totalorder %v7132_v63, %v7156_v44  ;;  %vm10596_vm5 = vcmp.eq.s32.totalorder %v7144_v13, %v7156_v44  ;;  %vm10583_vm0 = vcmp.eq.s32.totalorder %v7220_v4, %v7156_v44 }
  0xb7   :  { %vm7191_vm6 = vmpackc.low %vm10596_vm5, %vm10599_vm4 }
  0xb8   :  { %5910 = vmatpush1.bf16.msk.msra.mxu1 %vm7191_vm6, %v10637_v3 }
  0xba   :  { %5806 = vmatpush3.bf16.xpose.msra.mxu0 %v6991_v39  ;;  %v5851_v39 = vpack.c.bf16 %v258_v23, %v251_v22  ;;  %v11037_v22 = vmov 0  ;;  %v5859_v23 = vpack.c.bf16 %v286_v60, %v279_v55  ;;  %v5863_v55 = vpack.c.bf16 %v300_v26, %v293_v25 }
  0xbb   :  { %5808 = vmatprep.subr.bf16.mxu0 %v7016_v53  ;;  %v11048_v60 = vmov 0  ;;  %v7328_v25 = vadd.s32 72, %v7132_v63  ;;  %v11056_v26 = vand.u32 4294901760, %v6985_v36  ;;  %v5871_v36 = vpack.c.bf16 %v328_v17, %v321_v16 }
  0xbd   :  { %11055 = vst [vmem:[#allocation22_spill] sm:$0xff] %v7328_v25  ;;  %v5867_v48 = vpack.c.bf16 %v11056_v26, %v307_v42  ;;  %vm10593_vm2 = vcmp.eq.s32.totalorder %v7328_v25, %v7156_v44  ;;  %v11087_v42 = vmov 0 }
  0xc2   :  { %5810 = vmatpush3.bf16.xpose.msra.mxu0 %v7016_v53  ;;  %v7179_v53 = vadd.s32 24, %v7132_v63 }
  0xc3   :  { %5812 = vmatprep.subr.bf16.mxu0 %v6852_v20 }
  0xc4   :  { %11028 = vst [vmem:[#allocation9_spill] sm:$0xff] %v7179_v53  ;;  %vm10578_vm8 = vcmp.eq.s32.totalorder %v7179_v53, %v7153_v43  ;;  %vm10581_vm11 = vcmp.eq.s32.totalorder %v7179_v53, %v7156_v44 }
  0xc9   :  { %5608 = vmatmul.mubr.f32.vlgmr.msra.gmra.mrb[0].mxu0 %v7011_v52  ;;  %v7176_v52 = vadd.s32 16, %v7132_v63 }
  0xca   :  { %5814 = vmatpush3.bf16.xpose.msra.mxu0 %v6852_v20  ;;  %5642 = vmatprep.mubr.f32.mxu0 %v202_v41  ;;  %v5847_v41 = vpack.c.bf16 %v244_v58, %v237_v56  ;;  %v11029_v56 = vmov 0  ;;  %v5855_v58 = vpack.c.bf16 %v272_v37, %v265_v34  ;;  %v11040_v34 = vmov 0 }
  0xcb   :  { %5816 = vmatprep.subr.bf16.mxu0 %v6854_v21  ;;  %11027 = vst [vmem:[#allocation8_spill] sm:$0xff] %v7176_v52  ;;  %v11030_v56 = vsel %vm7191_vm6, 4294967295, %v11029_v56  ;;  %vm10589_vm7 = vcmp.eq.s32.totalorder %v7176_v52, %v7153_v43  ;;  %vm10584_vm10 = vcmp.eq.s32.totalorder %v7176_v52, %v7156_v44  ;;  %v11041_v34 = vsel %vm7256_vm15, 4294967295, %v11040_v34 }
  0xcc   :  { %11031 = vst [vmem:[#allocation10_spill] sm:$0xff] %v11030_v56  ;;  %vm7212_vm9 = vmpackc.low %vm10578_vm8, %vm10589_vm7  ;;  %vm10582_vm8 = vcmp.eq.s32.totalorder %v7223_v5, %v7156_v44  ;;  %v7284_v37 = vadd.s32 56, %v7132_v63 }
  0xcd   :  { %5912 = vmatprep.subr.msk.bf16.mxu1 %vm7212_vm9, %v10637_v3  ;;  %vm7235_vm12 = vmpackc.low %vm10581_vm11, %vm10584_vm10  ;;  %11042 = vst [vmem:[#allocation15_spill] sm:$0xff] %v11041_v34 }
  0xce   :  { %v11038_v22 = vsel %vm7235_vm12, 4294967295, %v11037_v22  ;;  %5914 = vmatpush1.bf16.msk.msra.mxu1 %vm7235_vm12, %v10637_v3  ;;  %vm7276_vm14 = vmpackc.low %vm10582_vm8, %vm10583_vm0  ;;  %11047 = vst [vmem:[#allocation18_spill] sm:$0xff] %v7284_v37  ;;  %vm10585_vm11 = vcmp.eq.s32.totalorder %v7284_v37, %v7153_v43  ;;  %vm10588_vm0 = vcmp.eq.s32.totalorder %v7266_v6, %v7156_v44  ;;  %vm10587_vm10 = vcmp.eq.s32.totalorder %v7284_v37, %v7156_v44 }
  0xcf   :  { %11039 = vst [vmem:[#allocation14_spill] sm:$0xff] %v11038_v22  ;;  %5916 = vmatprep.subr.msk.bf16.mxu1 %vm7256_vm15, %v10637_v3  ;;  %v11045_v7 = vsel %vm7276_vm14, 4294967295, %v11044_v7  ;;  %vm7300_vm8 = vmpackc.low %vm10585_vm11, %vm10586_vm13  ;;  %vm10595_vm13 = vcmp.eq.s32.totalorder %v7325_v19, %v7153_v43  ;;  %v11162_v22 = vmov 0 }
  0xd0   :  { %11046 = vst [vmem:[#allocation17_spill] sm:$0xff] %v11045_v7  ;;  %v11049_v60 = vsel %vm7300_vm8, 4294967295, %v11048_v60  ;;  %vm7317_vm11 = vmpackc.low %vm10587_vm10, %vm10588_vm0  ;;  %vm10592_vm10 = vcmp.eq.s32.totalorder %v7328_v25, %v7153_v43  ;;  %vm10594_vm0 = vcmp.eq.s32.totalorder %v7325_v19, %v7156_v44 }
  0xd1   :  { %11050 = vst [vmem:[#allocation19_spill] sm:$0xff] %v11049_v60  ;;  %v11052_v18 = vsel %vm7317_vm11, 4294967295, %v11051_v18  ;;  %vm7346_vm7 = vmpackc.low %vm10592_vm10, %vm10595_vm13 }
  0xd2   :  { %5818 = vmatpush3.bf16.xpose.msra.mxu0 %v6854_v21  ;;  %5918 = vmatpush1.bf16.msk.msra.mxu1 %vm7276_vm14, %v10637_v3  ;;  %11053 = vst [vmem:[#allocation20_spill] sm:$0xff] %v11052_v18  ;;  %v11058_v49 = vsel %vm7346_vm7, 4294967295, %v11057_v49  ;;  %vm7361_vm1 = vmpackc.low %vm10593_vm2, %vm10594_vm0 }
  0xd3   :  { %5820 = vmatprep.subr.bf16.mxu0 %v6871_v32  ;;  %5920 = vmatprep.subr.msk.bf16.mxu1 %vm7300_vm8, %v10637_v3  ;;  %11059 = vst [vmem:[#allocation23_spill] sm:$0xff] %v11058_v49  ;;  %v11061_v35 = vsel %vm7361_vm1, 4294967295, %v11060_v35 }
  0xd4   :  { %11062 = vst [vmem:[#allocation24_spill] sm:$0xff] %v11061_v35 }
  0xd6   :  { %5922 = vmatpush1.bf16.msk.msra.mxu1 %vm7317_vm11, %v10637_v3 }
  0xd7   :  { %5924 = vmatprep.subr.msk.bf16.mxu1 %vm7346_vm7, %v10637_v3 }
  0xda   :  { %5822 = vmatpush3.bf16.xpose.msra.mxu0 %v6871_v32  ;;  %5926 = vmatpush1.bf16.msk.msra.mxu1 %vm7361_vm1, %v10637_v3 }
  0xdb   :  { %5824 = vmatprep.subr.bf16.mxu0 %v6898_v47 }
  0xe2   :  { %5826 = vmatpush3.bf16.xpose.msra.mxu0 %v6898_v47 }
  0xe3   :  { %5828 = vmatprep.subr.bf16.mxu0 %v6906_v57 }
  0xea   :  { %5830 = vmatpush3.bf16.xpose.msra.mxu0 %v6906_v57 }
  0xeb   :  { %5832 = vmatprep.subr.bf16.mxu0 %v6956_v15 }
  0xf2   :  { %5834 = vmatpush3.bf16.xpose.msra.mxu0 %v6956_v15 }
  0xf3   :  { %5836 = vmatprep.subr.bf16.mxu0 %v6976_v29 }
  0xfa   :  { %5838 = vmatpush3.bf16.xpose.msra.mxu0 %v6976_v29 }
  0xfb   :  { %5840 = vmatprep.subr.bf16.mxu0 %v6998_v46 }
 0x102   :  { %5842 = vmatpush3.bf16.xpose.msra.mxu0 %v6998_v46 }
 0x103   :  { %5844 = vmatprep.subr.bf16.mxu0 %v5843_v38 }
 0x109   :  { %5643 = vmatmul.mubr.f32.vlgmr.msra.gmra.mrb[0].mxu0 %v212_v59  ;;  %v11032_v59 = vmov 0 }
 0x10a   :  { %5846 = vmatpush3.bf16.xpose.msra.mxu0 %v5843_v38  ;;  %5677 = vmatprep.mubr.f32.mxu0 %v6873_v33  ;;  %v11033_v59 = vsel %vm7212_vm9, 4294967295, %v11032_v59 }
 0x10b   :  { %5848 = vmatprep.subr.bf16.mxu0 %v5847_v41  ;;  %11034 = vst [vmem:[#allocation11_spill] sm:$0xff] %v11033_v59 }
 0x112   :  { %5850 = vmatpush3.bf16.xpose.msra.mxu0 %v5847_v41 }
 0x113   :  { %5852 = vmatprep.subr.bf16.mxu0 %v5851_v39 }
 0x11a   :  { %5854 = vmatpush3.bf16.xpose.msra.mxu0 %v5851_v39 }
 0x11b   :  { %5856 = vmatprep.subr.bf16.mxu0 %v5855_v58 }
 0x122   :  { %5858 = vmatpush3.bf16.xpose.msra.mxu0 %v5855_v58 }
 0x123   :  { %5860 = vmatprep.subr.bf16.mxu0 %v5859_v23 }
 0x12a   :  { %5862 = vmatpush3.bf16.xpose.msra.mxu0 %v5859_v23 }
 0x12b   :  { %5864 = vmatprep.subr.bf16.mxu0 %v5863_v55 }
 0x132   :  { %5866 = vmatpush3.bf16.xpose.msra.mxu0 %v5863_v55 }
 0x133   :  { %5868 = vmatprep.subr.bf16.mxu0 %v5867_v48 }
 0x13a   :  { %5870 = vmatpush3.bf16.xpose.msra.mxu0 %v5867_v48 }
 0x13b   :  { %5872 = vmatprep.subr.bf16.mxu0 %v5871_v36 }
 0x142   :  { %5874 = vmatpush3.bf16.xpose.msra.mxu0 %v5871_v36 }
 0x143   :  { %5876 = vmatprep.subr.bf16.mxu0 %v6852_v20 }
 0x149   :  { %5678 = vmatmul.mubr.f32.vlgmr.msra.gmra.mrb[0].mxu0 %v6996_v45 }
 0x14a   :  { %5878 = vmatpush3.bf16.xpose.msra.mxu0 %v6852_v20  ;;  %5712 = vmatprep.mubr.f32.mxu0 %v6873_v33  ;;  %v843_v20 = vsub.s32 5, %v7132_v63  ;;  %v11063_v33 = vmov 0 }
 0x14b   :  { %5880 = vmatprep.subr.bf16.mxu0 %v6854_v21 }
 0x152   :  { %5882 = vmatpush3.bf16.xpose.msra.mxu0 %v6854_v21  ;;  %v7389_v21 = vrot.slane %v7137_v0, %v843_v20 }
 0x153   :  { %5884 = vmatprep.subr.bf16.mxu0 %v6871_v32 }
 0x154   :  { %vm10598_vm10 = vcmp.eq.s32.totalorder %v7132_v63, %v7389_v21  ;;  %vm10597_vm2 = vcmp.eq.s32.totalorder %v7144_v13, %v7389_v21 }
 0x155   :  { %vm7404_vm0 = vmpackc.low %vm10597_vm2, %vm10598_vm10  ;;  %vm10609_vm2 = vcmp.eq.s32.totalorder %v7176_v52, %v7389_v21  ;;  %vm10608_vm10 = vcmp.eq.s32.totalorder %v7179_v53, %v7389_v21 }
 0x156   :  { %v11064_v33 = vsel %vm7404_vm0, 4294967295, %v11063_v33  ;;  %vm7439_vm1 = vmpackc.low %vm10608_vm10, %vm10609_vm2 }
 0x157   :  { %11065 = vst [vmem:[#allocation25_spill] sm:$0xff] %v11064_v33 }
 0x15a   :  { %5886 = vmatpush3.bf16.xpose.msra.mxu0 %v6871_v32  ;;  %v839_v32 = vsub.s32 4, %v7132_v63 }
 0x15b   :  { %5888 = vmatprep.subr.bf16.mxu0 %v6898_v47 }
 0x162   :  { %5890 = vmatpush3.bf16.xpose.msra.mxu0 %v6898_v47  ;;  %v7409_v47 = vrot.slane %v7137_v0, %v839_v32 }
 0x163   :  { %5892 = vmatprep.subr.bf16.mxu0 %v6906_v57 }
 0x164   :  { %vm10607_vm13 = vcmp.eq.s32.totalorder %v7132_v63, %v7409_v47  ;;  %vm10606_vm5 = vcmp.eq.s32.totalorder %v7144_v13, %v7409_v47  ;;  %vm10615_vm7 = vcmp.eq.s32.totalorder %v7176_v52, %v7409_v47  ;;  %vm10614_vm11 = vcmp.eq.s32.totalorder %v7179_v53, %v7409_v47 }
 0x165   :  { %vm7429_vm4 = vmpackc.low %vm10606_vm5, %vm10607_vm13  ;;  %vm10617_vm5 = vcmp.eq.s32.totalorder %v7220_v4, %v7389_v21  ;;  %vm10616_vm13 = vcmp.eq.s32.totalorder %v7223_v5, %v7389_v21  ;;  %vm10623_vm8 = vcmp.eq.s32.totalorder %v7220_v4, %v7409_v47  ;;  %vm10622_vm14 = vcmp.eq.s32.totalorder %v7223_v5, %v7409_v47 }
 0x166   :  { %vm7465_vm10 = vmpackc.low %vm10614_vm11, %vm10615_vm7  ;;  %vm10625_vm11 = vcmp.eq.s32.totalorder %v7266_v6, %v7389_v21  ;;  %vm10624_vm7 = vcmp.eq.s32.totalorder %v7284_v37, %v7389_v21  ;;  %vm10632_vm15 = vcmp.eq.s32.totalorder %v7284_v37, %v7409_v47 }
 0x167   :  { %vm7475_vm2 = vmpackc.low %vm10616_vm13, %vm10617_vm5 }
 0x168   :  { %vm7499_vm13 = vmpackc.low %vm10622_vm14, %vm10623_vm8  ;;  %vm10631_vm14 = vcmp.eq.s32.totalorder %v7325_v19, %v7389_v21  ;;  %vm10630_vm8 = vcmp.eq.s32.totalorder %v7328_v25, %v7389_v21 }
 0x169   :  { %vm7509_vm5 = vmpackc.low %vm10624_vm7, %vm10625_vm11 }
 0x16a   :  { %5894 = vmatpush3.bf16.xpose.msra.mxu0 %v6906_v57  ;;  %v11066_v57 = vmov 0  ;;  %v11082_v50 = vsel %vm7509_vm5, 4294967295, %v11081_v50  ;;  %vm7543_vm11 = vmpackc.low %vm10630_vm8, %vm10631_vm14  ;;  %vm11093_vm14 = vcmp.eq.s32.totalorder %v7132_v63, %v7156_v44 }
 0x16b   :  { %5896 = vmatprep.subr.bf16.mxu0 %v6956_v15  ;;  %v11067_v57 = vsel %vm7429_vm4, 4294967295, %v11066_v57  ;;  %11083 = vst [vmem:[#allocation31_spill] sm:$0xff] %v11082_v50  ;;  %v11088_v42 = vsel %vm7543_vm11, 4294967295, %v11087_v42  ;;  %v4885_v10 = vsel %vm11093_vm14, 1.0, %v10677_v1  ;;  %vm11099_vm14 = vcmp.eq.s32.totalorder %v7132_v63, %v7389_v21 }
 0x16c   :  { %11068 = vst [vmem:[#allocation26_spill] sm:$0xff] %v11067_v57  ;;  %11089 = vst [vmem:[#allocation33_spill] sm:$0xff] %v11088_v42  ;;  %v7578_v61 = vsub.f32 %v4885_v10, %v4885_v10  ;;  %v4890_v30 = vsel %vm11099_vm14, 1.0, %v10677_v1  ;;  %vm11105_vm14 = vcmp.eq.s32.totalorder %v7176_v52, %v7153_v43 }
 0x16d   :  { %v7612_v62 = vsub.f32 %v4890_v30, %v4890_v30  ;;  %v4902_v0 = vsel %vm11105_vm14, 1.0, %v10677_v1  ;;  %vm11109_vm14 = vcmp.eq.s32.totalorder %v7176_v52, %v7389_v21 }
 0x16e   :  { %11095 = vst [vmem:[#allocation35_spill] sm:$0xff] %v7578_v61  ;;  %v10636_v31 = vand.u32 4294901760, %v7578_v61  ;;  %v4906_v58 = vsel %vm11109_vm14, 1.0, %v10677_v1  ;;  %vm11116_vm14 = vcmp.eq.s32.totalorder %v7179_v53, %v7409_v47 }
 0x16f   :  { %v7670_v30 = vsub.f32 %v4906_v58, %v4906_v58 }
 0x170   :  { %v7629_v24 = vsub.f32 %v7578_v61, %v10636_v31 }
 0x172   :  { %5898 = vmatpush3.bf16.xpose.msra.mxu0 %v6956_v15  ;;  %v11069_v15 = vmov 0 }
 0x173   :  { %5900 = vmatprep.subr.bf16.mxu0 %v6976_v29  ;;  %v11070_v15 = vsel %vm7439_vm1, 4294967295, %v11069_v15 }
 0x174   :  { %11071 = vst [vmem:[#allocation27_spill] sm:$0xff] %v11070_v15 }
 0x17a   :  { %5902 = vmatpush3.bf16.xpose.msra.mxu0 %v6976_v29  ;;  %v11072_v29 = vmov 0 }
 0x17b   :  { %5904 = vmatprep.subr.bf16.mxu0 %v6998_v46  ;;  %v11073_v29 = vsel %vm7465_vm10, 4294967295, %v11072_v29 }
 0x17c   :  { %11074 = vst [vmem:[#allocation28_spill] sm:$0xff] %v11073_v29 }
 0x182   :  { %5906 = vmatpush3.bf16.xpose.msra.mxu0 %v6998_v46  ;;  %v11078_v46 = vmov 0 }
 0x183   :  { %6292 = vmatprep.subr.msk.bf16.mxu0 %vm7404_vm0, %v10637_v3  ;;  %v11079_v46 = vsel %vm7499_vm13, 4294967295, %v11078_v46 }
 0x184   :  { %11080 = vst [vmem:[#allocation30_spill] sm:$0xff] %v11079_v46  ;;  %v7811_v46 = vadd.s32 80, %v7132_v63 }
 0x186   :  { %11143 = vst [vmem:[#allocation48_spill] sm:$0xff] %v7811_v46 }
 0x189   :  { %5713 = vmatmul.mubr.f32.vlgmr.msra.gmra.mrb[0].mxu0 %v6996_v45  ;;  %v11075_v45 = vmov 0 }
 0x18a   :  { %6294 = vmatpush1.bf16.msk.msra.mxu0 %vm7429_vm4, %v10637_v3  ;;  %3141 = vmatprep.mubr.f32.mxu0 %v10677_v1  ;;  %v11076_v45 = vsel %vm7475_vm2, 4294967295, %v11075_v45 }
 0x18b   :  { %6296 = vmatprep.subr.msk.bf16.mxu0 %vm7439_vm1, %v10637_v3  ;;  %11077 = vst [vmem:[#allocation29_spill] sm:$0xff] %v11076_v45  ;;  %v7872_v45 = vadd.s32 96, %v7132_v63 }
 0x18d   :  { %11157 = vst [vmem:[#allocation53_spill] sm:$0xff] %v7872_v45 }
 0x18e   :  { %6298 = vmatpush1.bf16.msk.msra.mxu0 %vm7465_vm10, %v10637_v3 }
 0x18f   :  { %6300 = vmatprep.subr.msk.bf16.mxu0 %vm7475_vm2, %v10637_v3  ;;  %vm905_vm2 = vcmp.eq.s32.totalorder %v7266_v6, %v7409_v47 }
 0x190   :  { %vm7533_vm7 = vmpackc.low %vm10632_vm15, %vm905_vm2  ;;  %vm11094_vm15 = vcmp.eq.s32.totalorder %v7144_v13, %v7156_v44  ;;  %v4937_v42 = vsel %vm905_vm2, 1.0, %v10677_v1  ;;  %vm11136_vm2 = vcmp.eq.s32.totalorder %v7325_v19, %v7389_v21 }
 0x191   :  { %v11085_v51 = vsel %vm7533_vm7, 4294967295, %v11084_v51  ;;  %v4893_v11 = vsel %vm11094_vm15, 1.0, %v10677_v1  ;;  %vm11100_vm15 = vcmp.eq.s32.totalorder %v7144_v13, %v7389_v21 }
 0x192   :  { %6302 = vmatpush1.bf16.msk.msra.mxu0 %vm7499_vm13, %v10637_v3  ;;  %11086 = vst [vmem:[#allocation32_spill] sm:$0xff] %v11085_v51  ;;  %vm10633_vm13 = vcmp.eq.s32.totalorder %v7328_v25, %v7409_v47  ;;  %v7580_v16 = vsub.f32 %v4893_v11, %v4893_v11  ;;  %v4898_v40 = vsel %vm11100_vm15, 1.0, %v10677_v1  ;;  %vm11106_vm15 = vcmp.eq.s32.totalorder %v7176_v52, %v7156_v44 }
 0x193   :  { %6304 = vmatprep.subr.msk.bf16.mxu0 %vm7509_vm5, %v10637_v3  ;;  %vm10634_vm5 = vcmp.eq.s32.totalorder %v7325_v19, %v7409_v47  ;;  %v4901_v12 = vsel %vm11106_vm15, 1.0, %v10677_v1  ;;  %vm11110_vm15 = vcmp.eq.s32.totalorder %v7179_v53, %v7389_v21  ;;  %v7643_v55 = vsub.f32 %v4898_v40, %v4898_v40 }
 0x194   :  { %vm7563_vm8 = vmpackc.low %vm10633_vm13, %vm10634_vm5  ;;  %11096 = vst [vmem:[#allocation36_spill] sm:$0xff] %v7580_v16  ;;  %vm11097_vm13 = vcmp.eq.s32.totalorder %v7132_v63, %v7153_v43  ;;  %vm11098_vm5 = vcmp.eq.s32.totalorder %v7144_v13, %v7153_v43  ;;  %v10635_v27 = vand.u32 4294901760, %v7580_v16  ;;  %v4914_v23 = vsel %vm11110_vm15, 1.0, %v10677_v1 }
 0x195   :  { %v11091_v54 = vsel %vm7563_vm8, 4294967295, %v11090_v54  ;;  %v4886_v17 = vsel %vm11097_vm13, 1.0, %v10677_v1  ;;  %v4894_v28 = vsel %vm11098_vm5, 1.0, %v10677_v1  ;;  %vm11103_vm5 = vcmp.eq.s32.totalorder %v7132_v63, %v7409_v47 }
 0x196   :  { %6306 = vmatpush1.bf16.msk.msra.mxu0 %vm7533_vm7, %v10637_v3  ;;  %11092 = vst [vmem:[#allocation34_spill] sm:$0xff] %v11091_v54  ;;  %v7600_v38 = vsub.f32 %v4886_v17, %v4886_v17  ;;  %v7602_v41 = vsub.f32 %v4894_v28, %v4894_v28  ;;  %v4889_v8 = vsel %vm11103_vm5, 1.0, %v10677_v1  ;;  %vm11104_vm13 = vcmp.eq.s32.totalorder %v7144_v13, %v7409_v47 }
 0x197   :  { %6308 = vmatprep.subr.msk.bf16.mxu0 %vm7543_vm11, %v10637_v3  ;;  %v4897_v9 = vsel %vm11104_vm13, 1.0, %v10677_v1  ;;  %vm11107_vm5 = vcmp.eq.s32.totalorder %v7179_v53, %v7156_v44  ;;  %vm11108_vm13 = vcmp.eq.s32.totalorder %v7179_v53, %v7153_v43  ;;  %v7648_v26 = vsub.f32 %v7580_v16, %v10635_v27 }
 0x198   :  { %11101 = vst [vmem:[#allocation37_spill] sm:$0xff] %v7600_v38  ;;  %11102 = vst [vmem:[#allocation38_spill] sm:$0xff] %v7602_v41  ;;  %v4909_v14 = vsel %vm11107_vm5, 1.0, %v10677_v1  ;;  %v4910_v39 = vsel %vm11108_vm13, 1.0, %v10677_v1  ;;  %v7650_v48 = vsub.f32 %v4889_v8, %v4889_v8  ;;  %v7652_v36 = vsub.f32 %v4897_v9, %v4897_v9 }
 0x199   :  { %v7654_v20 = vsub.f32 %v4901_v12, %v4901_v12  ;;  %v7656_v32 = vsub.f32 %v4909_v14, %v4909_v14  ;;  %vm11113_vm5 = vcmp.eq.s32.totalorder %v7176_v52, %v7409_v47  ;;  %vm11114_vm13 = vcmp.eq.s32.totalorder %v7220_v4, %v7156_v44 }
 0x19a   :  { %6310 = vmatpush1.bf16.msk.msra.mxu0 %vm7563_vm8, %v10637_v3  ;;  %11111 = vst [vmem:[#allocation39_spill] sm:$0xff] %v7650_v48  ;;  %11112 = vst [vmem:[#allocation40_spill] sm:$0xff] %v7652_v36  ;;  %v4905_v10 = vsel %vm11113_vm5, 1.0, %v10677_v1  ;;  %v4917_v11 = vsel %vm11114_vm13, 1.0, %v10677_v1  ;;  %v7666_v17 = vsub.f32 %v4902_v0, %v4902_v0  ;;  %v7668_v28 = vsub.f32 %v4910_v39, %v4910_v39 }
 0x19b   :  { %v7672_v40 = vsub.f32 %v4914_v23, %v4914_v23  ;;  %v4913_v9 = vsel %vm11116_vm14, 1.0, %v10677_v1  ;;  %vm11117_vm15 = vcmp.eq.s32.totalorder %v7220_v4, %v7153_v43  ;;  %vm11118_vm5 = vcmp.eq.s32.totalorder %v7223_v5, %v7153_v43 }
 0x19c   :  { %11115 = vst [vmem:[#allocation41_spill] sm:$0xff] %v7668_v28  ;;  %v4918_v12 = vsel %vm11117_vm15, 1.0, %v10677_v1  ;;  %v4926_v0 = vsel %vm11118_vm5, 1.0, %v10677_v1  ;;  %v7688_v39 = vsub.f32 %v4905_v10, %v4905_v10  ;;  %vm11119_vm13 = vcmp.eq.s32.totalorder %v7223_v5, %v7156_v44 }
 0x19d   :  { %v4925_v58 = vsel %vm11119_vm13, 1.0, %v10677_v1  ;;  %v7694_v23 = vsub.f32 %v4917_v11, %v4917_v11  ;;  %vm11120_vm14 = vcmp.eq.s32.totalorder %v7220_v4, %v7389_v21  ;;  %vm11121_vm15 = vcmp.eq.s32.totalorder %v7223_v5, %v7389_v21 }
 0x19e   :  { %v4922_v8 = vsel %vm11120_vm14, 1.0, %v10677_v1  ;;  %v4930_v10 = vsel %vm11121_vm15, 1.0, %v10677_v1  ;;  %v7706_v14 = vsub.f32 %v4913_v9, %v4913_v9  ;;  %v7708_v3 = vsub.f32 %v4918_v12, %v4918_v12 }
 0x19f   :  { %v7710_v11 = vsub.f32 %v4926_v0, %v4926_v0  ;;  %vm11122_vm5 = vcmp.eq.s32.totalorder %v7266_v6, %v7156_v44  ;;  %v7716_v27 = vsub.f32 %v4925_v58, %v4925_v58  ;;  %vm11124_vm13 = vcmp.eq.s32.totalorder %v7220_v4, %v7409_v47 }
 0x1a0   :  { %v4933_v31 = vsel %vm11122_vm5, 1.0, %v10677_v1  ;;  %v4921_v53 = vsel %vm11124_vm13, 1.0, %v10677_v1  ;;  %vm11125_vm14 = vcmp.eq.s32.totalorder %v7223_v5, %v7409_v47  ;;  %vm11126_vm15 = vcmp.eq.s32.totalorder %v7284_v37, %v7156_v44 }
 0x1a1   :  { %11123 = vst [vmem:[#allocation42_spill] sm:$0xff] %v7716_v27  ;;  %v4929_v9 = vsel %vm11125_vm14, 1.0, %v10677_v1  ;;  %v4941_v12 = vsel %vm11126_vm15, 1.0, %v10677_v1  ;;  %v7730_v0 = vsub.f32 %v4922_v8, %v4922_v8  ;;  %v7732_v52 = vsub.f32 %v4930_v10, %v4930_v10 }
 0x1a2   :  { %vm11127_vm5 = vcmp.eq.s32.totalorder %v7266_v6, %v7153_v43  ;;  %vm11128_vm13 = vcmp.eq.s32.totalorder %v7284_v37, %v7153_v43  ;;  %vm11129_vm14 = vcmp.eq.s32.totalorder %v7266_v6, %v7389_v21  ;;  %vm11130_vm15 = vcmp.eq.s32.totalorder %v7284_v37, %v7389_v21 }
 0x1a3   :  { %v4934_v4 = vsel %vm11127_vm5, 1.0, %v10677_v1  ;;  %v4942_v5 = vsel %vm11128_vm13, 1.0, %v10677_v1  ;;  %v4938_v8 = vsel %vm11129_vm14, 1.0, %v10677_v1  ;;  %v4946_v10 = vsel %vm11130_vm15, 1.0, %v10677_v1 }
 0x1a4   :  { %v7751_v58 = vsub.f32 %v4933_v31, %v4933_v31  ;;  %v7753_v13 = vsub.f32 %v4921_v53, %v4921_v53  ;;  %v7755_v54 = vsub.f32 %v4929_v9, %v4929_v9  ;;  %v7757_v35 = vsub.f32 %v4941_v12, %v4941_v12 }
 0x1a5   :  { %v7764_v51 = vsub.f32 %v4934_v4, %v4934_v4  ;;  %vm11133_vm5 = vcmp.eq.s32.totalorder %v7284_v37, %v7409_v47  ;;  %vm11134_vm13 = vcmp.eq.s32.totalorder %v7325_v19, %v7153_v43  ;;  %v7774_v9 = vsub.f32 %v4942_v5, %v4942_v5 }
 0x1a6   :  { %11131 = vst [vmem:[#allocation43_spill] sm:$0xff] %v7751_v58  ;;  %11132 = vst [vmem:[#allocation44_spill] sm:$0xff] %v7757_v35  ;;  %v4945_v31 = vsel %vm11133_vm5, 1.0, %v10677_v1  ;;  %v4950_v53 = vsel %vm11134_vm13, 1.0, %v10677_v1  ;;  %v7776_v12 = vsub.f32 %v4938_v8, %v4938_v8  ;;  %v7778_v6 = vsub.f32 %v4946_v10, %v4946_v10 }
 0x1a7   :  { %v4954_v4 = vsel %vm11136_vm2, 1.0, %v10677_v1  ;;  %v7785_v37 = vsub.f32 %v4937_v42, %v4937_v42  ;;  %vm11138_vm14 = vcmp.eq.s32.totalorder %v7325_v19, %v7156_v44  ;;  %vm11139_vm15 = vcmp.eq.s32.totalorder %v7328_v25, %v7156_v44 }
 0x1a8   :  { %11135 = vst [vmem:[#allocation45_spill] sm:$0xff] %v7776_v12  ;;  %v4949_v18 = vsel %vm11138_vm14, 1.0, %v10677_v1  ;;  %v4957_v5 = vsel %vm11139_vm15, 1.0, %v10677_v1  ;;  %v7796_v10 = vsub.f32 %v4945_v31, %v4945_v31  ;;  %vm11140_vm5 = vcmp.eq.s32.totalorder %v7328_v25, %v7153_v43 }
 0x1a9   :  { %11137 = vst [vmem:[#allocation46_spill] sm:$0xff] %v7785_v37  ;;  %v4958_v42 = vsel %vm11140_vm5, 1.0, %v10677_v1  ;;  %v7802_v49 = vsub.f32 %v4950_v53, %v4950_v53  ;;  %vm11141_vm13 = vcmp.eq.s32.totalorder %v7328_v25, %v7389_v21  ;;  %v7808_v60 = vsub.f32 %v4954_v4, %v4954_v4 }
 0x1aa   :  { %v4962_v50 = vsel %vm11141_vm13, 1.0, %v10677_v1  ;;  %v7814_v31 = vadd.s32 88, %v7132_v63  ;;  %v7816_v8 = vsub.f32 %v4949_v18, %v4949_v18  ;;  %v7818_v7 = vsub.f32 %v4957_v5, %v4957_v5 }
 0x1ab   :  { %11142 = vst [vmem:[#allocation47_spill] sm:$0xff] %v7808_v60  ;;  %vm11146_vm2 = vcmp.eq.s32.totalorder %v7325_v19, %v7409_v47  ;;  %vm11147_vm14 = vcmp.eq.s32.totalorder %v7328_v25, %v7409_v47  ;;  %vm10682_vm15 = vcmp.eq.s32.totalorder %v7811_v46, %v7153_v43  ;;  %v11148_v18 = vmov 0 }
 0x1ac   :  { %11144 = vst [vmem:[#allocation49_spill] sm:$0xff] %v7814_v31  ;;  %11145 = vst [vmem:[#allocation50_spill] sm:$0xff] %v7816_v8  ;;  %v4953_v53 = vsel %vm11146_vm2, 1.0, %v10677_v1  ;;  %v4961_v4 = vsel %vm11147_vm14, 1.0, %v10677_v1  ;;  %vm10681_vm5 = vcmp.eq.s32.totalorder %v7814_v31, %v7153_v43  ;;  %vm10697_vm14 = vcmp.eq.s32.totalorder %v7811_v46, %v7156_v44 }
 0x1ad   :  { %vm7842_vm2 = vmpackc.low %vm10681_vm5, %vm10682_vm15  ;;  %vm10703_vm13 = vcmp.eq.s32.totalorder %v7811_v46, %v7409_v47  ;;  %vm10702_vm8 = vcmp.eq.s32.totalorder %v7814_v31, %v7409_v47  ;;  %v7854_v5 = vsub.f32 %v4958_v42, %v4958_v42  ;;  %v7856_v1 = vsub.f32 %v4962_v50, %v4962_v50 }
 0x1ae   :  { %v11149_v18 = vsel %vm7842_vm2, 4294967295, %v11148_v18  ;;  %v11151_v25 = vmov 1.0|1.0   ;;  %vm11152_vm5 = vcmp.eq.s32.totalorder %v7811_v46, %v7389_v21  ;;  %vm11153_vm15 = vcmp.eq.s32.totalorder %v7814_v31, %v7389_v21 }
 0x1af   :  { %11150 = vst [vmem:[#allocation51_spill] sm:$0xff] %v11149_v18  ;;  %5928 = vmatprep.subr.msk.bf16.mxu1 %vm7842_vm2, %v11151_v25  ;;  %vm7867_vm11 = vmpackc.low %vm11153_vm15, %vm11152_vm5  ;;  %v11154_v19 = vmov 0  ;;  %v7875_v50 = vadd.s32 104, %v7132_v63  ;;  %v7879_v34 = vsub.f32 %v4953_v53, %v4953_v53  ;;  %v7881_v29 = vsub.f32 %v4961_v4, %v4961_v4 }
 0x1b0   :  { %v11155_v19 = vsel %vm7867_vm11, 4294967295, %v11154_v19  ;;  %6312 = vmatprep.subr.msk.bf16.mxu0 %vm7867_vm11, %v11151_v25  ;;  %vm11161_vm15 = vcmp.eq.s32.totalorder %v7814_v31, %v7156_v44  ;;  %vm7905_vm11 = vmpackc.low %vm10702_vm8, %vm10703_vm13  ;;  %v11165_v53 = vmov 0  ;;  %v11168_v4 = vmov 0 }
 0x1b1   :  { %11156 = vst [vmem:[#allocation52_spill] sm:$0xff] %v11155_v19  ;;  %11158 = vst [vmem:[#allocation54_spill] sm:$0xff] %v7875_v50  ;;  %v11166_v53 = vsel %vm7905_vm11, 4294967295, %v11165_v53  ;;  %6314 = vmatpush1.bf16.msk.msra.mxu0 %vm7905_vm11, %v11151_v25  ;;  %v11173_v18 = vmov 0  ;;  %v7952_v42 = vadd.s32 112, %v7132_v63  ;;  %v11178_v19 = vmov 0.0  }
 0x1b2   :  { %11159 = vst [vmem:[#allocation55_spill] sm:$0xff] %v7879_v34  ;;  %11160 = vst [vmem:[#allocation56_spill] sm:$0xff] %v7881_v29  ;;  %vm11179_vm11 = vcmp.eq.s32.totalorder %v7811_v46, %v7153_v43  ;;  %vm11182_vm2 = vcmp.eq.s32.totalorder %v7814_v31, %v7389_v21 }
 0x1b3   :  { %vm7892_vm5 = vmpackc.low %vm11161_vm15, %vm10697_vm14  ;;  %11167 = vst [vmem:[#allocation58_spill] sm:$0xff] %v11166_v53  ;;  %vm10707_vm15 = vcmp.eq.s32.totalorder %v7872_v45, %v7153_v43  ;;  %vm10706_vm14 = vcmp.eq.s32.totalorder %v7875_v50, %v7153_v43  ;;  %v7955_v53 = vadd.s32 120, %v7132_v63  ;;  %v4966_v15 = vsel %vm11179_vm11, 1.0, %v11178_v19 }
 0x1b4   :  { %v11163_v22 = vsel %vm7892_vm5, 4294967295, %v11162_v22  ;;  %5930 = vmatpush1.bf16.msk.msra.mxu1 %vm7892_vm5, %v11151_v25  ;;  %vm7926_vm8 = vmpackc.low %vm10706_vm14, %vm10707_vm15  ;;  %vm10732_vm5 = vcmp.eq.s32.totalorder %v7875_v50, %v7156_v44  ;;  %vm11171_vm14 = vcmp.eq.s32.totalorder %v7872_v45, %v7389_v21  ;;  %vm11172_vm15 = vcmp.eq.s32.totalorder %v7875_v50, %v7389_v21  ;;  %11176 = vst [vmem:[#allocation61_spill] sm:$0xff] %v7952_v42 }
 0x1b5   :  { %11164 = vst [vmem:[#allocation57_spill] sm:$0xff] %v11163_v22  ;;  %v11169_v4 = vsel %vm7926_vm8, 4294967295, %v11168_v4  ;;  %5932 = vmatprep.subr.msk.bf16.mxu1 %vm7926_vm8, %v11151_v25  ;;  %vm7947_vm13 = vmpackc.low %vm11172_vm15, %vm11171_vm14  ;;  %vm11180_vm14 = vcmp.eq.s32.totalorder %v7814_v31, %v7153_v43  ;;  %vm11181_vm15 = vcmp.eq.s32.totalorder %v7811_v46, %v7389_v21  ;;  %vm11183_vm11 = vcmp.eq.s32.totalorder %v7872_v45, %v7156_v44 }
 0x1b6   :  { %11170 = vst [vmem:[#allocation59_spill] sm:$0xff] %v11169_v4  ;;  %v11174_v18 = vsel %vm7947_vm13, 4294967295, %v11173_v18  ;;  %11177 = vst [vmem:[#allocation62_spill] sm:$0xff] %v7955_v53  ;;  %v4974_v59 = vsel %vm11180_vm14, 1.0, %v11178_v19  ;;  %v4970_v63 = vsel %vm11181_vm15, 1.0, %v11178_v19  ;;  %v4978_v4 = vsel %vm11182_vm2, 1.0, %v11178_v19  ;;  %6316 = vmatprep.subr.msk.bf16.mxu0 %vm7947_vm13, %v11151_v25 }
 0x1b7   :  { %11175 = vst [vmem:[#allocation60_spill] sm:$0xff] %v11174_v18  ;;  %vm7984_vm14 = vmpackc.low %vm10732_vm5, %vm11183_vm11  ;;  %v11184_v22 = vmov 0  ;;  %v7988_v57 = vsub.f32 %v4966_v15, %v4966_v15  ;;  %v7990_v56 = vsub.f32 %v4974_v59, %v4974_v59  ;;  %v7992_v33 = vsub.f32 %v4970_v63, %v4970_v63 }
 0x1b8   :  { %v11185_v22 = vsel %vm7984_vm14, 4294967295, %v11184_v22  ;;  %v7994_v2 = vsub.f32 %v4978_v4, %v4978_v4  ;;  %5934 = vmatpush1.bf16.msk.msra.mxu1 %vm7984_vm14, %v11151_v25  ;;  %vm11191_vm2 = vcmp.eq.s32.totalorder %v7872_v45, %v7409_v47  ;;  %vm11192_vm15 = vcmp.eq.s32.totalorder %v7875_v50, %v7409_v47 }
 0x1b9   :  { %11186 = vst [vmem:[#allocation63_spill] sm:$0xff] %v11185_v22  ;;  %11187 = vst [vmem:[#allocation64_spill] sm:$0xff] %v7988_v57  ;;  %v11193_v18 = vmov 0  ;;  %vm11196_vm5 = vcmp.eq.s32.totalorder %v7811_v46, %v7156_v44  ;;  %vm11197_vm13 = vcmp.eq.s32.totalorder %v7814_v31, %v7156_v44  ;;  %vm11198_vm14 = vcmp.eq.s32.totalorder %v7811_v46, %v7409_v47 }
 0x1ba   :  { %11188 = vst [vmem:[#allocation65_spill] sm:$0xff] %v7990_v56  ;;  %11189 = vst [vmem:[#allocation66_spill] sm:$0xff] %v7992_v33  ;;  %v4965_v63 = vsel %vm11196_vm5, 1.0, %v11178_v19  ;;  %v4973_v59 = vsel %vm11197_vm13, 1.0, %v11178_v19  ;;  %v4969_v15 = vsel %vm11198_vm14, 1.0, %v11178_v19  ;;  %vm11204_vm13 = vcmp.eq.s32.totalorder %v7872_v45, %v7153_v43 }
 0x1bb   :  { %11190 = vst [vmem:[#allocation67_spill] sm:$0xff] %v7994_v2  ;;  %vm8005_vm11 = vmpackc.low %vm11192_vm15, %vm11191_vm2  ;;  %vm11199_vm2 = vcmp.eq.s32.totalorder %v7814_v31, %v7409_v47  ;;  %v8028_v22 = vsub.f32 %v4965_v63, %v4965_v63  ;;  %v8030_v16 = vsub.f32 %v4973_v59, %v4973_v59  ;;  %v8032_v61 = vsub.f32 %v4969_v15, %v4969_v15 }
 0x1bc   :  { %v11194_v18 = vsel %vm8005_vm11, 4294967295, %v11193_v18  ;;  %v4977_v4 = vsel %vm11199_vm2, 1.0, %v11178_v19  ;;  %6318 = vmatpush1.bf16.msk.msra.mxu0 %vm8005_vm11, %v11151_v25  ;;  %v4982_v46 = vsel %vm11204_vm13, 1.0, %v11178_v19  ;;  %vm11205_vm5 = vcmp.eq.s32.totalorder %v7875_v50, %v7153_v43 }
 0x1bd   :  { %11195 = vst [vmem:[#allocation68_spill] sm:$0xff] %v11194_v18  ;;  %11200 = vst [vmem:[#allocation69_spill] sm:$0xff] %v8028_v22  ;;  %v8034_v2 = vsub.f32 %v4977_v4, %v4977_v4  ;;  %v4990_v31 = vsel %vm11205_vm5, 1.0, %v11178_v19  ;;  %vm11206_vm14 = vcmp.eq.s32.totalorder %v7872_v45, %v7389_v21  ;;  %vm11207_vm15 = vcmp.eq.s32.totalorder %v7875_v50, %v7389_v21 }
 0x1be   :  { %11201 = vst [vmem:[#allocation70_spill] sm:$0xff] %v8030_v16  ;;  %11202 = vst [vmem:[#allocation71_spill] sm:$0xff] %v8032_v61  ;;  %v4986_v63 = vsel %vm11206_vm14, 1.0, %v11178_v19  ;;  %v4994_v59 = vsel %vm11207_vm15, 1.0, %v11178_v19  ;;  %v8054_v18 = vsub.f32 %v4982_v46, %v4982_v46  ;;  %vm11211_vm2 = vcmp.eq.s32.totalorder %v7872_v45, %v7156_v44 }
 0x1bf   :  { %11203 = vst [vmem:[#allocation72_spill] sm:$0xff] %v8034_v2  ;;  %v8056_v2 = vsub.f32 %v4990_v31, %v4990_v31  ;;  %v8058_v61 = vsub.f32 %v4986_v63, %v4986_v63  ;;  %v8060_v33 = vsub.f32 %v4994_v59, %v4994_v59  ;;  %v4981_v56 = vsel %vm11211_vm2, 1.0, %v11178_v19 }
 0x1c0   :  { %11208 = vst [vmem:[#allocation73_spill] sm:$0xff] %v8054_v18  ;;  %vm11212_vm13 = vcmp.eq.s32.totalorder %v7875_v50, %v7156_v44  ;;  %v8070_v22 = vsub.f32 %v4981_v56, %v4981_v56  ;;  %vm11215_vm5 = vcmp.eq.s32.totalorder %v7872_v45, %v7409_v47  ;;  %vm11216_vm14 = vcmp.eq.s32.totalorder %v7875_v50, %v7409_v47 }
 0x1c1   :  { %11209 = vst [vmem:[#allocation74_spill] sm:$0xff] %v8058_v61  ;;  %11210 = vst [vmem:[#allocation75_spill] sm:$0xff] %v8060_v33  ;;  %v4989_v15 = vsel %vm11212_vm13, 1.0, %v11178_v19  ;;  %v4985_v31 = vsel %vm11215_vm5, 1.0, %v11178_v19  ;;  %v4993_v63 = vsel %vm11216_vm14, 1.0, %v11178_v19  ;;  %vm966_vm15 = vcmp.eq.s32.totalorder %v7952_v42, %v7153_v43 }
 0x1c2   :  { %11213 = vst [vmem:[#allocation76_spill] sm:$0xff] %v8070_v22  ;;  %v8072_v46 = vsub.f32 %v4989_v15, %v4989_v15  ;;  %v8082_v59 = vsub.f32 %v4985_v31, %v4985_v31  ;;  %v8084_v4 = vsub.f32 %v4993_v63, %v4993_v63  ;;  %vm974_vm2 = vcmp.eq.s32.totalorder %v7955_v53, %v7153_v43 }
 0x1c3   :  { %v4998_v45 = vsel %vm966_vm15, 1.0, %v11178_v19  ;;  %v5006_v33 = vsel %vm974_vm2, 1.0, %v11178_v19  ;;  %vm8094_vm13 = vmpackc.low %vm974_vm2, %vm966_vm15  ;;  %v11218_v50 = vmov 0  ;;  %vm970_vm5 = vcmp.eq.s32.totalorder %v7952_v42, %v7389_v21 }
 0x1c4   :  { %11214 = vst [vmem:[#allocation77_spill] sm:$0xff] %v8072_v46  ;;  %11217 = vst [vmem:[#allocation78_spill] sm:$0xff] %v8084_v4  ;;  %v11219_v50 = vsel %vm8094_vm13, 4294967295, %v11218_v50  ;;  %5936 = vmatprep.subr.msk.bf16.mxu1 %vm8094_vm13, %v11151_v25  ;;  %v8101_v31 = vsub.f32 %v4998_v45, %v4998_v45  ;;  %v8103_v63 = vsub.f32 %v5006_v33, %v5006_v33  ;;  %v5002_v43 = vsel %vm970_vm5, 1.0, %v11178_v19 }
 0x1c5   :  { %11220 = vst [vmem:[#allocation79_spill] sm:$0xff] %v11219_v50  ;;  %vm978_vm14 = vcmp.eq.s32.totalorder %v7955_v53, %v7389_v21  ;;  %v11223_v56 = vmov 0  ;;  %vm965_vm2 = vcmp.eq.s32.totalorder %v7952_v42, %v7156_v44  ;;  %vm973_vm13 = vcmp.eq.s32.totalorder %v7955_v53, %v7156_v44 }
 0x1c6   :  { %11221 = vst [vmem:[#allocation80_spill] sm:$0xff] %v8101_v31  ;;  %11222 = vst [vmem:[#allocation81_spill] sm:$0xff] %v8103_v63  ;;  %v5010_v15 = vsel %vm978_vm14, 1.0, %v11178_v19  ;;  %v8122_v33 = vsub.f32 %v5002_v43, %v5002_v43  ;;  %v4997_v45 = vsel %vm965_vm2, 1.0, %v11178_v19  ;;  %v5005_v50 = vsel %vm973_vm13, 1.0, %v11178_v19 }
 0x1c7   :  { %vm8111_vm15 = vmpackc.low %vm978_vm14, %vm970_vm5  ;;  %v8124_v21 = vsub.f32 %v5010_v15, %v5010_v15  ;;  %v11228_v63 = vmov 0  ;;  %v8135_v44 = vsub.f32 %v4997_v45, %v4997_v45  ;;  %vm969_vm14 = vcmp.eq.s32.totalorder %v7952_v42, %v7409_v47 }
 0x1c8   :  { %v11224_v56 = vsel %vm8111_vm15, 4294967295, %v11223_v56  ;;  %6320 = vmatprep.subr.msk.bf16.mxu0 %vm8111_vm15, %v11151_v25  ;;  %11226 = vst [vmem:[#allocation83_spill] sm:$0xff] %v8122_v33  ;;  %vm8128_vm5 = vmpackc.low %vm973_vm13, %vm965_vm2  ;;  %vm977_vm15 = vcmp.eq.s32.totalorder %v7955_v53, %v7409_v47  ;;  %v5001_v15 = vsel %vm969_vm14, 1.0, %v11178_v19  ;;  %v11241_v42 = vand.u32 4294901760, %v7648_v26 }
 0x1c9   :  { %11225 = vst [vmem:[#allocation82_spill] sm:$0xff] %v11224_v56  ;;  %11227 = vst [vmem:[#allocation84_spill] sm:$0xff] %v8124_v21  ;;  %v11229_v63 = vsel %vm8128_vm5, 4294967295, %v11228_v63  ;;  %5938 = vmatpush1.bf16.msk.msra.mxu1 %vm8128_vm5, %v11151_v25  ;;  %v8137_v56 = vsub.f32 %v5005_v50, %v5005_v50  ;;  %v5009_v43 = vsel %vm977_vm15, 1.0, %v11178_v19  ;;  %v11233_v21 = vmov 0 }
 0x1ca   :  { %11230 = vst [vmem:[#allocation85_spill] sm:$0xff] %v11229_v63  ;;  %11231 = vst [vmem:[#allocation86_spill] sm:$0xff] %v8135_v44  ;;  %v11236_v63 = vand.u32 4294901760, %v7600_v38  ;;  %v11237_v50 = vand.u32 4294901760, %v7602_v41  ;;  %v8160_v53 = vsub.f32 %v5001_v15, %v5001_v15  ;;  %v8162_v19 = vsub.f32 %v5009_v43, %v5009_v43 }
 0x1cb   :  { %11232 = vst [vmem:[#allocation87_spill] sm:$0xff] %v8137_v56  ;;  %vm8145_vm13 = vmpackc.low %vm977_vm15, %vm969_vm14  ;;  %v10790_v47 = vand.u32 4294901760, %v7650_v48  ;;  %v10796_v15 = vand.u32 4294901760, %v7666_v17 }
 0x1cc   :  { %v11234_v21 = vsel %vm8145_vm13, 4294967295, %v11233_v21  ;;  %v1359_v45 = vsub.f32 %v7600_v38, %v11236_v63  ;;  %v1371_v33 = vsub.f32 %v7602_v41, %v11237_v50  ;;  %6322 = vmatpush1.bf16.msk.msra.mxu0 %vm8145_vm13, %v11151_v25  ;;  %11238 = vst [vmem:[#allocation89_spill] sm:$0xff] %v8160_v53  ;;  %11239 = vst [vmem:[#allocation90_spill] sm:$0xff] %v8162_v19  ;;  %v10787_v63 = vand.u32 4294901760, %v7612_v62 }
 0x1cd   :  { %11235 = vst [vmem:[#allocation88_spill] sm:$0xff] %v11234_v21  ;;  %v10788_v38 = vand.u32 4294901760, %v7643_v55  ;;  %v11240_v50 = vand.u32 4294901760, %v7629_v24  ;;  %v10793_v21 = vand.u32 4294901760, %v7652_v36  ;;  %v10797_v24 = vand.u32 4294901760, %v7668_v28 }
 0x1ce   :  { %v1360_v31 = vand.u32 4294901760, %v1359_v45  ;;  %v1372_v4 = vand.u32 4294901760, %v1371_v33  ;;  %v3167_v33 = vsub.f32 %v7612_v62, %v10787_v63  ;;  %v3173_v26 = vsub.f32 %v7650_v48, %v10790_v47 }
 0x1cf   :  { %v8170_v41 = vpack.c.bf16 %v11241_v42, %v11240_v50  ;;  %v3179_v45 = vsub.f32 %v7643_v55, %v10788_v38  ;;  %v3185_v42 = vsub.f32 %v7652_v36, %v10793_v21  ;;  %v1395_v38 = vsub.f32 %v7668_v28, %v10797_v24 }
 0x1d0   :  { %v5939_v43 = vpack.c.bf16 %v1372_v4, %v1360_v31  ;;  %v1383_v4 = vsub.f32 %v7666_v17, %v10796_v15  ;;  %v10801_v31 = vand.u32 4294901760, %v7670_v30  ;;  %v3168_v50 = vand.u32 4294901760, %v3167_v33 }
 0x1d1   :  { %11242 = vst [vmem:[#allocation91_spill] sm:$0xff] %v8170_v41  ;;  %v3180_v63 = vand.u32 4294901760, %v3179_v45  ;;  %v10800_v25 = vand.u32 4294901760, %v7672_v40  ;;  %v3174_v47 = vand.u32 4294901760, %v3173_v26  ;;  %v3186_v41 = vand.u32 4294901760, %v3185_v42 }
 0x1d2   :  { %5940 = vmatprep.subr.bf16.mxu1 %v5939_v43  ;;  %v1384_v48 = vand.u32 4294901760, %v1383_v4  ;;  %v3191_v21 = vsub.f32 %v7670_v30, %v10801_v31  ;;  %v1396_v15 = vand.u32 4294901760, %v1395_v38  ;;  %v11243_v33 = vand.u32 4294901760, %v7654_v20 }
 0x1d3   :  { %v6323_v36 = vpack.c.bf16 %v3180_v63, %v3168_v50  ;;  %v3203_v43 = vsub.f32 %v7672_v40, %v10800_v25  ;;  %v8205_v24 = vpack.c.bf16 %v3186_v41, %v3174_v47  ;;  %v11245_v26 = vand.u32 4294901760, %v7656_v32 }
 0x1d4   :  { %v1389_v45 = vsub.f32 %v7654_v20, %v11243_v33  ;;  %v3192_v28 = vand.u32 4294901760, %v3191_v21  ;;  %v10803_v4 = vand.u32 4294901760, %v7688_v39  ;;  %v8211_v63 = vpack.c.bf16 %v1396_v15, %v1384_v48 }
 0x1d5   :  { %11244 = vst [vmem:[#allocation92_spill] sm:$0xff] %v8205_v24  ;;  %v1401_v42 = vsub.f32 %v7656_v32, %v11245_v26  ;;  %6324 = vmatprep.subr.bf16.mxu0 %v6323_v36  ;;  %v3204_v38 = vand.u32 4294901760, %v3203_v43  ;;  %v10802_v25 = vand.u32 4294901760, %v7706_v14  ;;  %v10804_v21 = vand.u32 4294901760, %v7708_v3 }
 0x1d6   :  { %11246 = vst [vmem:[#allocation93_spill] sm:$0xff] %v8211_v63  ;;  %v1390_v50 = vand.u32 4294901760, %v1389_v45  ;;  %v3197_v41 = vsub.f32 %v7688_v39, %v10803_v4  ;;  %v10805_v47 = vand.u32 4294901760, %v7710_v11  ;;  %v10806_v36 = vand.u32 4294901760, %v7730_v0 }
 0x1d7   :  { %v1402_v31 = vand.u32 4294901760, %v1401_v42  ;;  %v8219_v33 = vpack.c.bf16 %v3204_v38, %v3192_v28  ;;  %v3209_v48 = vsub.f32 %v7706_v14, %v10802_v25  ;;  %v10807_v15 = vand.u32 4294901760, %v7732_v52 }
 0x1d8   :  { %v3198_v45 = vand.u32 4294901760, %v3197_v41  ;;  %v1407_v26 = vsub.f32 %v7708_v3, %v10804_v21  ;;  %v1419_v28 = vsub.f32 %v7710_v11, %v10805_v47  ;;  %v3215_v38 = vsub.f32 %v7730_v0, %v10806_v36 }
 0x1d9   :  { %11247 = vst [vmem:[#allocation94_spill] sm:$0xff] %v8219_v33  ;;  %v8226_v43 = vpack.c.bf16 %v1402_v31, %v1390_v50  ;;  %v3210_v42 = vand.u32 4294901760, %v3209_v48  ;;  %v3227_v25 = vsub.f32 %v7732_v52, %v10807_v15  ;;  %v11249_v31 = vand.u32 4294901760, %v7694_v23 }
 0x1da   :  { %v1408_v41 = vand.u32 4294901760, %v1407_v26  ;;  %v1420_v4 = vand.u32 4294901760, %v1419_v28  ;;  %v11250_v21 = vand.u32 4294901760, %v7716_v27  ;;  %v10813_v48 = vand.u32 4294901760, %v7753_v13 }
 0x1db   :  { %11248 = vst [vmem:[#allocation95_spill] sm:$0xff] %v8226_v43  ;;  %v1413_v50 = vsub.f32 %v7694_v23, %v11249_v31  ;;  %v8247_v47 = vpack.c.bf16 %v3210_v42, %v3198_v45  ;;  %v3216_v33 = vand.u32 4294901760, %v3215_v38  ;;  %v3228_v36 = vand.u32 4294901760, %v3227_v25 }
 0x1dc   :  { %v1425_v43 = vsub.f32 %v7716_v27, %v11250_v21  ;;  %v8249_v24 = vpack.c.bf16 %v1420_v4, %v1408_v41  ;;  %v3221_v31 = vsub.f32 %v7753_v13, %v10813_v48  ;;  %v10811_v26 = vand.u32 4294901760, %v7755_v54 }
 0x1dd   :  { %11251 = vst [vmem:[#allocation96_spill] sm:$0xff] %v8247_v47  ;;  %v1414_v63 = vand.u32 4294901760, %v1413_v50  ;;  %v8255_v28 = vpack.c.bf16 %v3228_v36, %v3216_v33  ;;  %v10810_v21 = vand.u32 4294901760, %v7764_v51  ;;  %v10812_v27 = vand.u32 4294901760, %v7774_v9 }
 0x1de   :  { %11252 = vst [vmem:[#allocation97_spill] sm:$0xff] %v8249_v24  ;;  %v1426_v15 = vand.u32 4294901760, %v1425_v43  ;;  %v10814_v45 = vand.u32 4294901760, %v7776_v12  ;;  %v3222_v25 = vand.u32 4294901760, %v3221_v31  ;;  %v3233_v4 = vsub.f32 %v7755_v54, %v10811_v26 }
 0x1df   :  { %11253 = vst [vmem:[#allocation98_spill] sm:$0xff] %v8255_v28  ;;  %v10815_v43 = vand.u32 4294901760, %v7778_v6  ;;  %v1431_v33 = vsub.f32 %v7764_v51, %v10810_v21  ;;  %v1443_v36 = vsub.f32 %v7774_v9, %v10812_v27  ;;  %v11256_v31 = vand.u32 4294901760, %v7757_v35 }
 0x1e0   :  { %v8260_v42 = vpack.c.bf16 %v1426_v15, %v1414_v63  ;;  %v3239_v63 = vsub.f32 %v7776_v12, %v10814_v45  ;;  %v11255_v15 = vand.u32 4294901760, %v7751_v58  ;;  %v3234_v50 = vand.u32 4294901760, %v3233_v4 }
 0x1e1   :  { %v3251_v41 = vsub.f32 %v7778_v6, %v10815_v43  ;;  %v1449_v21 = vsub.f32 %v7757_v35, %v11256_v31  ;;  %v10821_v26 = vand.u32 4294901760, %v7785_v37  ;;  %v1432_v27 = vand.u32 4294901760, %v1431_v33 }
 0x1e2   :  { %11254 = vst [vmem:[#allocation99_spill] sm:$0xff] %v8260_v42  ;;  %v1437_v38 = vsub.f32 %v7751_v58, %v11255_v15  ;;  %v1444_v48 = vand.u32 4294901760, %v1443_v36  ;;  %v3240_v42 = vand.u32 4294901760, %v3239_v63  ;;  %v8285_v45 = vpack.c.bf16 %v3234_v50, %v3222_v25 }
 0x1e3   :  { %v3252_v24 = vand.u32 4294901760, %v3251_v41  ;;  %v1450_v47 = vand.u32 4294901760, %v1449_v21  ;;  %v3245_v4 = vsub.f32 %v7785_v37, %v10821_v26  ;;  %v10819_v43 = vand.u32 4294901760, %v7796_v10 }
 0x1e4   :  { %v1438_v28 = vand.u32 4294901760, %v1437_v38  ;;  %11257 = vst [vmem:[#allocation100_spill] sm:$0xff] %v8285_v45  ;;  %v8290_v15 = vpack.c.bf16 %v1444_v48, %v1432_v27  ;;  %v10818_v31 = vand.u32 4294901760, %v7802_v49  ;;  %v10820_v35 = vand.u32 4294901760, %v7854_v5 }
 0x1e5   :  { %v8295_v33 = vpack.c.bf16 %v3252_v24, %v3240_v42  ;;  %v3246_v25 = vand.u32 4294901760, %v3245_v4  ;;  %v10822_v63 = vand.u32 4294901760, %v7808_v60  ;;  %v3257_v21 = vsub.f32 %v7796_v10, %v10819_v43 }
 0x1e6   :  { %11258 = vst [vmem:[#allocation101_spill] sm:$0xff] %v8290_v15  ;;  %v8297_v36 = vpack.c.bf16 %v1450_v47, %v1438_v28  ;;  %v1455_v27 = vsub.f32 %v7802_v49, %v10818_v31  ;;  %v1467_v48 = vsub.f32 %v7854_v5, %v10820_v35  ;;  %v10823_v24 = vand.u32 4294901760, %v7856_v1 }
 0x1e7   :  { %11259 = vst [vmem:[#allocation102_spill] sm:$0xff] %v8295_v33  ;;  %v3263_v47 = vsub.f32 %v7808_v60, %v10822_v63  ;;  %v11261_v28 = vand.u32 4294901760, %v7816_v8  ;;  %v11262_v38 = vand.u32 4294901760, %v7818_v7  ;;  %v10825_v41 = vand.u32 4294901760, %v7879_v34 }
 0x1e8   :  { %11260 = vst [vmem:[#allocation103_spill] sm:$0xff] %v8297_v36  ;;  %v3258_v4 = vand.u32 4294901760, %v3257_v21  ;;  %v1456_v31 = vand.u32 4294901760, %v1455_v27  ;;  %v1468_v43 = vand.u32 4294901760, %v1467_v48  ;;  %v3275_v35 = vsub.f32 %v7856_v1, %v10823_v24  ;;  %v11266_v24 = vld [vmem:[#allocation65_spill] sm:$0xff] }
 0x1e9   :  { %v1461_v42 = vsub.f32 %v7816_v8, %v11261_v28  ;;  %v1473_v50 = vsub.f32 %v7818_v7, %v11262_v38  ;;  %v3264_v26 = vand.u32 4294901760, %v3263_v47  ;;  %v3269_v28 = vsub.f32 %v7879_v34, %v10825_v41 }
 0x1ea   :  { %v8326_v33 = vpack.c.bf16 %v3258_v4, %v3246_v25  ;;  %v8328_v15 = vpack.c.bf16 %v1468_v43, %v1456_v31  ;;  %v3276_v38 = vand.u32 4294901760, %v3275_v35  ;;  %v10824_v21 = vand.u32 4294901760, %v7881_v29  ;;  %v11268_v25 = vld [vmem:[#allocation66_spill] sm:$0xff]  ;;  %v11269_v43 = vld [vmem:[#allocation67_spill] sm:$0xff] }
 0x1eb   :  { %v1462_v36 = vand.u32 4294901760, %v1461_v42  ;;  %v1474_v63 = vand.u32 4294901760, %v1473_v50  ;;  %v3270_v48 = vand.u32 4294901760, %v3269_v28  ;;  %v10826_v45 = vand.u32 4294901760, %v7988_v57 }
 0x1ec   :  { %11263 = vst [vmem:[#allocation104_spill] sm:$0xff] %v8326_v33  ;;  %11264 = vst [vmem:[#allocation105_spill] sm:$0xff] %v8328_v15  ;;  %v10827_v47 = vand.u32 4294901760, %v11266_v24  ;;  %v8335_v42 = vpack.c.bf16 %v3276_v38, %v3264_v26  ;;  %v3281_v50 = vsub.f32 %v7881_v29, %v10824_v21  ;;  %v10834_v4 = vand.u32 4294901760, %v11268_v25 }
 0x1ed   :  { %v8331_v27 = vpack.c.bf16 %v1474_v63, %v1462_v36  ;;  %v1479_v35 = vsub.f32 %v7988_v57, %v10826_v45  ;;  %v11270_v63 = vld [vmem:[#allocation69_spill] sm:$0xff]  ;;  %v11272_v38 = vand.u32 4294901760, %v8030_v16 }
 0x1ee   :  { %11267 = vst [vmem:[#allocation107_spill] sm:$0xff] %v8335_v42  ;;  %v1491_v36 = vsub.f32 %v11266_v24, %v10827_v47  ;;  %v11271_v28 = vand.u32 4294901760, %v11270_v63  ;;  %v3282_v41 = vand.u32 4294901760, %v3281_v50  ;;  %v3287_v31 = vsub.f32 %v11268_v25, %v10834_v4  ;;  %v11274_v42 = vld [vmem:[#allocation71_spill] sm:$0xff] }
 0x1ef   :  { %11265 = vst [vmem:[#allocation106_spill] sm:$0xff] %v8331_v27  ;;  %v1497_v21 = vsub.f32 %v8030_v16, %v11272_v38  ;;  %v11273_v27 = vand.u32 4294901760, %v11269_v43  ;;  %v10840_v15 = vand.u32 4294901760, %v11274_v42  ;;  %v1480_v47 = vand.u32 4294901760, %v1479_v35  ;;  %v11278_v16 = vld [vmem:[#allocation72_spill] sm:$0xff] }
 0x1f0   :  { %v1485_v26 = vsub.f32 %v11270_v63, %v11271_v28  ;;  %v1492_v33 = vand.u32 4294901760, %v1491_v36  ;;  %v8361_v28 = vpack.c.bf16 %v3282_v41, %v3270_v48  ;;  %v3288_v63 = vand.u32 4294901760, %v3287_v31 }
 0x1f1   :  { %v3299_v45 = vsub.f32 %v11269_v43, %v11273_v27  ;;  %v1498_v57 = vand.u32 4294901760, %v1497_v21  ;;  %v3293_v50 = vsub.f32 %v11274_v42, %v10840_v15  ;;  %v10839_v27 = vand.u32 4294901760, %v11278_v16 }
 0x1f2   :  { %v1486_v24 = vand.u32 4294901760, %v1485_v26  ;;  %11275 = vst [vmem:[#allocation66_spill] sm:$0xff] %v8361_v28  ;;  %v8366_v38 = vpack.c.bf16 %v1492_v33, %v1480_v47  ;;  %v10838_v43 = vand.u32 4294901760, %v8054_v18  ;;  %v10841_v41 = vand.u32 4294901760, %v8056_v2  ;;  %v11280_v33 = vld [vmem:[#allocation75_spill] sm:$0xff] }
 0x1f3   :  { %v3300_v29 = vand.u32 4294901760, %v3299_v45  ;;  %v3294_v36 = vand.u32 4294901760, %v3293_v50  ;;  %v10842_v21 = vand.u32 4294901760, %v8058_v61  ;;  %v3305_v45 = vsub.f32 %v11278_v16, %v10839_v27 }
 0x1f4   :  { %11276 = vst [vmem:[#allocation108_spill] sm:$0xff] %v8366_v38  ;;  %v8368_v4 = vpack.c.bf16 %v1498_v57, %v1486_v24  ;;  %v1503_v57 = vsub.f32 %v8054_v18, %v10838_v43  ;;  %v10849_v24 = vand.u32 4294901760, %v11280_v33  ;;  %v11281_v48 = vand.u32 4294901760, %v8070_v22  ;;  %v57_v18 = vpop.permute.xlu0 %56 }
 0x1f5   :  { %v8372_v35 = vpack.c.bf16 %v3300_v29, %v3288_v63  ;;  %v1515_v47 = vsub.f32 %v8056_v2, %v10841_v41  ;;  %v3311_v31 = vsub.f32 %v8058_v61, %v10842_v21  ;;  %v11282_v63 = vand.u32 4294901760, %v8072_v46 }
 0x1f6   :  { %11277 = vst [vmem:[#allocation109_spill] sm:$0xff] %v8368_v4  ;;  %v1509_v29 = vsub.f32 %v8070_v22, %v11281_v48  ;;  %v10851_v50 = vand.u32 4294901760, %v8082_v59  ;;  %v3306_v43 = vand.u32 4294901760, %v3305_v45  ;;  %v1504_v27 = vand.u32 4294901760, %v1503_v57  ;;  %v11285_v22 = vld [vmem:[#allocation80_spill] sm:$0xff] }
 0x1f7   :  { %11279 = vst [vmem:[#allocation72_spill] sm:$0xff] %v8372_v35  ;;  %v1521_v26 = vsub.f32 %v8072_v46, %v11282_v63  ;;  %v3323_v48 = vsub.f32 %v11280_v33, %v10849_v24  ;;  %v1516_v4 = vand.u32 4294901760, %v1515_v47  ;;  %v3312_v35 = vand.u32 4294901760, %v3311_v31  ;;  %v11284_v63 = vld [vmem:[#allocation78_spill] sm:$0xff] }
 0x1f8   :  { %v1510_v15 = vand.u32 4294901760, %v1509_v29  ;;  %v3317_v21 = vsub.f32 %v8082_v59, %v10851_v50  ;;  %v8402_v38 = vpack.c.bf16 %v3306_v43, %v3294_v36  ;;  %v10850_v46 = vand.u32 4294901760, %v11284_v63  ;;  %v11288_v29 = vld [vmem:[#allocation81_spill] sm:$0xff]  ;;  %v11290_v36 = vld [vmem:[#allocation83_spill] sm:$0xff] }
 0x1f9   :  { %v1522_v41 = vand.u32 4294901760, %v1521_v26  ;;  %v3324_v28 = vand.u32 4294901760, %v3323_v48  ;;  %v10852_v45 = vand.u32 4294901760, %v11285_v22  ;;  %v8406_v57 = vpack.c.bf16 %v1516_v4, %v1504_v27  ;;  %v11291_v4 = vld [vmem:[#allocation84_spill] sm:$0xff] }
 0x1fa   :  { %11283 = vst [vmem:[#allocation110_spill] sm:$0xff] %v8402_v38  ;;  %v3318_v24 = vand.u32 4294901760, %v3317_v21  ;;  %v10853_v47 = vand.u32 4294901760, %v11288_v29  ;;  %v3329_v26 = vsub.f32 %v11284_v63, %v10850_v46  ;;  %v10856_v48 = vand.u32 4294901760, %v11290_v36 }
 0x1fb   :  { %11286 = vst [vmem:[#allocation78_spill] sm:$0xff] %v8406_v57  ;;  %v8408_v61 = vpack.c.bf16 %v1522_v41, %v1510_v15  ;;  %v8411_v31 = vpack.c.bf16 %v3324_v28, %v3312_v35  ;;  %v1527_v43 = vsub.f32 %v11285_v22, %v10852_v45  ;;  %v10859_v27 = vand.u32 4294901760, %v11291_v4 }
 0x1fc   :  { %v1539_v15 = vsub.f32 %v11288_v29, %v10853_v47  ;;  %v11292_v41 = vand.u32 4294901760, %v8135_v44  ;;  %v11293_v35 = vand.u32 4294901760, %v8137_v56  ;;  %v3330_v46 = vand.u32 4294901760, %v3329_v26 }
 0x1fd   :  { %11287 = vst [vmem:[#allocation80_spill] sm:$0xff] %v8408_v61  ;;  %11289 = vst [vmem:[#allocation81_spill] sm:$0xff] %v8411_v31  ;;  %v1528_v50 = vand.u32 4294901760, %v1527_v43  ;;  %v3335_v45 = vsub.f32 %v11290_v36, %v10856_v48  ;;  %v10860_v61 = vand.u32 4294901760, %v8160_v53  ;;  %v3347_v47 = vsub.f32 %v11291_v4, %v10859_v27 }
 0x1fe   :  { %v1533_v28 = vsub.f32 %v8135_v44, %v11292_v41  ;;  %v1545_v21 = vsub.f32 %v8137_v56, %v11293_v35  ;;  %v1540_v31 = vand.u32 4294901760, %v1539_v15  ;;  %v8437_v41 = vpack.c.bf16 %v3330_v46, %v3318_v24  ;;  %v11295_v24 = vld [vmem:[#allocation35_spill] sm:$0xff]  ;;  %v11303_v46 = vld [vmem:[#allocation64_spill] sm:$0xff] }
 0x1ff   :  { %v3336_v44 = vand.u32 4294901760, %v3335_v45  ;;  %v3341_v26 = vsub.f32 %v8160_v53, %v10860_v61  ;;  %v10861_v43 = vand.u32 4294901760, %v8162_v19  ;;  %v3348_v48 = vand.u32 4294901760, %v3347_v47  ;;  %v11296_v45 = vld [vmem:[#allocation36_spill] sm:$0xff]  ;;  %v11297_v61 = vld [vmem:[#allocation39_spill] sm:$0xff]  ;;  %v11299_v47 = vld [vmem:[#allocation41_spill] sm:$0xff] }
 0x200   :  { %v1534_v57 = vand.u32 4294901760, %v1533_v28  ;;  %v1546_v38 = vand.u32 4294901760, %v1545_v21  ;;  %11294 = vst [vmem:[#allocation83_spill] sm:$0xff] %v8437_v41  ;;  %v8443_v35 = vpack.c.bf16 %v1540_v31, %v1528_v50  ;;  %v11298_v41 = vld [vmem:[#allocation40_spill] sm:$0xff]  ;;  %v11300_v50 = vld [vmem:[#allocation42_spill] sm:$0xff]  ;;  %v11312_v21 = vld [vmem:[#allocation87_spill] sm:$0xff] }
 0x201   :  { %v3342_v15 = vand.u32 4294901760, %v3341_v26  ;;  %v3353_v28 = vsub.f32 %v8162_v19, %v10861_v43  ;;  %v8454_v27 = vpack.c.bf16 %v3348_v48, %v3336_v44  ;;  %v11304_v43 = vld [vmem:[#allocation65_spill] sm:$0xff]  ;;  %v11305_v44 = vld [vmem:[#allocation67_spill] sm:$0xff]  ;;  %v11307_v48 = vld [vmem:[#allocation70_spill] sm:$0xff] }
 0x202   :  { %v8445_v56 = vpack.c.bf16 %v1546_v38, %v1534_v57  ;;  %v11311_v26 = vld [vmem:[#allocation86_spill] sm:$0xff]  ;;  %v11323_v53 = vld [vmem:[#allocation93_spill] sm:$0xff] }
 0x203   :  { %v3354_v31 = vand.u32 4294901760, %v3353_v28  ;;  %v62_v28 = vpop.permute.xlu0 %61 }
 0x205   :  { %v8476_v57 = vpack.c.bf16 %v3354_v31, %v3342_v15  ;;  %v11302_v15 = vld [vmem:[#allocation56_spill] sm:$0xff] }
 0x25c   :  { %v5714_v60 = vpop.f32.mrb[0].mxu0 }
 0x25d   :  { %v6675_v33 = vadd.f32 %v5714_v60, %v62_v28  ;;  %v793_v34 = vpop.f32.mrb[1].mxu0  ;;  %v11322_v28 = vmov 0.0  }
 0x25e   :  { %v6676_v8 = vadd.f32 %v793_v34, %v57_v18 }
 0x25f   :  { %v8516_v31 = vand.u32 4294901760, %v6675_v33 }
 0x260   :  { %v8518_v12 = vand.u32 4294901760, %v6676_v8 }
 0x261   :  { %11313 = vst [vmem:[#allocation84_spill] sm:$0xff] %v8516_v31  ;;  %v8521_v58 = vsub.f32 %v6675_v33, %v8516_v31  ;;  %v11321_v33 = vld [vmem:[#allocation92_spill] sm:$0xff] }
 0x262   :  { %11314 = vst [vmem:[#allocation35_spill] sm:$0xff] %v8518_v12  ;;  %v8524_v37 = vsub.f32 %v6676_v8, %v8518_v12  ;;  %v11320_v8 = vld [vmem:[#allocation91_spill] sm:$0xff] }
 0x263   :  { %11315 = vst [vmem:[#allocation36_spill] sm:$0xff] %v8521_v58  ;;  %v8530_v38 = vand.u32 4294901760, %v8521_v58 }
 0x264   :  { %11316 = vst [vmem:[#allocation39_spill] sm:$0xff] %v8524_v37  ;;  %v8527_v42 = vand.u32 4294901760, %v8524_v37 }
 0x265   :  { %11318 = vst [vmem:[#allocation41_spill] sm:$0xff] %v8530_v38  ;;  %v1348_v18 = vsub.f32 %v8521_v58, %v8530_v38  ;;  %v11326_v38 = vld [vmem:[#allocation95_spill] sm:$0xff]  ;;  %v11339_v58 = vld [vmem:[#allocation66_spill] sm:$0xff] }
 0x266   :  { %11317 = vst [vmem:[#allocation40_spill] sm:$0xff] %v8527_v42  ;;  %v1337_v60 = vsub.f32 %v8524_v37, %v8527_v42  ;;  %v11333_v42 = vld [vmem:[#allocation102_spill] sm:$0xff]  ;;  %v11340_v37 = vld [vmem:[#allocation108_spill] sm:$0xff] }
 0x267   :  { %v8544_v19 = vand.u32 4294901760, %v1348_v18  ;;  %v11331_v18 = vld [vmem:[#allocation100_spill] sm:$0xff] }
 0x268   :  { %v8534_v34 = vand.u32 4294901760, %v1337_v60  ;;  %v11325_v60 = vld [vmem:[#allocation94_spill] sm:$0xff] }
 0x269   :  { %11324 = vst [vmem:[#allocation70_spill] sm:$0xff] %v8544_v19 }
 0x26a   :  { %11319 = vst [vmem:[#allocation42_spill] sm:$0xff] %v8534_v34  ;;  %1339 = vmatmul.mubr.f32.vlgmr.msra.gmra.mrb[0].mxu1 %v8534_v34  ;;  %3147 = vmatmul.mubr.f32.vlgmr.msra.gmra.mrb[2].mxu0 %v8534_v34  ;;  %v11327_v34 = vld [vmem:[#allocation96_spill] sm:$0xff] }
 0x26b   :  { %5942 = vmatpush1.bf16.msra.mxu1 %v11320_v8  ;;  %6326 = vmatpush1.bf16.msra.mxu0 %v11321_v33  ;;  %v11328_v8 = vld [vmem:[#allocation97_spill] sm:$0xff]  ;;  %v11329_v33 = vld [vmem:[#allocation98_spill] sm:$0xff] }
 0x26c   :  { %1344 = vmatprep.mubr.f32.mxu1 %v11322_v28  ;;  %5944 = vmatprep.subr.bf16.mxu1 %v11323_v53  ;;  %v11330_v53 = vld [vmem:[#allocation99_spill] sm:$0xff] }
 0x26d   :  { %3152 = vmatprep.mubr.f32.mxu0 %v11322_v28  ;;  %6328 = vmatprep.subr.bf16.mxu0 %v11325_v60  ;;  %v11332_v60 = vld [vmem:[#allocation101_spill] sm:$0xff] }
 0x26e   :  { %1350 = vmatmul.mubr.f32.gmra.mrb[2].mxu1 %v8544_v19  ;;  %3158 = vmatmul.mubr.f32.gmra.mrb[4].mxu0 %v8544_v19  ;;  %v11334_v19 = vld [vmem:[#allocation103_spill] sm:$0xff] }
 0x26f   :  { %5946 = vmatpush1.bf16.msra.mxu1 %v11326_v38  ;;  %6330 = vmatpush1.bf16.msra.mxu0 %v11327_v34  ;;  %v11335_v38 = vld [vmem:[#allocation104_spill] sm:$0xff]  ;;  %v11336_v34 = vld [vmem:[#allocation105_spill] sm:$0xff] }
 0x270   :  { %5948 = vmatprep.subr.bf16.mxu1 %v11328_v8  ;;  %6332 = vmatprep.subr.bf16.mxu0 %v11329_v33  ;;  %v11337_v8 = vld [vmem:[#allocation107_spill] sm:$0xff]  ;;  %v11338_v33 = vld [vmem:[#allocation106_spill] sm:$0xff] }
 0x271   :  { %1580 = vmatprep.mubr.f32.mxu1 %v11322_v28  ;;  %3388 = vmatprep.mubr.f32.mxu0 %v11322_v28 }
 0x273   :  { %5950 = vmatpush1.bf16.msra.mxu1 %v11330_v53  ;;  %6334 = vmatpush1.bf16.msra.mxu0 %v11331_v18  ;;  %v11341_v53 = vld [vmem:[#allocation72_spill] sm:$0xff]  ;;  %v11342_v18 = vld [vmem:[#allocation109_spill] sm:$0xff] }
 0x274   :  { %5952 = vmatprep.subr.bf16.mxu1 %v11332_v60  ;;  %6336 = vmatprep.subr.bf16.mxu0 %v11333_v42  ;;  %v11343_v60 = vld [vmem:[#allocation110_spill] sm:$0xff] }
 0x275   :  { %v11344_v42 = vld [vmem:[#allocation78_spill] sm:$0xff] }
 0x277   :  { %5954 = vmatpush1.bf16.msra.mxu1 %v11334_v19  ;;  %6338 = vmatpush1.bf16.msra.mxu0 %v11335_v38  ;;  %v11345_v19 = vld [vmem:[#allocation81_spill] sm:$0xff]  ;;  %v11346_v38 = vld [vmem:[#allocation80_spill] sm:$0xff] }
 0x278   :  { %5956 = vmatprep.subr.bf16.mxu1 %v11336_v34  ;;  %6340 = vmatprep.subr.bf16.mxu0 %v11337_v8  ;;  %v11347_v34 = vld [vmem:[#allocation83_spill] sm:$0xff] }
 0x27b   :  { %5958 = vmatpush1.bf16.msra.mxu1 %v11338_v33  ;;  %6342 = vmatpush1.bf16.msra.mxu0 %v11339_v58  ;;  %v11348_v58 = vld [vmem:[#allocation37_spill] sm:$0xff]  ;;  %v11350_v33 = vpack.c.bf16 %v7643_v55, %v7612_v62 }
 0x27c   :  { %5960 = vmatprep.subr.bf16.mxu1 %v11340_v37  ;;  %6344 = vmatprep.subr.bf16.mxu0 %v11341_v53  ;;  %v11349_v37 = vld [vmem:[#allocation38_spill] sm:$0xff]  ;;  %v11355_v53 = vpack.c.bf16 %v7656_v32, %v7654_v20 }
 0x27d   :  { %v5971_v8 = vpack.c.bf16 %v11349_v37, %v11348_v58 }
 0x27f   :  { %5962 = vmatpush1.bf16.msra.mxu1 %v11342_v18  ;;  %6346 = vmatpush1.bf16.msra.mxu0 %v11343_v60  ;;  %v11356_v18 = vpack.c.bf16 %v7706_v14, %v7688_v39  ;;  %v11357_v60 = vpack.c.bf16 %v7710_v11, %v7708_v3 }
 0x280   :  { %5964 = vmatprep.subr.bf16.mxu1 %v11344_v42  ;;  %6348 = vmatprep.subr.bf16.mxu0 %v11345_v19  ;;  %v11358_v42 = vpack.c.bf16 %v7732_v52, %v7730_v0  ;;  %v11359_v19 = vpack.c.bf16 %v11300_v50, %v7694_v23 }
 0x283   :  { %5966 = vmatpush1.bf16.msra.mxu1 %v11346_v38  ;;  %6350 = vmatpush1.bf16.msra.mxu0 %v11347_v34  ;;  %v11360_v38 = vpack.c.bf16 %v7755_v54, %v7753_v13  ;;  %v11361_v34 = vpack.c.bf16 %v7774_v9, %v7764_v51 }
 0x284   :  { %5968 = vmatprep.subr.bf16.mxu1 %v8443_v35  ;;  %6352 = vmatprep.subr.bf16.mxu0 %v8454_v27  ;;  %v11351_v35 = vpack.c.bf16 %v11296_v45, %v11295_v24  ;;  %v11352_v27 = vpack.c.bf16 %v11298_v41, %v11297_v61 }
 0x287   :  { %5970 = vmatpush1.bf16.msra.mxu1 %v8445_v56  ;;  %6354 = vmatpush1.bf16.msra.mxu0 %v8476_v57  ;;  %v11353_v56 = vpack.c.bf16 %v11299_v47, %v7666_v17  ;;  %v11354_v57 = vpack.c.bf16 %v7672_v40, %v7670_v30 }
 0x288   :  { %5972 = vmatprep.subr.bf16.mxu1 %v5971_v8  ;;  %6356 = vmatprep.subr.bf16.mxu0 %v11350_v33  ;;  %v11362_v8 = vld [vmem:[#allocation45_spill] sm:$0xff] }
 0x289   :  { %v11363_v33 = vpack.c.bf16 %v7778_v6, %v11362_v8 }
 0x28a   :  { %1582 = vmatmul.mubr.f32.vlgmr.msra.gmra.mrb[0].mxu1 %v8518_v12  ;;  %3390 = vmatmul.mubr.f32.vlgmr.msra.gmra.mrb[2].mxu0 %v8518_v12 }
 0x28b   :  { %5974 = vmatpush1.bf16.msra.mxu1 %v11351_v35  ;;  %6358 = vmatpush1.bf16.msra.mxu0 %v11352_v27  ;;  %v11364_v35 = vld [vmem:[#allocation44_spill] sm:$0xff]  ;;  %v11365_v27 = vld [vmem:[#allocation43_spill] sm:$0xff] }
 0x28c   :  { %1587 = vmatprep.mubr.f32.mxu1 %v11322_v28  ;;  %3395 = vmatprep.mubr.f32.mxu0 %v11322_v28 }
 0x28d   :  { %5976 = vmatprep.subr.bf16.mxu1 %v11353_v56  ;;  %6360 = vmatprep.subr.bf16.mxu0 %v11354_v57  ;;  %v11366_v56 = vpack.c.bf16 %v11364_v35, %v11365_v27  ;;  %v11367_v57 = vld [vmem:[#allocation46_spill] sm:$0xff] }
 0x28e   :  { %1589 = vmatmul.mubr.f32.gmra.mrb[2].mxu1 %v8516_v31  ;;  %3397 = vmatmul.mubr.f32.gmra.mrb[4].mxu0 %v8516_v31 }
 0x28f   :  { %5978 = vmatpush1.bf16.msra.mxu1 %v11355_v53  ;;  %6362 = vmatpush1.bf16.msra.mxu0 %v11356_v18  ;;  %v11368_v53 = vpack.c.bf16 %v7796_v10, %v11367_v57  ;;  %v11369_v18 = vpack.c.bf16 %v7854_v5, %v7802_v49 }
 0x290   :  { %5980 = vmatprep.subr.bf16.mxu1 %v11357_v60  ;;  %6364 = vmatprep.subr.bf16.mxu0 %v11358_v42  ;;  %v11370_v60 = vld [vmem:[#allocation47_spill] sm:$0xff] }
 0x291   :  { %1723 = vmatprep.mubr.f32.mxu1 %v11322_v28  ;;  %3531 = vmatprep.mubr.f32.mxu0 %v11322_v28  ;;  %v11371_v42 = vpack.c.bf16 %v7856_v1, %v11370_v60 }
 0x293   :  { %5982 = vmatpush1.bf16.msra.mxu1 %v11359_v19  ;;  %6366 = vmatpush1.bf16.msra.mxu0 %v11360_v38  ;;  %v11372_v19 = vld [vmem:[#allocation50_spill] sm:$0xff] }
 0x294   :  { %5984 = vmatprep.subr.bf16.mxu1 %v11361_v34  ;;  %6368 = vmatprep.subr.bf16.mxu0 %v11363_v33  ;;  %v11373_v38 = vpack.c.bf16 %v7818_v7, %v11372_v19  ;;  %v11374_v34 = vld [vmem:[#allocation55_spill] sm:$0xff] }
 0x295   :  { %v11375_v33 = vpack.c.bf16 %v11302_v15, %v11374_v34  ;;  %v11385_v34 = vld [vmem:[#allocation74_spill] sm:$0xff] }
 0x297   :  { %5986 = vmatpush1.bf16.msra.mxu1 %v11366_v56  ;;  %6370 = vmatpush1.bf16.msra.mxu0 %v11368_v53  ;;  %v11376_v56 = vpack.c.bf16 %v11304_v43, %v11303_v46  ;;  %v11377_v53 = vpack.c.bf16 %v11305_v44, %v11268_v25  ;;  %v11388_v46 = vld [vmem:[#allocation76_spill] sm:$0xff] }
 0x298   :  { %5988 = vmatprep.subr.bf16.mxu1 %v11369_v18  ;;  %6372 = vmatprep.subr.bf16.mxu0 %v11371_v42  ;;  %v11378_v18 = vld [vmem:[#allocation69_spill] sm:$0xff]  ;;  %v11380_v42 = vld [vmem:[#allocation71_spill] sm:$0xff] }
 0x299   :  { %v11379_v31 = vpack.c.bf16 %v11307_v48, %v11378_v18  ;;  %v11381_v12 = vpack.c.bf16 %v11278_v16, %v11380_v42 }
 0x29b   :  { %5990 = vmatpush1.bf16.msra.mxu1 %v11373_v38  ;;  %6374 = vmatpush1.bf16.msra.mxu0 %v11375_v33  ;;  %v11382_v38 = vld [vmem:[#allocation73_spill] sm:$0xff]  ;;  %v11384_v33 = vld [vmem:[#allocation75_spill] sm:$0xff] }
 0x29c   :  { %5992 = vmatprep.subr.bf16.mxu1 %v11376_v56  ;;  %6376 = vmatprep.subr.bf16.mxu0 %v11377_v53  ;;  %v11383_v15 = vpack.c.bf16 %v8056_v2, %v11382_v38  ;;  %v11386_v43 = vpack.c.bf16 %v11384_v33, %v11385_v34  ;;  %v11387_v56 = vld [vmem:[#allocation77_spill] sm:$0xff]  ;;  %v11390_v53 = vpack.c.bf16 %v11284_v63, %v8082_v59 }
 0x29d   :  { %v11389_v44 = vpack.c.bf16 %v11387_v56, %v11388_v46  ;;  %v11395_v33 = vld [vmem:[#allocation89_spill] sm:$0xff]  ;;  %v11408_v46 = vld [vmem:[#allocation15_spill] sm:$0xff] }
 0x29e   :  { %vm11409_vm15 = vnez %v11408_v46  ;;  %v11418_v46 = vld [vmem:[#allocation31_spill] sm:$0xff] }
 0x29f   :  { %5994 = vmatpush1.bf16.msra.mxu1 %v11379_v31  ;;  %6378 = vmatpush1.bf16.msra.mxu0 %v11381_v12  ;;  %v11391_v31 = vpack.c.bf16 %v11288_v29, %v11285_v22  ;;  %v11392_v12 = vpack.c.bf16 %v11291_v4, %v11290_v36 }
 0x2a0   :  { %5996 = vmatprep.subr.bf16.mxu1 %v11383_v15  ;;  %6380 = vmatprep.subr.bf16.mxu0 %v11386_v43  ;;  %v11393_v15 = vpack.c.bf16 %v11312_v21, %v11311_v26  ;;  %v11394_v43 = vld [vmem:[#allocation90_spill] sm:$0xff] }
 0x2a1   :  { %v11396_v56 = vpack.c.bf16 %v11394_v43, %v11395_v33  ;;  %v11452_v33 = vand.u32 4294901760, %v7643_v55  ;;  %v11459_v55 = vand.u32 4294901760, %v7666_v17  ;;  %v11466_v17 = vand.u32 4294901760, %v7688_v39  ;;  %v11472_v39 = vld [vmem:[#allocation41_spill] sm:$0xff] }
 0x2a3   :  { %5998 = vmatpush1.bf16.msra.mxu1 %v11389_v44  ;;  %6382 = vmatpush1.bf16.msra.mxu0 %v11390_v53  ;;  %v11397_v44 = vmov 1.0|1.0   ;;  %v11433_v53 = vld [vmem:[#allocation52_spill] sm:$0xff] }
 0x2a4   :  { %6000 = vmatprep.subr.bf16.mxu1 %v11391_v31  ;;  %6384 = vmatprep.subr.bf16.mxu0 %v11392_v12  ;;  %v11400_v31 = vld [vmem:[#allocation39_spill] sm:$0xff]  ;;  %v11414_v12 = vld [vmem:[#allocation30_spill] sm:$0xff] }
 0x2a7   :  { %6002 = vmatpush1.bf16.msra.mxu1 %v11393_v15  ;;  %6386 = vmatpush1.bf16.msra.mxu0 %v11396_v56  ;;  %v11410_v56 = vld [vmem:[#allocation29_spill] sm:$0xff]  ;;  %v11416_v15 = vld [vmem:[#allocation19_spill] sm:$0xff] }
 0x2a8   :  { %6004 = vmatprep.subr.msk.bf16.mxu1 %vm7168_vm3, %v11397_v44  ;;  %6388 = vmatprep.subr.msk.bf16.mxu0 %vm7404_vm0, %v11397_v44  ;;  %vm11411_vm2 = vnez %v11410_v56  ;;  %v11420_v56 = vld [vmem:[#allocation20_spill] sm:$0xff] }
 0x2aa   :  { %1726 = vmatmul.mubr.f32.vlgmr.msra.gmra.mrb[0].mxu1 %v11400_v31  ;;  %3534 = vmatmul.mubr.f32.vlgmr.msra.gmra.mrb[2].mxu0 %v11400_v31  ;;  %v11405_v31 = vld [vmem:[#allocation36_spill] sm:$0xff] }
 0x2ab   :  { %6006 = vmatpush1.bf16.msk.msra.mxu1 %vm7191_vm6, %v11397_v44  ;;  %6390 = vmatpush1.bf16.msk.msra.mxu0 %vm7429_vm4, %v11397_v44 }
 0x2ac   :  { %1731 = vmatprep.mubr.f32.mxu1 %v11322_v28  ;;  %3539 = vmatprep.mubr.f32.mxu0 %v11322_v28 }
 0x2ad   :  { %6008 = vmatprep.subr.msk.bf16.mxu1 %vm7212_vm9, %v11397_v44  ;;  %6392 = vmatprep.subr.msk.bf16.mxu0 %vm7439_vm1, %v11397_v44 }
 0x2ae   :  { %1734 = vmatmul.mubr.f32.gmra.mrb[2].mxu1 %v11405_v31  ;;  %3542 = vmatmul.mubr.f32.gmra.mrb[4].mxu0 %v11405_v31  ;;  %v11412_v31 = vld [vmem:[#allocation17_spill] sm:$0xff] }
 0x2af   :  { %6010 = vmatpush1.bf16.msk.msra.mxu1 %vm7235_vm12, %v11397_v44  ;;  %6394 = vmatpush1.bf16.msk.msra.mxu0 %vm7465_vm10, %v11397_v44  ;;  %vm11413_vm14 = vnez %v11412_v31  ;;  %vm11415_vm12 = vnez %v11414_v12  ;;  %vm11417_vm10 = vnez %v11416_v15  ;;  %v11423_v31 = vld [vmem:[#allocation23_spill] sm:$0xff]  ;;  %v11425_v12 = vld [vmem:[#allocation33_spill] sm:$0xff]  ;;  %v11427_v15 = vld [vmem:[#allocation24_spill] sm:$0xff] }
 0x2b0   :  { %6012 = vmatprep.subr.msk.bf16.mxu1 %vm11409_vm15, %v11397_v44  ;;  %6396 = vmatprep.subr.msk.bf16.mxu0 %vm11411_vm2, %v11397_v44  ;;  %vm11419_vm15 = vnez %v11418_v46  ;;  %vm11421_vm2 = vnez %v11420_v56  ;;  %v11429_v46 = vld [vmem:[#allocation34_spill] sm:$0xff]  ;;  %v11431_v56 = vld [vmem:[#allocation51_spill] sm:$0xff] }
 0x2b1   :  { %1836 = vmatprep.mubr.f32.mxu1 %v11322_v28  ;;  %3644 = vmatprep.mubr.f32.mxu0 %v11322_v28 }
 0x2b3   :  { %6014 = vmatpush1.bf16.msk.msra.mxu1 %vm11413_vm14, %v11397_v44  ;;  %6398 = vmatpush1.bf16.msk.msra.mxu0 %vm11415_vm12, %v11397_v44  ;;  %vm11424_vm14 = vnez %v11423_v31  ;;  %vm11426_vm12 = vnez %v11425_v12  ;;  %v11435_v31 = vld [vmem:[#allocation57_spill] sm:$0xff]  ;;  %v11437_v12 = vld [vmem:[#allocation58_spill] sm:$0xff] }
 0x2b4   :  { %6016 = vmatprep.subr.msk.bf16.mxu1 %vm11417_vm10, %v11397_v44  ;;  %6400 = vmatprep.subr.msk.bf16.mxu0 %vm11419_vm15, %v11397_v44  ;;  %vm11428_vm10 = vnez %v11427_v15  ;;  %vm11430_vm15 = vnez %v11429_v46  ;;  %v11440_v46 = vld [vmem:[#allocation60_spill] sm:$0xff]  ;;  %v11449_v15 = vand.u32 4294901760, %v11348_v58  ;;  %v11456_v58 = vand.u32 4294901760, %v11296_v45 }
 0x2b7   :  { %6018 = vmatpush1.bf16.msk.msra.mxu1 %vm11421_vm2, %v11397_v44  ;;  %6402 = vmatpush1.bf16.msk.msra.mxu0 %vm7533_vm7, %v11397_v44  ;;  %vm11432_vm2 = vnez %v11431_v56  ;;  %vm11434_vm7 = vnez %v11433_v53  ;;  %v11442_v56 = vld [vmem:[#allocation63_spill] sm:$0xff]  ;;  %v11463_v53 = vld [vmem:[#allocation40_spill] sm:$0xff] }
 0x2b8   :  { %6020 = vmatprep.subr.msk.bf16.mxu1 %vm11424_vm14, %v11397_v44  ;;  %6404 = vmatprep.subr.msk.bf16.mxu0 %vm11426_vm12, %v11397_v44  ;;  %vm11436_vm14 = vnez %v11435_v31  ;;  %vm11438_vm12 = vnez %v11437_v12  ;;  %v11445_v31 = vld [vmem:[#allocation79_spill] sm:$0xff]  ;;  %v11447_v12 = vld [vmem:[#allocation82_spill] sm:$0xff] }
 0x2bb   :  { %6022 = vmatpush1.bf16.msk.msra.mxu1 %vm11428_vm10, %v11397_v44  ;;  %6406 = vmatpush1.bf16.msk.msra.mxu0 %vm11430_vm15, %v11397_v44  ;;  %vm11441_vm15 = vnez %v11440_v46  ;;  %v11450_v46 = vand.u32 4294901760, %v11349_v37 }
 0x2bc   :  { %6024 = vmatprep.subr.msk.bf16.mxu1 %vm11432_vm2, %v11397_v44  ;;  %6408 = vmatprep.subr.msk.bf16.mxu0 %vm11434_vm7, %v11397_v44  ;;  %vm11443_vm2 = vnez %v11442_v56  ;;  %v11451_v56 = vand.u32 4294901760, %v7612_v62  ;;  %v11458_v62 = vand.u32 4294901760, %v11298_v41  ;;  %v11465_v41 = vand.u32 4294901760, %v7656_v32 }
 0x2bd   :  { %v6035_v43 = vpack.c.bf16 %v11450_v46, %v11449_v15  ;;  %v11457_v46 = vand.u32 4294901760, %v11297_v61  ;;  %v11464_v61 = vand.u32 4294901760, %v7654_v20  ;;  %v11471_v20 = vand.u32 4294901760, %v7732_v52 }
 0x2be   :  { %v6419_v21 = vpack.c.bf16 %v11452_v33, %v11451_v56  ;;  %v11460_v33 = vand.u32 4294901760, %v11299_v47  ;;  %v11461_v56 = vand.u32 4294901760, %v7670_v30  ;;  %v11468_v30 = vand.u32 4294901760, %v7708_v3 }
 0x2bf   :  { %6026 = vmatpush1.bf16.msk.msra.mxu1 %vm11436_vm14, %v11397_v44  ;;  %6410 = vmatpush1.bf16.msk.msra.mxu0 %vm11438_vm12, %v11397_v44  ;;  %vm11446_vm14 = vnez %v11445_v31  ;;  %vm11448_vm12 = vnez %v11447_v12  ;;  %v11455_v12 = vand.u32 4294901760, %v11295_v24  ;;  %v6421_v37 = vpack.c.bf16 %v11458_v62, %v11457_v46 }
 0x2c0   :  { %6028 = vmatprep.subr.msk.bf16.mxu1 %vm7926_vm8, %v11397_v44  ;;  %6412 = vmatprep.subr.msk.bf16.mxu0 %vm11441_vm15, %v11397_v44  ;;  %v6039_v15 = vpack.c.bf16 %v11460_v33, %v11459_v55  ;;  %v11462_v31 = vand.u32 4294901760, %v7672_v40  ;;  %v6041_v45 = vpack.c.bf16 %v11465_v41, %v11464_v61  ;;  %v11469_v40 = vand.u32 4294901760, %v7710_v11  ;;  %v11493_v41 = vld [vmem:[#allocation56_spill] sm:$0xff] }
 0x2c1   :  { %v6037_v26 = vpack.c.bf16 %v11456_v58, %v11455_v12  ;;  %v11474_v3 = vand.u32 4294901760, %v11300_v50  ;;  %v11475_v11 = vand.u32 4294901760, %v7753_v13  ;;  %v11477_v52 = vand.u32 4294901760, %v7764_v51 }
 0x2c2   :  { %v6423_v24 = vpack.c.bf16 %v11462_v31, %v11461_v56  ;;  %v11478_v58 = vand.u32 4294901760, %v7774_v9  ;;  %v11479_v62 = vand.u32 4294901760, %v11362_v8  ;;  %v11481_v13 = vand.u32 4294901760, %v11365_v27 }
 0x2c3   :  { %6030 = vmatpush1.bf16.msk.msra.mxu1 %vm11443_vm2, %v11397_v44  ;;  %6414 = vmatpush1.bf16.msk.msra.mxu0 %vm8005_vm11, %v11397_v44  ;;  %v11483_v51 = vand.u32 4294901760, %v11367_v57  ;;  %v11484_v9 = vand.u32 4294901760, %v7796_v10  ;;  %v11486_v8 = vand.u32 4294901760, %v7854_v5  ;;  %v11488_v56 = vand.u32 4294901760, %v7856_v1  ;;  %v11495_v5 = vld [vmem:[#allocation64_spill] sm:$0xff] }
 0x2c4   :  { %6032 = vmatprep.subr.msk.bf16.mxu1 %vm11446_vm14, %v11397_v44  ;;  %6416 = vmatprep.subr.msk.bf16.mxu0 %vm11448_vm12, %v11397_v44  ;;  %v6047_v46 = vpack.c.bf16 %v11478_v58, %v11477_v52  ;;  %v11490_v57 = vand.u32 4294901760, %v7818_v7  ;;  %v11502_v7 = vand.u32 4294901760, %v11378_v18 }
 0x2c5   :  { %v6433_v55 = vpack.c.bf16 %v11484_v9, %v11483_v51 }
 0x2c7   :  { %6034 = vmatpush1.bf16.msk.msra.mxu1 %vm8128_vm5, %v11397_v44  ;;  %6418 = vmatpush1.bf16.msk.msra.mxu0 %vm8145_vm13, %v11397_v44 }
 0x2c8   :  { %6036 = vmatprep.subr.bf16.mxu1 %v6035_v43  ;;  %6420 = vmatprep.subr.bf16.mxu0 %v6419_v21  ;;  %v11467_v21 = vand.u32 4294901760, %v7706_v14  ;;  %v11470_v43 = vand.u32 4294901760, %v7730_v0  ;;  %v11473_v14 = vand.u32 4294901760, %v7694_v23  ;;  %v11476_v0 = vand.u32 4294901760, %v7755_v54 }
 0x2c9   :  { %v11482_v54 = vand.u32 4294901760, %v11364_v35  ;;  %v11489_v35 = vand.u32 4294901760, %v11372_v19 }
 0x2ca   :  { %1840 = vmatmul.mubr.f32.vlgmr.msra.gmra.mrb[0].mxu1 %v11463_v53  ;;  %3648 = vmatmul.mubr.f32.vlgmr.msra.gmra.mrb[2].mxu0 %v11463_v53  ;;  %v6425_v47 = vpack.c.bf16 %v11467_v21, %v11466_v17  ;;  %v6427_v32 = vpack.c.bf16 %v11471_v20, %v11470_v43  ;;  %v6045_v31 = vpack.c.bf16 %v11474_v3, %v11473_v14  ;;  %v11496_v17 = vand.u32 4294901760, %v11495_v5  ;;  %v11549_v5 = vld [vmem:[#allocation19_spill] sm:$0xff] }
 0x2cb   :  { %6038 = vmatpush1.bf16.msra.mxu1 %v6037_v26  ;;  %6422 = vmatpush1.bf16.msra.mxu0 %v6421_v37  ;;  %v6043_v26 = vpack.c.bf16 %v11469_v40, %v11468_v30  ;;  %v6429_v12 = vpack.c.bf16 %v11476_v0, %v11475_v11  ;;  %v11480_v37 = vand.u32 4294901760, %v7778_v6  ;;  %v6049_v50 = vpack.c.bf16 %v11482_v54, %v11481_v13  ;;  %v11500_v30 = vld [vmem:[#allocation67_spill] sm:$0xff] }
 0x2cc   :  { %1845 = vmatprep.mubr.f32.mxu1 %v11322_v28  ;;  %3653 = vmatprep.mubr.f32.mxu0 %v11322_v28  ;;  %v11485_v6 = vand.u32 4294901760, %v7802_v49  ;;  %v6053_v10 = vpack.c.bf16 %v11490_v57, %v11489_v35  ;;  %v11501_v40 = vand.u32 4294901760, %v11500_v30  ;;  %v11504_v20 = vand.u32 4294901760, %v11380_v42  ;;  %v11509_v0 = vld [vmem:[#allocation75_spill] sm:$0xff]  ;;  %v11513_v42 = vld [vmem:[#allocation77_spill] sm:$0xff]  ;;  %v11536_v57 = vld [vmem:[#allocation84_spill] sm:$0xff] }
 0x2cd   :  { %6040 = vmatprep.subr.bf16.mxu1 %v6039_v15  ;;  %6424 = vmatprep.subr.bf16.mxu0 %v6423_v24  ;;  %v6431_v23 = vpack.c.bf16 %v11480_v37, %v11479_v62  ;;  %v11487_v15 = vand.u32 4294901760, %v11370_v60  ;;  %v11491_v24 = vld [vmem:[#allocation55_spill] sm:$0xff]  ;;  %v11497_v60 = vld [vmem:[#allocation65_spill] sm:$0xff]  ;;  %v11506_v3 = vand.u32 4294901760, %v11382_v38  ;;  %v11508_v11 = vand.u32 4294901760, %v11385_v34 }
 0x2ce   :  { %1849 = vmatmul.mubr.f32.gmra.mrb[2].mxu1 %v11472_v39  ;;  %3657 = vmatmul.mubr.f32.gmra.mrb[4].mxu0 %v11472_v39  ;;  %v6051_v33 = vpack.c.bf16 %v11486_v8, %v11485_v6  ;;  %v11492_v61 = vand.u32 4294901760, %v11491_v24  ;;  %v11498_v21 = vand.u32 4294901760, %v11497_v60  ;;  %v11514_v58 = vand.u32 4294901760, %v11513_v42  ;;  %v11527_v8 = vld [vmem:[#allocation90_spill] sm:$0xff]  ;;  %v11539_v24 = vld [vmem:[#allocation28_spill] sm:$0xff]  ;;  %v11561_v30 = vld [vmem:[#allocation5_spill] sm:$0xff] }
 0x2cf   :  { %6042 = vmatpush1.bf16.msra.mxu1 %v6041_v45  ;;  %6426 = vmatpush1.bf16.msra.mxu0 %v6425_v47  ;;  %v6435_v27 = vpack.c.bf16 %v11488_v56, %v11487_v15  ;;  %v11494_v45 = vand.u32 4294901760, %v11493_v41  ;;  %v11499_v47 = vand.u32 4294901760, %v11268_v25  ;;  %v11507_v25 = vand.u32 4294901760, %v8056_v2  ;;  %v11543_v41 = vld [vmem:[#allocation29_spill] sm:$0xff]  ;;  %v11553_v60 = vld [vmem:[#allocation20_spill] sm:$0xff] }
 0x2d0   :  { %6044 = vmatprep.subr.bf16.mxu1 %v6043_v26  ;;  %6428 = vmatprep.subr.bf16.mxu0 %v6427_v32  ;;  %v6055_v1 = vpack.c.bf16 %v11498_v21, %v11496_v17  ;;  %v11503_v26 = vand.u32 4294901760, %v11307_v48  ;;  %v11505_v32 = vand.u32 4294901760, %v11278_v16  ;;  %v11511_v48 = vld [vmem:[#allocation76_spill] sm:$0xff]  ;;  %v11516_v62 = vand.u32 4294901760, %v11284_v63  ;;  %v11551_v17 = vld [vmem:[#allocation31_spill] sm:$0xff] }
 0x2d1   :  { %2015 = vmatprep.mubr.f32.mxu1 %v11322_v28  ;;  %3823 = vmatprep.mubr.f32.mxu0 %v11322_v28  ;;  %v6437_v49 = vpack.c.bf16 %v11494_v45, %v11492_v61  ;;  %v6439_v19 = vpack.c.bf16 %v11501_v40, %v11499_v47  ;;  %v11512_v52 = vand.u32 4294901760, %v11511_v48  ;;  %v11517_v2 = vand.u32 4294901760, %v11285_v22  ;;  %v11541_v61 = vld [vmem:[#allocation15_spill] sm:$0xff]  ;;  %v11545_v45 = vld [vmem:[#allocation17_spill] sm:$0xff]  ;;  %v11555_v21 = vld [vmem:[#allocation32_spill] sm:$0xff] }
 0x2d2   :  { %v6057_v43 = vpack.c.bf16 %v11503_v26, %v11502_v7  ;;  %v6441_v14 = vpack.c.bf16 %v11505_v32, %v11504_v20  ;;  %v11518_v34 = vand.u32 4294901760, %v11288_v29  ;;  %v11520_v13 = vand.u32 4294901760, %v11291_v4  ;;  %v11531_v4 = vld [vmem:[#allocation35_spill] sm:$0xff]  ;;  %v11559_v47 = vld [vmem:[#allocation33_spill] sm:$0xff]  ;;  %v11563_v7 = vld [vmem:[#allocation34_spill] sm:$0xff] }
 0x2d3   :  { %6046 = vmatpush1.bf16.msra.mxu1 %v6045_v31  ;;  %6430 = vmatpush1.bf16.msra.mxu0 %v6429_v12  ;;  %v6059_v31 = vpack.c.bf16 %v11507_v25, %v11506_v3  ;;  %v11510_v12 = vand.u32 4294901760, %v11509_v0  ;;  %v6061_v16 = vpack.c.bf16 %v11514_v58, %v11512_v52  ;;  %v835_v40 = vsub.s32 3, %v11561_v30  ;;  %v11565_v26 = vld [vmem:[#allocation51_spill] sm:$0xff]  ;;  %v9000_v32 = vld [vmem:[%s10572_s0] sm:$0xff]  ;;  %v11571_v25 = vld [vmem:[#allocation58_spill] sm:$0xff]  ;;  %s6802_s0 = smov [#allocation2]  }
 0x2d4   :  { %6048 = vmatprep.subr.bf16.mxu1 %v6047_v46  ;;  %6432 = vmatprep.subr.bf16.mxu0 %v6431_v23  ;;  %v11515_v46 = vand.u32 4294901760, %v8082_v59  ;;  %v6063_v37 = vpack.c.bf16 %v11518_v34, %v11517_v2  ;;  %v11519_v23 = vand.u32 4294901760, %v11290_v36  ;;  %v11523_v59 = vld [vmem:[#allocation87_spill] sm:$0xff]  ;;  %v831_v20 = vsub.s32 2, %v11561_v30  ;;  %11568 = vst [vmem:[#allocation91_spill] sm:$0xff] %v9000_v32  ;;  %v11569_v3 = vld [vmem:[#allocation57_spill] sm:$0xff] }
 0x2d5   :  { %v6443_v18 = vpack.c.bf16 %v11510_v12, %v11508_v11  ;;  %v11524_v9 = vand.u32 4294901760, %v11523_v59  ;;  %v11575_v12 = vld [vmem:[#allocation6_spill] sm:$0xff]  ;;  %v11590_v59 = vld [vmem:[#allocation12_spill] sm:$0xff]  ;;  %v11718_v58 = vld [vmem:[#allocation5_spill] sm:$0xff]  ;;  %s4874_s30 = sshll.u32 %s6802_s0, 4  ;;  %s4875_s30 = int_to_ptr.vmem [resolvable:$true] %s4874_s30 }
 0x2d6   :  { %v6445_v38 = vpack.c.bf16 %v11516_v62, %v11515_v46  ;;  %v6447_v54 = vpack.c.bf16 %v11520_v13, %v11519_v23  ;;  %v9018_v0 = vrot.slane %v9000_v32, %v831_v20  ;;  %v11583_v46 = vld [vmem:[#allocation9_spill] sm:$0xff]  ;;  %v11610_v62 = vmov 0  ;;  %s6775_s5 = scalar_lea.vmem %s4875_s30, 2048  ;;  %p6780_p1 = scmp.lt.s32.totalorder %s4875_s30, %s4875_s30 }
 0x2d7   :  { %6050 = vmatpush1.bf16.msra.mxu1 %v6049_v50  ;;  %6434 = vmatpush1.bf16.msra.mxu0 %v6433_v55  ;;  %v11521_v50 = vld [vmem:[#allocation86_spill] sm:$0xff]  ;;  %v11525_v55 = vld [vmem:[#allocation89_spill] sm:$0xff]  ;;  %v851_v23 = vsub.s32 7, %v11718_v58  ;;  %p6776_p0 = scmp.ne.s32.totalorder %s4875_s30, %s6775_s5  ;;  %p6781_p2 = scmp.lt.s32.totalorder %s6775_s5, %s6775_s5 }
 0x2d8   :  { %6052 = vmatprep.subr.bf16.mxu1 %v6051_v33  ;;  %6436 = vmatprep.subr.bf16.mxu0 %v6435_v27  ;;  %v11522_v51 = vand.u32 4294901760, %v11521_v50  ;;  %v11526_v6 = vand.u32 4294901760, %v11525_v55  ;;  %v11528_v33 = vand.u32 4294901760, %v11527_v8  ;;  %v11594_v27 = vmov 0  ;;  %v11605_v20 = vld [vmem:[#allocation21_spill] sm:$0xff] }
 0x2d9   :  { %v847_v50 = vsub.s32 6, %v11718_v58  ;;  %p6782_p3 = por %p6781_p2, %p6780_p1 }
 0x2da   :  { %v6065_v63 = vpack.c.bf16 %v11524_v9, %v11522_v51  ;;  %v6449_v22 = vpack.c.bf16 %v11528_v33, %v11526_v6  ;;  %v11591_v9 = vld [vmem:[#allocation13_spill] sm:$0xff] }
 0x2db   :  { %6054 = vmatpush1.bf16.msra.mxu1 %v6053_v10  ;;  %6438 = vmatpush1.bf16.msra.mxu0 %v6437_v49  ;;  %v11537_v10 = vld [vmem:[#allocation14_spill] sm:$0xff]  ;;  %v11719_v36 = vld [vmem:[#allocation91_spill] sm:$0xff]  ;;  %p6783_p4 = pnand %p6782_p3, %p6776_p0 }
 0x2dc   :  { %6056 = vmatprep.subr.bf16.mxu1 %v6055_v1  ;;  %6440 = vmatprep.subr.bf16.mxu0 %v6439_v19  ;;  %v11547_v49 = vld [vmem:[#allocation30_spill] sm:$0xff]  ;;  %v11557_v1 = vld [vmem:[#allocation23_spill] sm:$0xff] }
 0x2df   :  { %6058 = vmatpush1.bf16.msra.mxu1 %v6057_v43  ;;  %6442 = vmatpush1.bf16.msra.mxu0 %v6441_v14  ;;  %v9003_v14 = vrot.slane %v9000_v32, %v835_v40 }
 0x2e0   :  { %6060 = vmatprep.subr.bf16.mxu1 %v6059_v31  ;;  %6444 = vmatprep.subr.bf16.mxu0 %v6443_v18  ;;  %v11607_v18 = vmov 0 }
 0x2e3   :  { %6062 = vmatpush1.bf16.msra.mxu1 %v6061_v16  ;;  %6446 = vmatpush1.bf16.msra.mxu0 %v6445_v38  ;;  %v11582_v16 = vld [vmem:[#allocation8_spill] sm:$0xff] }
 0x2e4   :  { %6064 = vmatprep.subr.bf16.mxu1 %v6063_v37  ;;  %6448 = vmatprep.subr.bf16.mxu0 %v6447_v54 }
 0x2e7   :  { %6066 = vmatpush1.bf16.msra.mxu1 %v6065_v63  ;;  %6450 = vmatpush1.bf16.msra.mxu0 %v6449_v22 }
 0x2e8   :  { %6068 = vmatprep.subr.msk.bf16.mxu1 %vm7168_vm3, %v11397_v44  ;;  %6452 = vmatprep.subr.msk.bf16.mxu0 %vm7404_vm0, %v11397_v44  ;;  %vm11538_vm3 = vnez %v11537_v10  ;;  %vm11548_vm0 = vnez %v11547_v49 }
 0x2ea   :  { %2017 = vmatmul.mubr.f32.vlgmr.msra.gmra.mrb[0].mxu1 %v11531_v4  ;;  %3825 = vmatmul.mubr.f32.vlgmr.msra.gmra.mrb[2].mxu0 %v11531_v4 }
 0x2eb   :  { %6070 = vmatpush1.bf16.msk.msra.mxu1 %vm7191_vm6, %v11397_v44  ;;  %6454 = vmatpush1.bf16.msk.msra.mxu0 %vm7429_vm4, %v11397_v44  ;;  %vm11540_vm4 = vnez %v11539_v24  ;;  %vm11542_vm6 = vnez %v11541_v61  ;;  %v11597_v24 = vld [vmem:[#allocation16_spill] sm:$0xff]  ;;  %v11598_v61 = vld [vmem:[#allocation18_spill] sm:$0xff] }
 0x2ec   :  { %2022 = vmatprep.mubr.f32.mxu1 %v11322_v28  ;;  %3830 = vmatprep.mubr.f32.mxu0 %v11322_v28 }
 0x2ed   :  { %6072 = vmatprep.subr.msk.bf16.mxu1 %vm7212_vm9, %v11397_v44  ;;  %6456 = vmatprep.subr.msk.bf16.mxu0 %vm7439_vm1, %v11397_v44  ;;  %vm11544_vm9 = vnez %v11543_v41  ;;  %vm11546_vm1 = vnez %v11545_v45 }
 0x2ee   :  { %2024 = vmatmul.mubr.f32.gmra.mrb[2].mxu1 %v11536_v57  ;;  %3832 = vmatmul.mubr.f32.gmra.mrb[4].mxu0 %v11536_v57 }
 0x2ef   :  { %6074 = vmatpush1.bf16.msk.msra.mxu1 %vm11538_vm3, %v11397_v44  ;;  %6458 = vmatpush1.bf16.msk.msra.mxu0 %vm11540_vm4, %v11397_v44  ;;  %vm11550_vm3 = vnez %v11549_v5  ;;  %vm11552_vm4 = vnez %v11551_v17  ;;  %v11599_v5 = vmov 0 }
 0x2f0   :  { %6076 = vmatprep.subr.msk.bf16.mxu1 %vm11542_vm6, %v11397_v44  ;;  %6460 = vmatprep.subr.msk.bf16.mxu0 %vm11544_vm9, %v11397_v44  ;;  %vm11554_vm6 = vnez %v11553_v60  ;;  %vm11556_vm9 = vnez %v11555_v21 }
 0x2f1   :  { %2126 = vmatprep.mubr.f32.mxu1 %v11322_v28  ;;  %3934 = vmatprep.mubr.f32.mxu0 %v11322_v28 }
 0x2f3   :  { %6078 = vmatpush1.bf16.msk.msra.mxu1 %vm11546_vm1, %v11397_v44  ;;  %6462 = vmatpush1.bf16.msk.msra.mxu0 %vm11548_vm0, %v11397_v44  ;;  %vm11558_vm1 = vnez %v11557_v1  ;;  %vm11560_vm0 = vnez %v11559_v47 }
 0x2f4   :  { %6080 = vmatprep.subr.msk.bf16.mxu1 %vm11550_vm3, %v11397_v44  ;;  %6464 = vmatprep.subr.msk.bf16.mxu0 %vm11552_vm4, %v11397_v44  ;;  %vm11564_vm3 = vnez %v11563_v7  ;;  %vm11566_vm4 = vnez %v11565_v26  ;;  %v11602_v7 = vmov 0 }
 0x2f7   :  { %6082 = vmatpush1.bf16.msk.msra.mxu1 %vm11554_vm6, %v11397_v44  ;;  %6466 = vmatpush1.bf16.msk.msra.mxu0 %vm11556_vm9, %v11397_v44  ;;  %vm11572_vm6 = vnez %v11571_v25  ;;  %vm864_vm9 = vcmp.eq.s32.totalorder %v11575_v12, %v9003_v14 }
 0x2f8   :  { %6084 = vmatprep.subr.msk.bf16.mxu1 %vm11558_vm1, %v11397_v44  ;;  %6468 = vmatprep.subr.msk.bf16.mxu0 %vm11560_vm0, %v11397_v44  ;;  %v4896_v34 = vsel %vm864_vm9, 1.0, %v11322_v28  ;;  %vm879_vm1 = vcmp.eq.s32.totalorder %v11583_v46, %v9018_v0  ;;  %vm888_vm0 = vcmp.eq.s32.totalorder %v11590_v59, %v9003_v14 }
 0x2f9   :  { %v9083_v55 = vsub.f32 %v4896_v34, %v4896_v34  ;;  %v4911_v29 = vsel %vm879_vm1, 1.0, %v11322_v28  ;;  %v4920_v56 = vsel %vm888_vm0, 1.0, %v11322_v28  ;;  %v11614_v34 = vld [vmem:[#allocation49_spill] sm:$0xff] }
 0x2fa   :  { %v9194_v1 = vsub.f32 %v4911_v29, %v4911_v29  ;;  %v9196_v47 = vsub.f32 %v4920_v56, %v4920_v56  ;;  %v11622_v56 = vld [vmem:[#allocation54_spill] sm:$0xff]  ;;  %v11634_v29 = vld [vmem:[#allocation61_spill] sm:$0xff] }
 0x2fb   :  { %6086 = vmatpush1.bf16.msk.msra.mxu1 %vm11428_vm10, %v11397_v44  ;;  %6470 = vmatpush1.bf16.msk.msra.mxu0 %vm11564_vm3, %v11397_v44  ;;  %vm11570_vm10 = vnez %v11569_v3  ;;  %vm896_vm3 = vcmp.eq.s32.totalorder %v11591_v9, %v9003_v14  ;;  %v11606_v3 = vld [vmem:[#allocation22_spill] sm:$0xff] }
 0x2fc   :  { %6088 = vmatprep.subr.msk.bf16.mxu1 %vm11566_vm4, %v11397_v44  ;;  %6472 = vmatprep.subr.msk.bf16.mxu0 %vm11434_vm7, %v11397_v44  ;;  %vm856_vm7 = vcmp.eq.s32.totalorder %v11561_v30, %v9003_v14  ;;  %v4928_v35 = vsel %vm896_vm3, 1.0, %v11322_v28 }
 0x2fd   :  { %v4888_v2 = vsel %vm856_vm7, 1.0, %v11322_v28  ;;  %v9198_v40 = vsub.f32 %v4928_v35, %v4928_v35 }
 0x2fe   :  { %v9081_v63 = vsub.f32 %v4888_v2, %v4888_v2  ;;  %v11613_v2 = vld [vmem:[#allocation48_spill] sm:$0xff] }
 0x2ff   :  { %6090 = vmatpush1.bf16.msk.msra.mxu1 %vm11570_vm10, %v11397_v44  ;;  %6474 = vmatpush1.bf16.msk.msra.mxu0 %vm11572_vm6, %v11397_v44  ;;  %vm9129_vm10 = vmpackc.low %vm896_vm3, %vm888_vm0  ;;  %vm887_vm6 = vcmp.eq.s32.totalorder %v11590_v59, %v9018_v0  ;;  %vm928_vm0 = vcmp.eq.s32.totalorder %v11606_v3, %v9003_v14  ;;  %vm919_vm3 = vcmp.eq.s32.totalorder %v11605_v20, %v9018_v0 }
 0x300   :  { %6092 = vmatprep.subr.msk.bf16.mxu1 %vm7926_vm8, %v11397_v44  ;;  %6476 = vmatprep.subr.msk.bf16.mxu0 %vm11441_vm15, %v11397_v44  ;;  %vm9036_vm8 = vmpackc.low %vm864_vm9, %vm856_vm7  ;;  %vm855_vm15 = vcmp.eq.s32.totalorder %v11561_v30, %v9018_v0  ;;  %v11595_v27 = vsel %vm9129_vm10, 4294967295, %v11594_v27  ;;  %vm895_vm7 = vcmp.eq.s32.totalorder %v11591_v9, %v9018_v0  ;;  %v4919_v10 = vsel %vm887_vm6, 1.0, %v11322_v28 }
 0x301   :  { %v4887_v37 = vsel %vm855_vm15, 1.0, %v11322_v28  ;;  %11596 = vst [vmem:[#allocation92_spill] sm:$0xff] %v11595_v27  ;;  %vm904_vm9 = vcmp.eq.s32.totalorder %v11597_v24, %v9003_v14  ;;  %v4927_v41 = vsel %vm895_vm7, 1.0, %v11322_v28  ;;  %v9200_v19 = vsub.f32 %v4919_v10, %v4919_v10 }
 0x302   :  { %v9088_v6 = vsub.f32 %v4887_v37, %v4887_v37  ;;  %v4936_v45 = vsel %vm904_vm9, 1.0, %v11322_v28  ;;  %v9212_v26 = vsub.f32 %v4927_v41, %v4927_v41  ;;  %v4960_v52 = vsel %vm928_vm0, 1.0, %v11322_v28 }
 0x303   :  { %6094 = vmatpush1.bf16.msk.msra.mxu1 %vm11443_vm2, %v11397_v44  ;;  %6478 = vmatpush1.bf16.msk.msra.mxu0 %vm8005_vm11, %v11397_v44  ;;  %vm863_vm2 = vcmp.eq.s32.totalorder %v11575_v12, %v9018_v0  ;;  %vm872_vm11 = vcmp.eq.s32.totalorder %v11582_v16, %v9003_v14  ;;  %v9214_v43 = vsub.f32 %v4936_v45, %v4936_v45  ;;  %v4951_v42 = vsel %vm919_vm3, 1.0, %v11322_v28 }
 0x304   :  { %6096 = vmatprep.subr.msk.bf16.mxu1 %vm11446_vm14, %v11397_v44  ;;  %6480 = vmatprep.subr.msk.bf16.mxu0 %vm11448_vm12, %v11397_v44  ;;  %vm880_vm14 = vcmp.eq.s32.totalorder %v11583_v46, %v9003_v14  ;;  %vm9060_vm12 = vmpackc.low %vm863_vm2, %vm855_vm15  ;;  %v4895_v13 = vsel %vm863_vm2, 1.0, %v11322_v28  ;;  %v4904_v54 = vsel %vm872_vm11, 1.0, %v11322_v28  ;;  %vm912_vm15 = vcmp.eq.s32.totalorder %v11598_v61, %v9003_v14 }
 0x305   :  { %v4912_v51 = vsel %vm880_vm14, 1.0, %v11322_v28  ;;  %v9091_v8 = vsub.f32 %v4895_v13, %v4895_v13  ;;  %v9097_v33 = vsub.f32 %v4904_v54, %v4904_v54  ;;  %vm903_vm2 = vcmp.eq.s32.totalorder %v11597_v24, %v9018_v0 }
 0x306   :  { %v9117_v15 = vsub.f32 %v4912_v51, %v4912_v51  ;;  %v4944_v17 = vsel %vm912_vm15, 1.0, %v11322_v28  ;;  %v4935_v60 = vsel %vm903_vm2, 1.0, %v11322_v28  ;;  %v9294_v35 = vsub.f32 %v4960_v52, %v4960_v52 }
 0x307   :  { %6098 = vmatpush1.bf16.msk.msra.mxu1 %vm8128_vm5, %v11397_v44  ;;  %6482 = vmatpush1.bf16.msk.msra.mxu0 %vm8145_vm13, %v11397_v44  ;;  %vm9066_vm5 = vmpackc.low %vm880_vm14, %vm872_vm11  ;;  %vm871_vm13 = vcmp.eq.s32.totalorder %v11582_v16, %v9018_v0  ;;  %vm911_vm11 = vcmp.eq.s32.totalorder %v11598_v61, %v9018_v0  ;;  %v9223_v25 = vsub.f32 %v4944_v17, %v4944_v17  ;;  %v11615_v10 = vmov 0  ;;  %v11618_v17 = vld [vmem:[#allocation53_spill] sm:$0xff] }
 0x308   :  { %6100 = vmatprep.subr.msk.bf16.mxu1 %vm9036_vm8, %v11397_v44  ;;  %v4903_v22 = vsel %vm871_vm13, 1.0, %v11322_v28  ;;  %vm9113_vm4 = vmpackc.low %vm879_vm1, %vm871_vm13  ;;  %v4943_v21 = vsel %vm911_vm11, 1.0, %v11322_v28  ;;  %vm920_vm1 = vcmp.eq.s32.totalorder %v11605_v20, %v9003_v14  ;;  %v9225_v31 = vsub.f32 %v4935_v60, %v4935_v60 }
 0x309   :  { %v9167_v49 = vsub.f32 %v4903_v22, %v4903_v22  ;;  %vm9178_vm14 = vmpackc.low %vm895_vm7, %vm887_vm6  ;;  %v9227_v11 = vsub.f32 %v4943_v21, %v4943_v21  ;;  %v4952_v48 = vsel %vm920_vm1, 1.0, %v11322_v28  ;;  %vm927_vm7 = vcmp.eq.s32.totalorder %v11606_v3, %v9018_v0 }
 0x30a   :  { %2128 = vmatmul.mubr.f32.vlgmr.msra.gmra.mrb[0].mxu1 %v11531_v4  ;;  %3936 = vmatmul.mubr.f32.vlgmr.msra.gmra.mrb[2].mxu0 %v11531_v4  ;;  %v11600_v5 = vsel %vm9178_vm14, 4294967295, %v11599_v5  ;;  %vm9208_vm13 = vmpackc.low %vm912_vm15, %vm904_vm9  ;;  %v4959_v38 = vsel %vm927_vm7, 1.0, %v11322_v28  ;;  %vm936_vm15 = vcmp.eq.s32.totalorder %v11613_v2, %v9003_v14  ;;  %v9283_v51 = vsub.f32 %v4952_v48, %v4952_v48 }
 0x30b   :  { %6102 = vmatpush1.bf16.msk.msra.mxu1 %vm9060_vm12, %v11397_v44  ;;  %2133 = vmatprep.mubr.f32.mxu1 %v11322_v28  ;;  %11601 = vst [vmem:[#allocation93_spill] sm:$0xff] %v11600_v5  ;;  %v11603_v7 = vsel %vm9208_vm13, 4294967295, %v11602_v7  ;;  %vm9240_vm6 = vmpackc.low %vm911_vm11, %vm903_vm2  ;;  %vm944_vm2 = vcmp.eq.s32.totalorder %v11614_v34, %v9003_v14  ;;  %vm10910_vm11 = vcmp.eq.s32.totalorder %v11613_v2, %v9018_v0  ;;  %v4968_v37 = vsel %vm936_vm15, 1.0, %v11322_v28 }
 0x30c   :  { %3941 = vmatprep.mubr.f32.mxu0 %v11322_v28  ;;  %6104 = vmatprep.subr.msk.bf16.mxu1 %vm9066_vm5, %v11397_v44  ;;  %11604 = vst [vmem:[#allocation94_spill] sm:$0xff] %v11603_v7  ;;  %v11608_v18 = vsel %vm9240_vm6, 4294967295, %v11607_v18  ;;  %vm9252_vm9 = vmpackc.low %vm928_vm0, %vm920_vm1  ;;  %v4976_v13 = vsel %vm944_vm2, 1.0, %v11322_v28  ;;  %vm10909_vm1 = vcmp.eq.s32.totalorder %v11614_v34, %v9018_v0  ;;  %v4967_v54 = vsel %vm10910_vm11, 1.0, %v11322_v28 }
 0x30d   :  { %11609 = vst [vmem:[#allocation95_spill] sm:$0xff] %v11608_v18  ;;  %v11611_v62 = vsel %vm9252_vm9, 4294967295, %v11610_v62  ;;  %v4975_v22 = vsel %vm10909_vm1, 1.0, %v11322_v28  ;;  %vm9302_vm0 = vmpackc.low %vm927_vm7, %vm919_vm3  ;;  %v9306_v41 = vsub.f32 %v4951_v42, %v4951_v42  ;;  %v9308_v45 = vsub.f32 %v4959_v38, %v4959_v38 }
 0x30e   :  { %2135 = vmatmul.mubr.f32.gmra.mrb[2].mxu1 %v11536_v57  ;;  %3943 = vmatmul.mubr.f32.gmra.mrb[4].mxu0 %v11536_v57  ;;  %11612 = vst [vmem:[#allocation96_spill] sm:$0xff] %v11611_v62  ;;  %v11616_v10 = vsel %vm9302_vm0, 4294967295, %v11615_v10  ;;  %vm10914_vm1 = vcmp.eq.s32.totalorder %v11618_v17, %v9003_v14  ;;  %vm9318_vm11 = vmpackc.low %vm944_vm2, %vm936_vm15  ;;  %v11619_v60 = vmov 0  ;;  %v9322_v21 = vsub.f32 %v4968_v37, %v4968_v37 }
 0x30f   :  { %6106 = vmatpush1.bf16.msk.msra.mxu1 %vm9113_vm4, %v11397_v44  ;;  %2237 = vmatprep.mubr.f32.mxu1 %v11322_v28  ;;  %11617 = vst [vmem:[#allocation97_spill] sm:$0xff] %v11616_v10  ;;  %v11620_v60 = vsel %vm9318_vm11, 4294967295, %v11619_v60  ;;  %v9324_v48 = vsub.f32 %v4976_v13, %v4976_v13  ;;  %v9326_v52 = vsub.f32 %v4967_v54, %v4967_v54  ;;  %v4984_v42 = vsel %vm10914_vm1, 1.0, %v11322_v28 }
 0x310   :  { %6108 = vmatprep.subr.msk.bf16.mxu1 %vm9129_vm10, %v11397_v44  ;;  %11621 = vst [vmem:[#allocation98_spill] sm:$0xff] %v11620_v60  ;;  %v9332_v38 = vsub.f32 %v4975_v22, %v4975_v22  ;;  %vm960_vm3 = vcmp.eq.s32.totalorder %v11622_v56, %v9003_v14  ;;  %v11623_v37 = vand.u32 4294901760, %v9081_v63  ;;  %v11624_v54 = vand.u32 4294901760, %v9083_v55 }
 0x311   :  { %vm11625_vm7 = vcmp.eq.s32.totalorder %v11613_v2, %v9018_v0  ;;  %vm11626_vm15 = vcmp.eq.s32.totalorder %v11614_v34, %v9018_v0  ;;  %v9363_v3 = vsub.f32 %v4984_v42, %v4984_v42  ;;  %vm951_vm1 = vcmp.eq.s32.totalorder %v11618_v17, %v9018_v0  ;;  %v11635_v34 = vld [vmem:[#allocation62_spill] sm:$0xff] }
 0x312   :  { %v2263_v13 = vsub.f32 %v9081_v63, %v11623_v37  ;;  %v2275_v22 = vsub.f32 %v9083_v55, %v11624_v54  ;;  %vm9358_vm2 = vmpackc.low %vm11626_vm15, %vm11625_vm7  ;;  %v11627_v37 = vmov 0  ;;  %v4992_v54 = vsel %vm960_vm3, 1.0, %v11322_v28 }
 0x313   :  { %6110 = vmatpush1.bf16.msk.msra.mxu1 %vm9178_vm14, %v11397_v44  ;;  %v11628_v37 = vsel %vm9358_vm2, 4294967295, %v11627_v37  ;;  %v11631_v61 = vmov 0  ;;  %v4983_v20 = vsel %vm951_vm1, 1.0, %v11322_v28  ;;  %vm968_vm7 = vcmp.eq.s32.totalorder %v11634_v29, %v9003_v14 }
 0x314   :  { %6112 = vmatprep.subr.msk.bf16.mxu1 %vm9208_vm13, %v11397_v44  ;;  %11629 = vst [vmem:[#allocation99_spill] sm:$0xff] %v11628_v37  ;;  %vm976_vm15 = vcmp.eq.s32.totalorder %v11635_v34, %v9003_v14  ;;  %v11636_v2 = vand.u32 4294901760, %v9088_v6  ;;  %v11637_v9 = vand.u32 4294901760, %v9091_v8  ;;  %v2264_v12 = vand.u32 4294901760, %v2263_v13 }
 0x315   :  { %v2276_v32 = vand.u32 4294901760, %v2275_v22  ;;  %v11638_v30 = vand.u32 4294901760, %v9097_v33  ;;  %v11640_v13 = vmov 0  ;;  %v9451_v60 = vsub.f32 %v4983_v20, %v4983_v20 }
 0x316   :  { %v2269_v24 = vsub.f32 %v9088_v6, %v11636_v2  ;;  %v2281_v59 = vsub.f32 %v9091_v8, %v11637_v9  ;;  %v11639_v2 = vand.u32 4294901760, %v9117_v15  ;;  %v9408_v9 = vsub.f32 %v4992_v54, %v4992_v54 }
 0x317   :  { %6114 = vmatpush1.bf16.msk.msra.mxu1 %vm9240_vm6, %v11397_v44  ;;  %v2287_v39 = vsub.f32 %v9097_v33, %v11638_v30  ;;  %v5000_v30 = vsel %vm968_vm7, 1.0, %v11322_v28  ;;  %v6131_v10 = vpack.c.bf16 %v2276_v32, %v2264_v12  ;;  %v11653_v54 = vand.u32 4294901760, %v9200_v19 }
 0x318   :  { %6116 = vmatprep.subr.msk.bf16.mxu1 %vm9252_vm9, %v11397_v44  ;;  %v2299_v53 = vsub.f32 %v9117_v15, %v11639_v2  ;;  %v11643_v2 = vmov 0  ;;  %v2270_v16 = vand.u32 4294901760, %v2269_v24  ;;  %v2282_v46 = vand.u32 4294901760, %v2281_v59 }
 0x319   :  { %v2288_v22 = vand.u32 4294901760, %v2287_v39  ;;  %v11648_v59 = vmov 0  ;;  %v11651_v24 = vand.u32 4294901760, %v9196_v47 }
 0x31a   :  { %v2300_v62 = vand.u32 4294901760, %v2299_v53  ;;  %v11652_v53 = vand.u32 4294901760, %v9198_v40  ;;  %v6133_v18 = vpack.c.bf16 %v2282_v46, %v2270_v16  ;;  %v11655_v16 = vand.u32 4294901760, %v9214_v43 }
 0x31b   :  { %6118 = vmatpush1.bf16.msk.msra.mxu1 %vm9302_vm0, %v11397_v44  ;;  %vm11630_vm0 = vcmp.eq.s32.totalorder %v11618_v17, %v9003_v14  ;;  %v2311_v32 = vsub.f32 %v9196_v47, %v11651_v24 }
 0x31c   :  { %6120 = vmatprep.subr.msk.bf16.mxu1 %vm9318_vm11, %v11397_v44  ;;  %vm959_vm11 = vcmp.eq.s32.totalorder %v11622_v56, %v9018_v0  ;;  %vm9372_vm9 = vmpackc.low %vm960_vm3, %vm11630_vm0  ;;  %v11646_v56 = vand.u32 4294901760, %v9167_v49  ;;  %v2323_v39 = vsub.f32 %v9198_v40, %v11652_v53  ;;  %v2335_v46 = vsub.f32 %v9214_v43, %v11655_v16 }
 0x31d   :  { %v11632_v61 = vsel %vm9372_vm9, 4294967295, %v11631_v61  ;;  %v4991_v42 = vsel %vm959_vm11, 1.0, %v11322_v28  ;;  %vm9416_vm0 = vmpackc.low %vm959_vm11, %vm951_vm1  ;;  %vm967_vm11 = vcmp.eq.s32.totalorder %v11634_v29, %v9018_v0  ;;  %vm975_vm1 = vcmp.eq.s32.totalorder %v11635_v34, %v9018_v0  ;;  %v11662_v29 = vld [vmem:[#allocation70_spill] sm:$0xff] }
 0x31e   :  { %11633 = vst [vmem:[#allocation100_spill] sm:$0xff] %v11632_v61  ;;  %v11641_v13 = vsel %vm9416_vm0, 4294967295, %v11640_v13  ;;  %vm9432_vm3 = vmpackc.low %vm976_vm15, %vm968_vm7  ;;  %v2293_v17 = vsub.f32 %v9167_v49, %v11646_v56  ;;  %v11647_v61 = vand.u32 4294901760, %v9194_v1  ;;  %v9474_v20 = vsub.f32 %v4991_v42, %v4991_v42 }
 0x31f   :  { %6122 = vmatpush1.bf16.msk.msra.mxu1 %vm9358_vm2, %v11397_v44  ;;  %11642 = vst [vmem:[#allocation101_spill] sm:$0xff] %v11641_v13  ;;  %v11644_v2 = vsel %vm9432_vm3, 4294967295, %v11643_v2  ;;  %vm9462_vm7 = vmpackc.low %vm975_vm1, %vm967_vm11  ;;  %v9476_v56 = vsub.f32 %v5000_v30, %v5000_v30  ;;  %v11654_v13 = vand.u32 4294901760, %v9212_v26  ;;  %v6135_v42 = vpack.c.bf16 %v2300_v62, %v2288_v22 }
 0x320   :  { %6124 = vmatprep.subr.msk.bf16.mxu1 %vm9372_vm9, %v11397_v44  ;;  %11645 = vst [vmem:[#allocation102_spill] sm:$0xff] %v11644_v2  ;;  %v2305_v37 = vsub.f32 %v9194_v1, %v11647_v61  ;;  %v11649_v59 = vsel %vm9462_vm7, 4294967295, %v11648_v59  ;;  %v2317_v2 = vsub.f32 %v9200_v19, %v11653_v54  ;;  %v2294_v7 = vand.u32 4294901760, %v2293_v17  ;;  %v11657_v61 = vld [vmem:[#allocation42_spill] sm:$0xff] }
 0x321   :  { %11650 = vst [vmem:[#allocation103_spill] sm:$0xff] %v11649_v59  ;;  %v2329_v24 = vsub.f32 %v9212_v26, %v11654_v13  ;;  %v10958_v30 = vand.u32 4294901760, %v9227_v11  ;;  %v2312_v12 = vand.u32 4294901760, %v2311_v32  ;;  %v2324_v27 = vand.u32 4294901760, %v2323_v39 }
 0x322   :  { %v2306_v5 = vand.u32 4294901760, %v2305_v37  ;;  %v11656_v17 = vand.u32 4294901760, %v9223_v25  ;;  %v2318_v13 = vand.u32 4294901760, %v2317_v2  ;;  %v10960_v62 = vand.u32 4294901760, %v9306_v41 }
 0x323   :  { %6126 = vmatpush1.bf16.msk.msra.mxu1 %vm9416_vm0, %v11397_v44  ;;  %v2330_v53 = vand.u32 4294901760, %v2329_v24  ;;  %v5008_v2 = vsel %vm976_vm15, 1.0, %v11322_v28  ;;  %v4999_v14 = vsel %vm967_vm11, 1.0, %v11322_v28  ;;  %v2336_v16 = vand.u32 4294901760, %v2335_v46 }
 0x324   :  { %6128 = vmatprep.subr.msk.bf16.mxu1 %vm9432_vm3, %v11397_v44  ;;  %v2347_v37 = vsub.f32 %v9223_v25, %v11656_v17  ;;  %v6137_v54 = vpack.c.bf16 %v2306_v5, %v2294_v7  ;;  %v2353_v5 = vsub.f32 %v9227_v11, %v10958_v30  ;;  %v11659_v7 = vand.u32 4294901760, %v9283_v51 }
 0x325   :  { %v11660_v17 = vand.u32 4294901760, %v9294_v35  ;;  %v5007_v30 = vsel %vm975_vm1, 1.0, %v11322_v28  ;;  %v6141_v22 = vpack.c.bf16 %v2330_v53, %v2318_v13  ;;  %v10964_v59 = vand.u32 4294901760, %v9408_v9 }
 0x326   :  { %v2359_v24 = vsub.f32 %v9283_v51, %v11659_v7  ;;  %v2348_v39 = vand.u32 4294901760, %v2347_v37  ;;  %v2365_v7 = vsub.f32 %v9306_v41, %v10960_v62  ;;  %v2354_v13 = vand.u32 4294901760, %v2353_v5 }
 0x327   :  { %6130 = vmatpush1.bf16.msk.msra.mxu1 %vm9462_vm7, %v11397_v44  ;;  %v9549_v53 = vsub.f32 %v5007_v30, %v5007_v30  ;;  %v10967_v30 = vand.u32 4294901760, %v9474_v20 }
 0x328   :  { %6132 = vmatprep.subr.bf16.mxu1 %v6131_v10  ;;  %v11658_v10 = vand.u32 4294901760, %v9225_v31  ;;  %v2360_v62 = vand.u32 4294901760, %v2359_v24  ;;  %v2366_v46 = vand.u32 4294901760, %v2365_v7  ;;  %v11665_v24 = vand.u32 4294901760, %v9326_v52 }
 0x329   :  { %v2419_v7 = vsub.f32 %v9408_v9, %v10964_v59 }
 0x32a   :  { %2243 = vmatmul.mubr.f32.vlgmr.msra.gmra.mrb[4].mxu1 %v11657_v61  ;;  %v2341_v32 = vsub.f32 %v9225_v31, %v11658_v10  ;;  %v2371_v10 = vsub.f32 %v9294_v35, %v11660_v17  ;;  %v11661_v17 = vand.u32 4294901760, %v9308_v45 }
 0x32b   :  { %6134 = vmatpush1.bf16.msra.mxu1 %v6133_v18  ;;  %2248 = vmatprep.mubr.f32.mxu1 %v11322_v28  ;;  %v6139_v18 = vpack.c.bf16 %v2324_v27, %v2312_v12  ;;  %v11663_v27 = vand.u32 4294901760, %v9322_v21 }
 0x32c   :  { %6136 = vmatprep.subr.bf16.mxu1 %v6135_v42  ;;  %v2377_v61 = vsub.f32 %v9308_v45, %v11661_v17  ;;  %v11664_v42 = vand.u32 4294901760, %v9324_v48  ;;  %v2342_v37 = vand.u32 4294901760, %v2341_v32  ;;  %v2372_v34 = vand.u32 4294901760, %v2371_v10 }
 0x32d   :  { %v2383_v12 = vsub.f32 %v9322_v21, %v11663_v27  ;;  %v9543_v17 = vsub.f32 %v5008_v2, %v5008_v2  ;;  %v10965_v27 = vand.u32 4294901760, %v9363_v3  ;;  %v2389_v10 = vsub.f32 %v9326_v52, %v11665_v24 }
 0x32e   :  { %2254 = vmatmul.mubr.f32.gmra.mrb[6].mxu1 %v11662_v29  ;;  %v2395_v0 = vsub.f32 %v9324_v48, %v11664_v42  ;;  %v6143_v29 = vpack.c.bf16 %v2348_v39, %v2336_v16  ;;  %v9547_v42 = vsub.f32 %v4999_v14, %v4999_v14  ;;  %v11666_v2 = vand.u32 4294901760, %v9332_v38 }
 0x32f   :  { %6138 = vmatpush1.bf16.msra.mxu1 %v6137_v54  ;;  %2484 = vmatprep.mubr.f32.mxu1 %v11322_v28  ;;  %v2378_v54 = vand.u32 4294901760, %v2377_v61  ;;  %v2384_v32 = vand.u32 4294901760, %v2383_v12  ;;  %v6145_v16 = vpack.c.bf16 %v2354_v13, %v2342_v37  ;;  %v10971_v14 = vand.u32 4294901760, %v9451_v60 }
 0x330   :  { %6140 = vmatprep.subr.bf16.mxu1 %v6139_v18  ;;  %v2396_v5 = vand.u32 4294901760, %v2395_v0  ;;  %v2401_v39 = vsub.f32 %v9332_v38, %v11666_v2  ;;  %v6147_v18 = vpack.c.bf16 %v2372_v34, %v2360_v62  ;;  %v2407_v61 = vsub.f32 %v9363_v3, %v10965_v27 }
 0x331   :  { %v10966_v12 = vand.u32 4294901760, %v9476_v56  ;;  %v10968_v0 = vand.u32 4294901760, %v9543_v17  ;;  %v2390_v34 = vand.u32 4294901760, %v2389_v10  ;;  %v2425_v13 = vsub.f32 %v9474_v20, %v10967_v30 }
 0x332   :  { %v6151_v37 = vpack.c.bf16 %v2396_v5, %v2384_v32  ;;  %v2402_v62 = vand.u32 4294901760, %v2401_v39  ;;  %v10970_v24 = vand.u32 4294901760, %v9547_v42  ;;  %v10969_v2 = vand.u32 4294901760, %v9549_v53 }
 0x333   :  { %6142 = vmatpush1.bf16.msra.mxu1 %v6141_v22  ;;  %v6149_v22 = vpack.c.bf16 %v2378_v54, %v2366_v46  ;;  %v2408_v59 = vand.u32 4294901760, %v2407_v61  ;;  %v2420_v27 = vand.u32 4294901760, %v2419_v7  ;;  %v2431_v46 = vsub.f32 %v9476_v56, %v10966_v12 }
 0x334   :  { %6144 = vmatprep.subr.bf16.mxu1 %v6143_v29  ;;  %v2413_v29 = vsub.f32 %v9451_v60, %v10971_v14  ;;  %v2443_v54 = vsub.f32 %v9543_v17, %v10968_v0  ;;  %v6153_v32 = vpack.c.bf16 %v2402_v62, %v2390_v34  ;;  %v2426_v10 = vand.u32 4294901760, %v2425_v13  ;;  %v11690_v14 = vld [vmem:[#allocation40_spill] sm:$0xff] }
 0x335   :  { %v2437_v39 = vsub.f32 %v9547_v42, %v10970_v24  ;;  %v2432_v61 = vand.u32 4294901760, %v2431_v46  ;;  %v6163_v62 = vpack.c.bf16 %v9083_v55, %v9081_v63  ;;  %v6179_v13 = vpack.c.bf16 %v9294_v35, %v9283_v51 }
 0x336   :  { %v2414_v5 = vand.u32 4294901760, %v2413_v29  ;;  %v2444_v7 = vand.u32 4294901760, %v2443_v54  ;;  %v6165_v29 = vpack.c.bf16 %v9091_v8, %v9088_v6  ;;  %v6181_v46 = vpack.c.bf16 %v9308_v45, %v9306_v41 }
 0x337   :  { %6146 = vmatpush1.bf16.msra.mxu1 %v6145_v16  ;;  %v2449_v16 = vsub.f32 %v9549_v53, %v10969_v2  ;;  %v2438_v30 = vand.u32 4294901760, %v2437_v39  ;;  %v6183_v54 = vpack.c.bf16 %v9324_v48, %v9322_v21  ;;  %v6191_v39 = vpack.c.bf16 %v9543_v17, %v9476_v56 }
 0x338   :  { %6148 = vmatprep.subr.bf16.mxu1 %v6147_v18  ;;  %v6155_v18 = vpack.c.bf16 %v2420_v27, %v2408_v59  ;;  %v6157_v12 = vpack.c.bf16 %v2426_v10, %v2414_v5  ;;  %v6167_v59 = vpack.c.bf16 %v9117_v15, %v9097_v33  ;;  %v6169_v27 = vpack.c.bf16 %v9194_v1, %v9167_v49 }
 0x339   :  { %v2450_v0 = vand.u32 4294901760, %v2449_v16  ;;  %v6187_v5 = vpack.c.bf16 %v9408_v9, %v9363_v3  ;;  %v6189_v10 = vpack.c.bf16 %v9474_v20, %v9451_v60  ;;  %v6193_v16 = vpack.c.bf16 %v9549_v53, %v9547_v42 }
 0x33a   :  { %v11689_v2 = vand.u32 4294901760, %v9117_v15  ;;  %v11696_v15 = vand.u32 4294901760, %v9200_v19 }
 0x33b   :  { %6150 = vmatpush1.bf16.msra.mxu1 %v6149_v22  ;;  %v6159_v22 = vpack.c.bf16 %v2444_v7, %v2432_v61  ;;  %v6161_v34 = vpack.c.bf16 %v2450_v0, %v2438_v30  ;;  %v6171_v30 = vpack.c.bf16 %v9198_v40, %v9196_v47  ;;  %v6175_v0 = vpack.c.bf16 %v9223_v25, %v9214_v43  ;;  %v11668_v61 = vld [vmem:[#allocation36_spill] sm:$0xff] }
 0x33c   :  { %6152 = vmatprep.subr.bf16.mxu1 %v6151_v37  ;;  %v6177_v37 = vpack.c.bf16 %v9227_v11, %v9225_v31 }
 0x33f   :  { %6154 = vmatpush1.bf16.msra.mxu1 %v6153_v32  ;;  %v6185_v32 = vpack.c.bf16 %v9332_v38, %v9326_v52 }
 0x340   :  { %6156 = vmatprep.subr.bf16.mxu1 %v6155_v18  ;;  %v11667_v18 = vld [vmem:[#allocation39_spill] sm:$0xff] }
 0x343   :  { %6158 = vmatpush1.bf16.msra.mxu1 %v6157_v12  ;;  %v6173_v12 = vpack.c.bf16 %v9212_v26, %v9200_v19  ;;  %v11702_v19 = vand.u32 4294901760, %v9283_v51  ;;  %v11709_v51 = vand.u32 4294901760, %v9332_v38  ;;  %v11716_v38 = vand.u32 4294901760, %v9547_v42 }
 0x344   :  { %6160 = vmatprep.subr.bf16.mxu1 %v6159_v22 }
 0x347   :  { %6162 = vmatpush1.bf16.msra.mxu1 %v6161_v34 }
 0x348   :  { %6164 = vmatprep.subr.bf16.mxu1 %v6163_v62 }
 0x34a   :  { %2486 = vmatmul.mubr.f32.vlgmr.msra.gmra.mrb[4].mxu1 %v11531_v4 }
 0x34b   :  { %6166 = vmatpush1.bf16.msra.mxu1 %v6165_v29  ;;  %2491 = vmatprep.mubr.f32.mxu1 %v11322_v28  ;;  %v11673_v29 = vld [vmem:[#allocation96_spill] sm:$0xff] }
 0x34c   :  { %6168 = vmatprep.subr.bf16.mxu1 %v6167_v59  ;;  %vm11674_vm15 = vnez %v11673_v29  ;;  %v11675_v59 = vld [vmem:[#allocation97_spill] sm:$0xff] }
 0x34d   :  { %vm11676_vm11 = vnez %v11675_v59 }
 0x34e   :  { %2493 = vmatmul.mubr.f32.gmra.mrb[6].mxu1 %v11536_v57 }
 0x34f   :  { %6170 = vmatpush1.bf16.msra.mxu1 %v6169_v27  ;;  %2627 = vmatprep.mubr.f32.mxu1 %v11322_v28  ;;  %v11677_v27 = vld [vmem:[#allocation98_spill] sm:$0xff] }
 0x350   :  { %6172 = vmatprep.subr.bf16.mxu1 %v6171_v30  ;;  %vm11678_vm1 = vnez %v11677_v27  ;;  %v11729_v30 = vld [vmem:[#allocation12_spill] sm:$0xff] }
 0x353   :  { %6174 = vmatpush1.bf16.msra.mxu1 %v6173_v12  ;;  %v11730_v12 = vld [vmem:[#allocation13_spill] sm:$0xff] }
 0x354   :  { %6176 = vmatprep.subr.bf16.mxu1 %v6175_v0 }
 0x357   :  { %6178 = vmatpush1.bf16.msra.mxu1 %v6177_v37 }
 0x358   :  { %6180 = vmatprep.subr.bf16.mxu1 %v6179_v13  ;;  %v11683_v13 = vand.u32 4294901760, %v9081_v63  ;;  %v11691_v63 = vand.u32 4294901760, %v9167_v49  ;;  %v11698_v49 = vand.u32 4294901760, %v9214_v43  ;;  %v11705_v43 = vand.u32 4294901760, %v9308_v45 }
 0x359   :  { %v11712_v45 = vand.u32 4294901760, %v9451_v60  ;;  %v9783_v60 = vrot.slane %v11719_v36, %v851_v23  ;;  %v11750_v23 = vld [vmem:[#allocation48_spill] sm:$0xff] }
 0x35b   :  { %6182 = vmatpush1.bf16.msra.mxu1 %v6181_v46  ;;  %v11684_v46 = vand.u32 4294901760, %v9083_v55  ;;  %v11692_v55 = vand.u32 4294901760, %v9194_v1  ;;  %v11699_v1 = vand.u32 4294901760, %v9223_v25  ;;  %v11706_v25 = vand.u32 4294901760, %v9322_v21 }
 0x35c   :  { %6184 = vmatprep.subr.bf16.mxu1 %v6183_v54  ;;  %v11713_v21 = vand.u32 4294901760, %v9474_v20  ;;  %v11720_v20 = vld [vmem:[#allocation6_spill] sm:$0xff] }
 0x35d   :  { %v6227_v54 = vpack.c.bf16 %v11684_v46, %v11683_v13  ;;  %v6233_v13 = vpack.c.bf16 %v11692_v55, %v11691_v63 }
 0x35f   :  { %6186 = vmatpush1.bf16.msra.mxu1 %v6185_v32 }
 0x360   :  { %6188 = vmatprep.subr.bf16.mxu1 %v6187_v5  ;;  %v11686_v5 = vand.u32 4294901760, %v9088_v6  ;;  %v11693_v6 = vand.u32 4294901760, %v9196_v47  ;;  %v11700_v47 = vand.u32 4294901760, %v9225_v31  ;;  %v11707_v31 = vand.u32 4294901760, %v9324_v48 }
 0x361   :  { %v11714_v48 = vand.u32 4294901760, %v9476_v56 }
 0x362   :  { %v6247_v63 = vpack.c.bf16 %v11707_v31, %v11706_v25 }
 0x363   :  { %6190 = vmatpush1.bf16.msra.mxu1 %v6189_v10  ;;  %v11687_v10 = vand.u32 4294901760, %v9091_v8  ;;  %v11694_v8 = vand.u32 4294901760, %v9198_v40  ;;  %v11701_v40 = vand.u32 4294901760, %v9227_v11  ;;  %v11708_v11 = vand.u32 4294901760, %v9326_v52 }
 0x364   :  { %6192 = vmatprep.subr.bf16.mxu1 %v6191_v39  ;;  %v11715_v52 = vand.u32 4294901760, %v9543_v17  ;;  %v11724_v17 = vld [vmem:[#allocation9_spill] sm:$0xff] }
 0x365   :  { %v6229_v39 = vpack.c.bf16 %v11687_v10, %v11686_v5  ;;  %v6235_v46 = vpack.c.bf16 %v11694_v8, %v11693_v6  ;;  %v6241_v5 = vpack.c.bf16 %v11701_v40, %v11700_v47  ;;  %v6249_v55 = vpack.c.bf16 %v11709_v51, %v11708_v11 }
 0x366   :  { %v6253_v6 = vpack.c.bf16 %v11713_v21, %v11712_v45  ;;  %v6255_v8 = vpack.c.bf16 %v11715_v52, %v11714_v48  ;;  %v11734_v40 = vmov 0  ;;  %v11739_v11 = vmov 0  ;;  %v11746_v48 = vld [vmem:[#allocation22_spill] sm:$0xff] }
 0x367   :  { %6194 = vmatpush1.bf16.msra.mxu1 %v6193_v16  ;;  %v11688_v16 = vand.u32 4294901760, %v9097_v33  ;;  %v11695_v33 = vld [vmem:[#allocation41_spill] sm:$0xff] }
 0x368   :  { %6196 = vmatprep.subr.msk.bf16.mxu1 %vm9036_vm8, %v11397_v44 }
 0x369   :  { %v6231_v24 = vpack.c.bf16 %v11689_v2, %v11688_v16  ;;  %v11697_v2 = vand.u32 4294901760, %v9212_v26  ;;  %v11703_v26 = vand.u32 4294901760, %v9294_v35  ;;  %v11710_v35 = vand.u32 4294901760, %v9363_v3 }
 0x36a   :  { %2630 = vmatmul.mubr.f32.vlgmr.msra.gmra.mrb[4].mxu1 %v11667_v18  ;;  %v11717_v3 = vand.u32 4294901760, %v9549_v53  ;;  %v11723_v53 = vld [vmem:[#allocation8_spill] sm:$0xff] }
 0x36b   :  { %6198 = vmatpush1.bf16.msk.msra.mxu1 %vm9060_vm12, %v11397_v44  ;;  %2635 = vmatprep.mubr.f32.mxu1 %v11322_v28  ;;  %v6243_v10 = vpack.c.bf16 %v11703_v26, %v11702_v19  ;;  %v11737_v26 = vld [vmem:[#allocation16_spill] sm:$0xff] }
 0x36c   :  { %6200 = vmatprep.subr.msk.bf16.mxu1 %vm9066_vm5, %v11397_v44 }
 0x36e   :  { %2638 = vmatmul.mubr.f32.gmra.mrb[6].mxu1 %v11668_v61 }
 0x36f   :  { %6202 = vmatpush1.bf16.msk.msra.mxu1 %vm9113_vm4, %v11397_v44  ;;  %2740 = vmatprep.mubr.f32.mxu1 %v11322_v28 }
 0x370   :  { %6204 = vmatprep.subr.msk.bf16.mxu1 %vm9129_vm10, %v11397_v44 }
 0x373   :  { %6206 = vmatpush1.bf16.msk.msra.mxu1 %vm9178_vm14, %v11397_v44 }
 0x374   :  { %6208 = vmatprep.subr.msk.bf16.mxu1 %vm9208_vm13, %v11397_v44 }
 0x377   :  { %6210 = vmatpush1.bf16.msk.msra.mxu1 %vm9240_vm6, %v11397_v44 }
 0x378   :  { %6212 = vmatprep.subr.msk.bf16.mxu1 %vm11674_vm15, %v11397_v44 }
 0x37b   :  { %6214 = vmatpush1.bf16.msk.msra.mxu1 %vm11676_vm11, %v11397_v44 }
 0x37c   :  { %6216 = vmatprep.subr.msk.bf16.mxu1 %vm11678_vm1, %v11397_v44 }
 0x37f   :  { %6218 = vmatpush1.bf16.msk.msra.mxu1 %vm9358_vm2, %v11397_v44 }
 0x380   :  { %6220 = vmatprep.subr.msk.bf16.mxu1 %vm9372_vm9, %v11397_v44 }
 0x383   :  { %6222 = vmatpush1.bf16.msk.msra.mxu1 %vm9416_vm0, %v11397_v44 }
 0x384   :  { %6224 = vmatprep.subr.msk.bf16.mxu1 %vm9432_vm3, %v11397_v44 }
 0x387   :  { %6226 = vmatpush1.bf16.msk.msra.mxu1 %vm9462_vm7, %v11397_v44 }
 0x388   :  { %6228 = vmatprep.subr.bf16.mxu1 %v6227_v54  ;;  %v6237_v54 = vpack.c.bf16 %v11697_v2, %v11696_v15 }
 0x38a   :  { %2744 = vmatmul.mubr.f32.vlgmr.msra.gmra.mrb[4].mxu1 %v11690_v14 }
 0x38b   :  { %6230 = vmatpush1.bf16.msra.mxu1 %v6229_v39  ;;  %2749 = vmatprep.mubr.f32.mxu1 %v11322_v28  ;;  %v11704_v39 = vand.u32 4294901760, %v9306_v41  ;;  %v11711_v41 = vand.u32 4294901760, %v9408_v9  ;;  %v9792_v9 = vrot.slane %v11719_v36, %v847_v50  ;;  %v11751_v50 = vmov 0 }
 0x38c   :  { %6232 = vmatprep.subr.bf16.mxu1 %v6231_v24  ;;  %v6239_v24 = vpack.c.bf16 %v11699_v1, %v11698_v49  ;;  %v11731_v1 = vmov 0 }
 0x38d   :  { %v6245_v16 = vpack.c.bf16 %v11705_v43, %v11704_v39 }
 0x38e   :  { %2753 = vmatmul.mubr.f32.gmra.mrb[6].mxu1 %v11695_v33 }
 0x38f   :  { %6234 = vmatpush1.bf16.msra.mxu1 %v6233_v13  ;;  %2919 = vmatprep.mubr.f32.mxu1 %v11322_v28  ;;  %v6251_v13 = vpack.c.bf16 %v11711_v41, %v11710_v35 }
 0x390   :  { %6236 = vmatprep.subr.bf16.mxu1 %v6235_v46  ;;  %v6257_v46 = vpack.c.bf16 %v11717_v3, %v11716_v38  ;;  %v11747_v3 = vmov 0 }
 0x393   :  { %6238 = vmatpush1.bf16.msra.mxu1 %v6237_v54 }
 0x394   :  { %6240 = vmatprep.subr.bf16.mxu1 %v6239_v24 }
 0x397   :  { %6242 = vmatpush1.bf16.msra.mxu1 %v6241_v5 }
 0x398   :  { %6244 = vmatprep.subr.bf16.mxu1 %v6243_v10  ;;  %v11738_v10 = vld [vmem:[#allocation18_spill] sm:$0xff] }
 0x39b   :  { %6246 = vmatpush1.bf16.msra.mxu1 %v6245_v16 }
 0x39c   :  { %6248 = vmatprep.subr.bf16.mxu1 %v6247_v63 }
 0x39f   :  { %6250 = vmatpush1.bf16.msra.mxu1 %v6249_v55 }
 0x3a0   :  { %6252 = vmatprep.subr.bf16.mxu1 %v6251_v13  ;;  %v11742_v13 = vmov 0 }
 0x3a3   :  { %6254 = vmatpush1.bf16.msra.mxu1 %v6253_v6  ;;  %v11745_v6 = vld [vmem:[#allocation21_spill] sm:$0xff] }
 0x3a4   :  { %6256 = vmatprep.subr.bf16.mxu1 %v6255_v8 }
 0x3a7   :  { %6258 = vmatpush1.bf16.msra.mxu1 %v6257_v46 }
 0x3a8   :  { %6260 = vmatprep.subr.msk.bf16.mxu1 %vm9036_vm8, %v11397_v44  ;;  %vm860_vm8 = vcmp.eq.s32.totalorder %v11718_v58, %v9783_v60 }
 0x3a9   :  { %v4892_v42 = vsel %vm860_vm8, 1.0, %v11322_v28 }
 0x3aa   :  { %2921 = vmatmul.mubr.f32.vlgmr.msra.gmra.mrb[4].mxu1 %v11531_v4  ;;  %v9843_v27 = vsub.f32 %v4892_v42, %v4892_v42 }
 0x3ab   :  { %6262 = vmatpush1.bf16.msk.msra.mxu1 %vm9060_vm12, %v11397_v44  ;;  %2926 = vmatprep.mubr.f32.mxu1 %v11322_v28  ;;  %vm868_vm12 = vcmp.eq.s32.totalorder %v11720_v20, %v9783_v60 }
 0x3ac   :  { %6264 = vmatprep.subr.msk.bf16.mxu1 %vm9066_vm5, %v11397_v44  ;;  %vm9804_vm5 = vmpackc.low %vm868_vm12, %vm860_vm8  ;;  %v4900_v7 = vsel %vm868_vm12, 1.0, %v11322_v28  ;;  %vm899_vm8 = vcmp.eq.s32.totalorder %v11730_v12, %v9792_v9  ;;  %vm908_vm12 = vcmp.eq.s32.totalorder %v11737_v26, %v9783_v60 }
 0x3ad   :  { %v9849_v0 = vsub.f32 %v4900_v7, %v4900_v7  ;;  %v4931_v19 = vsel %vm899_vm8, 1.0, %v11322_v28  ;;  %v4940_v43 = vsel %vm908_vm12, 1.0, %v11322_v28 }
 0x3ae   :  { %2928 = vmatmul.mubr.f32.gmra.mrb[6].mxu1 %v11536_v57  ;;  %v9958_v41 = vsub.f32 %v4931_v19, %v4931_v19  ;;  %v9972_v45 = vsub.f32 %v4940_v43, %v4940_v43 }
 0x3af   :  { %6266 = vmatpush1.bf16.msk.msra.mxu1 %vm9113_vm4, %v11397_v44  ;;  %3030 = vmatprep.mubr.f32.mxu1 %v11322_v28  ;;  %vm859_vm4 = vcmp.eq.s32.totalorder %v11718_v58, %v9792_v9 }
 0x3b0   :  { %6268 = vmatprep.subr.msk.bf16.mxu1 %vm9129_vm10, %v11397_v44  ;;  %vm867_vm10 = vcmp.eq.s32.totalorder %v11720_v20, %v9792_v9  ;;  %v4891_v22 = vsel %vm859_vm4, 1.0, %v11322_v28  ;;  %v11754_v20 = vld [vmem:[#allocation49_spill] sm:$0xff] }
 0x3b1   :  { %v4899_v34 = vsel %vm867_vm10, 1.0, %v11322_v28  ;;  %v9854_v37 = vsub.f32 %v4891_v22, %v4891_v22 }
 0x3b2   :  { %v9856_v32 = vsub.f32 %v4899_v34, %v4899_v34 }
 0x3b3   :  { %6270 = vmatpush1.bf16.msk.msra.mxu1 %vm9178_vm14, %v11397_v44  ;;  %vm876_vm14 = vcmp.eq.s32.totalorder %v11723_v53, %v9783_v60 }
 0x3b4   :  { %6272 = vmatprep.subr.msk.bf16.mxu1 %vm9208_vm13, %v11397_v44  ;;  %vm884_vm13 = vcmp.eq.s32.totalorder %v11724_v17, %v9783_v60  ;;  %v4908_v29 = vsel %vm876_vm14, 1.0, %v11322_v28 }
 0x3b5   :  { %v4916_v15 = vsel %vm884_vm13, 1.0, %v11322_v28  ;;  %v9866_v2 = vsub.f32 %v4908_v29, %v4908_v29  ;;  %v10977_v29 = vand.u32 4294901760, %v9843_v27 }
 0x3b6   :  { %v9915_v39 = vsub.f32 %v4916_v15, %v4916_v15 }
 0x3b7   :  { %6274 = vmatpush1.bf16.msk.msra.mxu1 %vm9240_vm6, %v11397_v44  ;;  %vm9826_vm6 = vmpackc.low %vm867_vm10, %vm859_vm4  ;;  %vm916_vm4 = vcmp.eq.s32.totalorder %v11738_v10, %v9783_v60  ;;  %vm907_vm10 = vcmp.eq.s32.totalorder %v11737_v26, %v9792_v9  ;;  %v11761_v26 = vld [vmem:[#allocation53_spill] sm:$0xff] }
 0x3b8   :  { %6276 = vmatprep.subr.msk.bf16.mxu1 %vm11674_vm15, %v11397_v44  ;;  %v4948_v16 = vsel %vm916_vm4, 1.0, %v11322_v28  ;;  %v4939_v51 = vsel %vm907_vm10, 1.0, %v11322_v28 }
 0x3b9   :  { %v9974_v21 = vsub.f32 %v4948_v16, %v4948_v16  ;;  %v9984_v8 = vsub.f32 %v4939_v51, %v4939_v51  ;;  %v10984_v16 = vand.u32 4294901760, %v9854_v37  ;;  %v10987_v51 = vand.u32 4294901760, %v9856_v32 }
 0x3bb   :  { %6278 = vmatpush1.bf16.msk.msra.mxu1 %vm11676_vm11, %v11397_v44  ;;  %v4089_v33 = vsub.f32 %v9856_v32, %v10987_v51 }
 0x3bc   :  { %6280 = vmatprep.subr.msk.bf16.mxu1 %vm11678_vm1, %v11397_v44  ;;  %vm891_vm1 = vcmp.eq.s32.totalorder %v11729_v30, %v9792_v9 }
 0x3bd   :  { %v4923_v5 = vsel %vm891_vm1, 1.0, %v11322_v28  ;;  %v4090_v14 = vand.u32 4294901760, %v4089_v33  ;;  %v11785_v33 = vmov 0 }
 0x3be   :  { %v9956_v35 = vsub.f32 %v4923_v5, %v4923_v5 }
 0x3bf   :  { %6282 = vmatpush1.bf16.msk.msra.mxu1 %vm9358_vm2, %v11397_v44  ;;  %vm875_vm2 = vcmp.eq.s32.totalorder %v11723_v53, %v9792_v9 }
 0x3c0   :  { %6284 = vmatprep.subr.msk.bf16.mxu1 %vm9372_vm9, %v11397_v44  ;;  %vm9834_vm9 = vmpackc.low %vm884_vm13, %vm876_vm14  ;;  %v4907_v54 = vsel %vm875_vm2, 1.0, %v11322_v28 }
 0x3c1   :  { %v9931_v25 = vsub.f32 %v4907_v54, %v4907_v54  ;;  %vm9946_vm14 = vmpackc.low %vm899_vm8, %vm891_vm1  ;;  %vm931_vm8 = vcmp.eq.s32.totalorder %v11746_v48, %v9792_v9 }
 0x3c2   :  { %v11740_v11 = vsel %vm9946_vm14, 4294967295, %v11739_v11  ;;  %vm9966_vm13 = vmpackc.low %vm916_vm4, %vm908_vm12  ;;  %vm940_vm12 = vcmp.eq.s32.totalorder %v11750_v23, %v9783_v60  ;;  %v4963_v36 = vsel %vm931_vm8, 1.0, %v11322_v28 }
 0x3c3   :  { %6286 = vmatpush1.bf16.msk.msra.mxu1 %vm9416_vm0, %v11397_v44  ;;  %vm883_vm0 = vcmp.eq.s32.totalorder %v11724_v17, %v9792_v9  ;;  %11741 = vst [vmem:[#allocation107_spill] sm:$0xff] %v11740_v11  ;;  %v11743_v13 = vsel %vm9966_vm13, 4294967295, %v11742_v13  ;;  %v4972_v53 = vsel %vm940_vm12, 1.0, %v11322_v28  ;;  %v10060_v54 = vsub.f32 %v4963_v36, %v4963_v36 }
 0x3c4   :  { %6288 = vmatprep.subr.msk.bf16.mxu1 %vm9432_vm3, %v11397_v44  ;;  %vm892_vm3 = vcmp.eq.s32.totalorder %v11729_v30, %v9783_v60  ;;  %v4915_v49 = vsel %vm883_vm0, 1.0, %v11322_v28  ;;  %vm9882_vm15 = vmpackc.low %vm883_vm0, %vm875_vm2  ;;  %11744 = vst [vmem:[#allocation106_spill] sm:$0xff] %v11743_v13  ;;  %vm915_vm2 = vcmp.eq.s32.totalorder %v11738_v10, %v9792_v9  ;;  %vm924_vm0 = vcmp.eq.s32.totalorder %v11745_v6, %v9783_v60  ;;  %v11762_v10 = vld [vmem:[#allocation54_spill] sm:$0xff] }
 0x3c5   :  { %v11732_v1 = vsel %vm9882_vm15, 4294967295, %v11731_v1  ;;  %v4924_v24 = vsel %vm892_vm3, 1.0, %v11322_v28  ;;  %v9933_v31 = vsub.f32 %v4915_v49, %v4915_v49  ;;  %v4947_v52 = vsel %vm915_vm2, 1.0, %v11322_v28  ;;  %vm9995_vm1 = vmpackc.low %vm915_vm2, %vm907_vm10 }
 0x3c6   :  { %11733 = vst [vmem:[#allocation104_spill] sm:$0xff] %v11732_v1  ;;  %v9938_v63 = vsub.f32 %v4924_v24, %v4924_v24  ;;  %v4956_v38 = vsel %vm924_vm0, 1.0, %v11322_v28  ;;  %v11748_v3 = vsel %vm9995_vm1, 4294967295, %v11747_v3  ;;  %vm948_vm10 = vcmp.eq.s32.totalorder %v11754_v20, %v9783_v60 }
 0x3c7   :  { %6290 = vmatpush1.bf16.msk.msra.mxu1 %vm9462_vm7, %v11397_v44  ;;  %vm900_vm7 = vcmp.eq.s32.totalorder %v11730_v12, %v9783_v60  ;;  %11749 = vst [vmem:[#allocation66_spill] sm:$0xff] %v11748_v3  ;;  %vm939_vm2 = vcmp.eq.s32.totalorder %v11750_v23, %v9792_v9  ;;  %v10024_v17 = vsub.f32 %v4947_v52, %v4947_v52  ;;  %v4980_v7 = vsel %vm948_vm10, 1.0, %v11322_v28 }
 0x3c8   :  { %6484 = vmatprep.subr.msk.bf16.mxu1 %vm9804_vm5, %v11397_v44  ;;  %v4932_v47 = vsel %vm900_vm7, 1.0, %v11322_v28  ;;  %vm9894_vm11 = vmpackc.low %vm900_vm7, %vm892_vm3  ;;  %vm932_vm3 = vcmp.eq.s32.totalorder %v11746_v48, %v9783_v60  ;;  %vm923_vm7 = vcmp.eq.s32.totalorder %v11745_v6, %v9792_v9  ;;  %v10026_v42 = vsub.f32 %v4956_v38, %v4956_v38 }
 0x3c9   :  { %v11735_v40 = vsel %vm9894_vm11, 4294967295, %v11734_v40  ;;  %v9954_v55 = vsub.f32 %v4932_v47, %v4932_v47  ;;  %v4964_v46 = vsel %vm932_vm3, 1.0, %v11322_v28  ;;  %v4955_v58 = vsel %vm923_vm7, 1.0, %v11322_v28  ;;  %vm10008_vm4 = vmpackc.low %vm932_vm3, %vm924_vm0 }
 0x3ca   :  { %3032 = vmatmul.mubr.f32.vlgmr.msra.gmra.mrb[4].mxu1 %v11531_v4  ;;  %11736 = vst [vmem:[#allocation105_spill] sm:$0xff] %v11735_v40  ;;  %v11752_v50 = vsel %vm10008_vm4, 4294967295, %v11751_v50  ;;  %v4971_v22 = vsel %vm939_vm2, 1.0, %v11322_v28  ;;  %v10039_v34 = vsub.f32 %v4964_v46, %v4964_v46  ;;  %vm10972_vm0 = vcmp.eq.s32.totalorder %v11754_v20, %v9792_v9  ;;  %vm10054_vm3 = vmpackc.low %vm931_vm8, %vm923_vm7  ;;  %v11794_v40 = vld [vmem:[#allocation42_spill] sm:$0xff] }
 0x3cb   :  { %6486 = vmatpush1.bf16.msk.msra.mxu1 %vm9826_vm6, %v11397_v44  ;;  %3037 = vmatprep.mubr.f32.mxu1 %v11322_v28  ;;  %11753 = vst [vmem:[#allocation108_spill] sm:$0xff] %v11752_v50  ;;  %v10976_v30 = vand.u32 4294901760, %v9849_v0  ;;  %v11755_v12 = vmov 0  ;;  %v10058_v15 = vsub.f32 %v4955_v58, %v4955_v58  ;;  %v10062_v49 = vsub.f32 %v4972_v53, %v4972_v53  ;;  %vm10074_vm7 = vmpackc.low %vm948_vm10, %vm940_vm12 }
 0x3cc   :  { %6488 = vmatprep.subr.msk.bf16.mxu1 %vm9834_vm9, %v11397_v44  ;;  %v11756_v12 = vsel %vm10054_vm3, 4294967295, %v11755_v12  ;;  %v4979_v24 = vsel %vm10972_vm0, 1.0, %v11322_v28  ;;  %v11758_v47 = vmov 0  ;;  %v10078_v5 = vsub.f32 %v4980_v7, %v4980_v7 }
 0x3cd   :  { %11757 = vst [vmem:[#allocation72_spill] sm:$0xff] %v11756_v12  ;;  %v11759_v47 = vsel %vm10074_vm7, 4294967295, %v11758_v47  ;;  %v10080_v19 = vsub.f32 %v4971_v22, %v4971_v22  ;;  %vm10973_vm8 = vcmp.eq.s32.totalorder %v11761_v26, %v9783_v60  ;;  %vm964_vm0 = vcmp.eq.s32.totalorder %v11762_v10, %v9783_v60 }
 0x3ce   :  { %3039 = vmatmul.mubr.f32.gmra.mrb[6].mxu1 %v11536_v57  ;;  %11760 = vst [vmem:[#allocation109_spill] sm:$0xff] %v11759_v47  ;;  %v4988_v43 = vsel %vm10973_vm8, 1.0, %v11322_v28  ;;  %v4071_v6 = vsub.f32 %v9843_v27, %v10977_v29  ;;  %v4083_v48 = vsub.f32 %v9849_v0, %v10976_v30  ;;  %vm11763_vm10 = vcmp.eq.s32.totalorder %v11754_v20, %v9792_v9  ;;  %v11772_v30 = vld [vmem:[#allocation61_spill] sm:$0xff]  ;;  %v11773_v29 = vld [vmem:[#allocation62_spill] sm:$0xff] }
 0x3cf   :  { %6490 = vmatpush1.bf16.msk.msra.mxu1 %vm9882_vm15, %v11397_v44  ;;  %4045 = vmatprep.mubr.f32.mxu1 %v11322_v28  ;;  %vm10114_vm8 = vmpackc.low %vm11763_vm10, %vm939_vm2  ;;  %v11764_v46 = vmov 0  ;;  %v10118_v58 = vsub.f32 %v4979_v24, %v4979_v24  ;;  %v4996_v36 = vsel %vm964_vm0, 1.0, %v11322_v28  ;;  %vm963_vm12 = vcmp.eq.s32.totalorder %v11762_v10, %v9792_v9 }
 0x3d0   :  { %6492 = vmatprep.subr.msk.bf16.mxu1 %vm9894_vm11, %v11397_v44  ;;  %v11765_v46 = vsel %vm10114_vm8, 4294967295, %v11764_v46  ;;  %vm11768_vm2 = vcmp.eq.s32.totalorder %v11761_v26, %v9783_v60  ;;  %v11769_v7 = vmov 0  ;;  %v10140_v22 = vsub.f32 %v4988_v43, %v4988_v43 }
 0x3d1   :  { %11766 = vst [vmem:[#allocation110_spill] sm:$0xff] %v11765_v46  ;;  %vm10136_vm10 = vmpackc.low %vm964_vm0, %vm11768_vm2  ;;  %v4995_v24 = vsel %vm963_vm12, 1.0, %v11322_v28  ;;  %v4077_v43 = vsub.f32 %v9854_v37, %v10984_v16  ;;  %v11774_v12 = vand.u32 4294901760, %v9866_v2  ;;  %v11775_v50 = vand.u32 4294901760, %v9915_v39 }
 0x3d2   :  { %v11770_v7 = vsel %vm10136_vm10, 4294967295, %v11769_v7  ;;  %vm11776_vm0 = vcmp.eq.s32.totalorder %v11761_v26, %v9792_v9  ;;  %v11008_v10 = vand.u32 4294901760, %v9956_v35  ;;  %v11784_v3 = vand.u32 4294901760, %v9933_v31 }
 0x3d3   :  { %6494 = vmatpush1.bf16.msk.msra.mxu1 %vm9946_vm14, %v11397_v44  ;;  %11771 = vst [vmem:[#allocation78_spill] sm:$0xff] %v11770_v7  ;;  %v4095_v16 = vsub.f32 %v9866_v2, %v11774_v12  ;;  %v4107_v51 = vsub.f32 %v9915_v39, %v11775_v50  ;;  %vm10178_vm2 = vmpackc.low %vm963_vm12, %vm11776_vm0  ;;  %vm971_vm12 = vcmp.eq.s32.totalorder %v11772_v30, %v9792_v9  ;;  %v4078_v50 = vand.u32 4294901760, %v4077_v43 }
 0x3d4   :  { %6496 = vmatprep.subr.msk.bf16.mxu1 %vm9966_vm13, %v11397_v44  ;;  %vm10999_vm0 = vcmp.eq.s32.totalorder %v11773_v29, %v9792_v9  ;;  %v11783_v7 = vand.u32 4294901760, %v9931_v25  ;;  %v4113_v13 = vsub.f32 %v9933_v31, %v11784_v3  ;;  %v11788_v3 = vand.u32 4294901760, %v9938_v63 }
 0x3d5   :  { %v4108_v43 = vand.u32 4294901760, %v4107_v51 }
 0x3d6   :  { %v4101_v46 = vsub.f32 %v9931_v25, %v11783_v7  ;;  %v4119_v7 = vsub.f32 %v9938_v63, %v11788_v3  ;;  %v11791_v3 = vand.u32 4294901760, %v9958_v41 }
 0x3d7   :  { %6498 = vmatpush1.bf16.msk.msra.mxu1 %vm9995_vm1, %v11397_v44 }
 0x3d8   :  { %6500 = vmatprep.subr.msk.bf16.mxu1 %vm10008_vm4, %v11397_v44  ;;  %v4120_v1 = vand.u32 4294901760, %v4119_v7 }
 0x3db   :  { %6502 = vmatpush1.bf16.msk.msra.mxu1 %vm10054_vm3, %v11397_v44  ;;  %vm10998_vm3 = vcmp.eq.s32.totalorder %v11773_v29, %v9783_v60 }
 0x3dc   :  { %6504 = vmatprep.subr.msk.bf16.mxu1 %vm10074_vm7, %v11397_v44  ;;  %vm11767_vm7 = vcmp.eq.s32.totalorder %v11761_v26, %v9792_v9  ;;  %v11780_v26 = vmov 0 }
 0x3dd   :  { %v4987_v23 = vsel %vm11767_vm7, 1.0, %v11322_v28  ;;  %v2129_v20 = vpop.f32.mrb[0].mxu1  ;;  %v3937_v53 = vpop.f32.mrb[2].mxu0  ;;  %vm972_vm7 = vcmp.eq.s32.totalorder %v11772_v30, %v9783_v60 }
 0x3de   :  { %4853 = vst [vmem:[#allocation2] sm:$0xff] %v2129_v20  ;;  %4857 = vst [vmem:[#allocation2 + $0x20] sm:$0xff] %v3937_v53  ;;  %v2131_v38 = vpop.f32.mrb[1].mxu1  ;;  %v3939_v52 = vpop.f32.mrb[3].mxu0  ;;  %v4072_v20 = vand.u32 4294901760, %v4071_v6  ;;  %v4084_v53 = vand.u32 4294901760, %v4083_v48  ;;  %v10182_v12 = vsub.f32 %v4987_v23, %v4987_v23 }
 0x3df   :  { %4854 = vst [vmem:[#allocation2 + $0x8] sm:$0xff] %v2131_v38  ;;  %4858 = vst [vmem:[#allocation2 + $0x28] sm:$0xff] %v3939_v52  ;;  %6506 = vmatpush1.bf16.msk.msra.mxu1 %vm10114_vm8, %v11397_v44  ;;  %v10170_v38 = vsub.f32 %v4996_v36, %v4996_v36  ;;  %v11777_v6 = vmov 0  ;;  %v4096_v36 = vand.u32 4294901760, %v4095_v16  ;;  %v11789_v16 = vand.u32 4294901760, %v9954_v55 }
 0x3e0   :  { %6508 = vmatprep.subr.msk.bf16.mxu1 %vm10136_vm10, %v11397_v44  ;;  %v11778_v6 = vsel %vm10178_vm2, 4294967295, %v11777_v6  ;;  %vm10192_vm10 = vmpackc.low %vm10998_vm3, %vm972_vm7 }
 0x3e1   :  { %11779 = vst [vmem:[#allocation81_spill] sm:$0xff] %v11778_v6  ;;  %v2136_v52 = vpop.f32.mrb[2].mxu1  ;;  %v3944_v47 = vpop.f32.mrb[4].mxu0  ;;  %v11781_v26 = vsel %vm10192_vm10, 4294967295, %v11780_v26  ;;  %vm10222_vm3 = vmpackc.low %vm10999_vm0, %vm971_vm12  ;;  %v4131_v51 = vsub.f32 %v9954_v55, %v11789_v16  ;;  %vm11790_vm0 = vcmp.eq.s32.totalorder %v11773_v29, %v9783_v60  ;;  %v4137_v16 = vsub.f32 %v9958_v41, %v11791_v3 }
 0x3e2   :  { %11782 = vst [vmem:[#allocation80_spill] sm:$0xff] %v11781_v26  ;;  %4861 = vst [vmem:[#allocation2 + $0x40] sm:$0xff] %v2136_v52  ;;  %v2138_v23 = vpop.f32.mrb[3].mxu1  ;;  %v3946_v48 = vpop.f32.mrb[5].mxu0  ;;  %v10211_v52 = vsub.f32 %v4995_v24, %v4995_v24  ;;  %v11786_v33 = vsel %vm10222_vm3, 4294967295, %v11785_v33  ;;  %v6517_v24 = vpack.c.bf16 %v4090_v14, %v4078_v50  ;;  %v4114_v26 = vand.u32 4294901760, %v4113_v13 }
 0x3e3   :  { %4865 = vst [vmem:[#allocation2 + $0x60] sm:$0xff] %v3944_v47  ;;  %4862 = vst [vmem:[#allocation2 + $0x48] sm:$0xff] %v2138_v23  ;;  %6510 = vmatpush1.bf16.msk.msra.mxu1 %vm10178_vm2, %v11397_v44  ;;  %v6515_v47 = vpack.c.bf16 %v4084_v53, %v4072_v20  ;;  %v5004_v53 = vsel %vm972_vm7, 1.0, %v11322_v28  ;;  %v4125_v23 = vsub.f32 %v9956_v35, %v11008_v10  ;;  %v4102_v20 = vand.u32 4294901760, %v4101_v46 }
 0x3e4   :  { %4866 = vst [vmem:[#allocation2 + $0x68] sm:$0xff] %v3946_v48  ;;  %6512 = vmatprep.subr.msk.bf16.mxu1 %vm10192_vm10, %v11397_v44  ;;  %11787 = vst [vmem:[#allocation83_spill] sm:$0xff] %v11786_v33  ;;  %v5012_v48 = vsel %vm11790_vm0, 1.0, %v11322_v28  ;;  %v6519_v11 = vpack.c.bf16 %v4108_v43, %v4096_v36  ;;  %v11011_v60 = vand.u32 4294901760, %v10024_v17  ;;  %v4132_v61 = vand.u32 4294901760, %v4131_v51  ;;  %v11799_v33 = vld [vmem:[#allocation70_spill] sm:$0xff] }
 0x3e5   :  { %v11792_v14 = vand.u32 4294901760, %v9972_v45  ;;  %v11793_v46 = vand.u32 4294901760, %v9974_v21  ;;  %v4126_v3 = vand.u32 4294901760, %v4125_v23  ;;  %v4138_v6 = vand.u32 4294901760, %v4137_v16 }
 0x3e6   :  { %v11015_v36 = vand.u32 4294901760, %v10058_v15  ;;  %v11014_v43 = vand.u32 4294901760, %v10060_v54  ;;  %v6521_v10 = vpack.c.bf16 %v4114_v26, %v4102_v20  ;;  %v5003_v23 = vsel %vm971_vm12, 1.0, %v11322_v28 }
 0x3e7   :  { %6514 = vmatpush1.bf16.msk.msra.mxu1 %vm10222_vm3, %v11397_v44  ;;  %v4143_v13 = vsub.f32 %v9972_v45, %v11792_v14  ;;  %v4155_v50 = vsub.f32 %v9974_v21, %v11793_v46  ;;  %v11796_v26 = vand.u32 4294901760, %v10026_v42  ;;  %v11797_v16 = vand.u32 4294901760, %v10039_v34 }
 0x3e8   :  { %6516 = vmatprep.subr.bf16.mxu1 %v6515_v47  ;;  %v11795_v47 = vand.u32 4294901760, %v9984_v8  ;;  %vm11798_vm7 = vcmp.eq.s32.totalorder %v11773_v29, %v9792_v9  ;;  %v10287_v51 = vsub.f32 %v5004_v53, %v5004_v53  ;;  %v11800_v9 = vand.u32 4294901760, %v10062_v49 }
 0x3e9   :  { %v4167_v20 = vsub.f32 %v10026_v42, %v11796_v26  ;;  %v4179_v46 = vsub.f32 %v10039_v34, %v11797_v16  ;;  %v5011_v30 = vsel %vm11798_vm7, 1.0, %v11322_v28  ;;  %v4156_v14 = vand.u32 4294901760, %v4155_v50 }
 0x3ea   :  { %4051 = vmatmul.mubr.f32.vlgmr.msra.gmra.mrb[8].mxu1 %v11794_v40  ;;  %v4149_v7 = vsub.f32 %v9984_v8, %v11795_v47  ;;  %v4161_v40 = vsub.f32 %v10024_v17, %v11011_v60  ;;  %v4144_v47 = vand.u32 4294901760, %v4143_v13  ;;  %v6525_v60 = vpack.c.bf16 %v4138_v6, %v4126_v3 }
 0x3eb   :  { %6518 = vmatpush1.bf16.msra.mxu1 %v6517_v24  ;;  %4056 = vmatprep.mubr.f32.mxu1 %v11322_v28  ;;  %v6523_v24 = vpack.c.bf16 %v4132_v61, %v4120_v1  ;;  %v4173_v26 = vsub.f32 %v10058_v15, %v11015_v36  ;;  %v4185_v16 = vsub.f32 %v10060_v54, %v11014_v43  ;;  %v11801_v61 = vand.u32 4294901760, %v10078_v5 }
 0x3ec   :  { %6520 = vmatprep.subr.bf16.mxu1 %v6519_v11  ;;  %v4191_v11 = vsub.f32 %v10062_v49, %v11800_v9  ;;  %v4150_v53 = vand.u32 4294901760, %v4149_v7  ;;  %v4162_v13 = vand.u32 4294901760, %v4161_v40  ;;  %v4168_v50 = vand.u32 4294901760, %v4167_v20 }
 0x3ed   :  { %v4203_v1 = vsub.f32 %v10078_v5, %v11801_v61  ;;  %v4180_v3 = vand.u32 4294901760, %v4179_v46  ;;  %v6527_v43 = vpack.c.bf16 %v4156_v14, %v4144_v47  ;;  %v11017_v9 = vand.u32 4294901760, %v10140_v22 }
 0x3ee   :  { %4062 = vmatmul.mubr.f32.gmra.mrb[10].mxu1 %v11799_v33  ;;  %v10305_v33 = vsub.f32 %v5012_v48, %v5012_v48  ;;  %v11016_v36 = vand.u32 4294901760, %v10170_v38  ;;  %v10309_v61 = vsub.f32 %v5003_v23, %v5003_v23  ;;  %v10311_v29 = vsub.f32 %v5011_v30, %v5011_v30 }
 0x3ef   :  { %6522 = vmatpush1.bf16.msra.mxu1 %v6521_v10  ;;  %4292 = vmatprep.mubr.f32.mxu1 %v11322_v28  ;;  %v4174_v6 = vand.u32 4294901760, %v4173_v26  ;;  %v4186_v10 = vand.u32 4294901760, %v4185_v16  ;;  %v4192_v7 = vand.u32 4294901760, %v4191_v11  ;;  %v4204_v40 = vand.u32 4294901760, %v4203_v1 }
 0x3f0   :  { %6524 = vmatprep.subr.bf16.mxu1 %v6523_v24  ;;  %v11802_v20 = vand.u32 4294901760, %v10080_v19  ;;  %v11803_v48 = vand.u32 4294901760, %v10118_v58  ;;  %v6529_v24 = vpack.c.bf16 %v4162_v13, %v4150_v53  ;;  %v6531_v47 = vpack.c.bf16 %v4180_v3, %v4168_v50 }
 0x3f1   :  { %v4220_v23 = vand.u32 4294901760, %v10182_v12  ;;  %v11019_v30 = vand.u32 4294901760, %v10211_v52  ;;  %v4215_v26 = vsub.f32 %v10140_v22, %v11017_v9  ;;  %v4227_v16 = vsub.f32 %v10170_v38, %v11016_v36 }
 0x3f2   :  { %v4197_v46 = vsub.f32 %v10080_v19, %v11802_v20  ;;  %v4209_v14 = vsub.f32 %v10118_v58, %v11803_v48  ;;  %v11018_v11 = vand.u32 4294901760, %v10287_v51  ;;  %v11020_v1 = vand.u32 4294901760, %v10305_v33 }
 0x3f3   :  { %6526 = vmatpush1.bf16.msra.mxu1 %v6525_v60  ;;  %v6533_v60 = vpack.c.bf16 %v4186_v10, %v4174_v6  ;;  %v6535_v53 = vpack.c.bf16 %v4204_v40, %v4192_v7  ;;  %v4233_v3 = vsub.f32 %v10211_v52, %v11019_v30  ;;  %v4244_v20 = vand.u32 4294901760, %v10309_v61 }
 0x3f4   :  { %6528 = vmatprep.subr.bf16.mxu1 %v6527_v43  ;;  %v4198_v13 = vand.u32 4294901760, %v4197_v46  ;;  %v4210_v50 = vand.u32 4294901760, %v4209_v14  ;;  %v4221_v43 = vsub.f32 %v10182_v12, %v4220_v23  ;;  %v11021_v48 = vand.u32 4294901760, %v10311_v29 }
 0x3f5   :  { %v4216_v36 = vand.u32 4294901760, %v4215_v26  ;;  %v4228_v9 = vand.u32 4294901760, %v4227_v16  ;;  %v4239_v6 = vsub.f32 %v10287_v51, %v11018_v11  ;;  %v4251_v10 = vsub.f32 %v10305_v33, %v11020_v1 }
 0x3f6   :  { %v6537_v7 = vpack.c.bf16 %v4210_v50, %v4198_v13  ;;  %v4222_v40 = vand.u32 4294901760, %v4221_v43  ;;  %v4234_v46 = vand.u32 4294901760, %v4233_v3  ;;  %v4245_v14 = vsub.f32 %v10309_v61, %v4244_v20 }
 0x3f7   :  { %6530 = vmatpush1.bf16.msra.mxu1 %v6529_v24  ;;  %v4257_v24 = vsub.f32 %v10311_v29, %v11021_v48  ;;  %v4240_v26 = vand.u32 4294901760, %v4239_v6  ;;  %v4252_v16 = vand.u32 4294901760, %v4251_v10  ;;  %v6547_v50 = vpack.c.bf16 %v9849_v0, %v9843_v27  ;;  %v11827_v48 = vld [vmem:[#allocation40_spill] sm:$0xff] }
 0x3f8   :  { %6532 = vmatprep.subr.bf16.mxu1 %v6531_v47  ;;  %v6539_v47 = vpack.c.bf16 %v4228_v9, %v4216_v36  ;;  %v6541_v11 = vpack.c.bf16 %v4234_v46, %v4222_v40  ;;  %v4246_v30 = vand.u32 4294901760, %v4245_v14  ;;  %v6549_v43 = vpack.c.bf16 %v9856_v32, %v9854_v37 }
 0x3f9   :  { %v4258_v1 = vand.u32 4294901760, %v4257_v24  ;;  %v6551_v36 = vpack.c.bf16 %v9915_v39, %v9866_v2  ;;  %v6553_v9 = vpack.c.bf16 %v9933_v31, %v9931_v25  ;;  %v6563_v3 = vpack.c.bf16 %v10039_v34, %v10026_v42 }
 0x3fa   :  { %v6565_v6 = vpack.c.bf16 %v10060_v54, %v10058_v15  ;;  %v6567_v10 = vpack.c.bf16 %v10078_v5, %v10062_v49  ;;  %v6571_v40 = vpack.c.bf16 %v10170_v38, %v10140_v22  ;;  %v6573_v46 = vpack.c.bf16 %v10211_v52, %v10182_v12 }
 0x3fb   :  { %6534 = vmatpush1.bf16.msra.mxu1 %v6533_v60  ;;  %v6543_v60 = vpack.c.bf16 %v4252_v16, %v4240_v26  ;;  %v6545_v13 = vpack.c.bf16 %v4258_v1, %v4246_v30  ;;  %v6555_v30 = vpack.c.bf16 %v9954_v55, %v9938_v63  ;;  %v6559_v1 = vpack.c.bf16 %v9974_v21, %v9972_v45 }
 0x3fc   :  { %6536 = vmatprep.subr.bf16.mxu1 %v6535_v53  ;;  %v6561_v53 = vpack.c.bf16 %v10024_v17, %v9984_v8  ;;  %v6575_v14 = vpack.c.bf16 %v10305_v33, %v10287_v51  ;;  %v6577_v24 = vpack.c.bf16 %v10311_v29, %v10309_v61 }
 0x3ff   :  { %6538 = vmatpush1.bf16.msra.mxu1 %v6537_v7  ;;  %v6569_v7 = vpack.c.bf16 %v10118_v58, %v10080_v19 }
 0x400   :  { %6540 = vmatprep.subr.bf16.mxu1 %v6539_v47  ;;  %v11804_v47 = vld [vmem:[#allocation36_spill] sm:$0xff] }
 0x403   :  { %6542 = vmatpush1.bf16.msra.mxu1 %v6541_v11  ;;  %v6557_v11 = vpack.c.bf16 %v9958_v41, %v9956_v35 }
 0x404   :  { %6544 = vmatprep.subr.bf16.mxu1 %v6543_v60 }
 0x407   :  { %6546 = vmatpush1.bf16.msra.mxu1 %v6545_v13 }
 0x408   :  { %6548 = vmatprep.subr.bf16.mxu1 %v6547_v50 }
 0x40a   :  { %4294 = vmatmul.mubr.f32.vlgmr.msra.gmra.mrb[8].mxu1 %v11531_v4 }
 0x40b   :  { %6550 = vmatpush1.bf16.msra.mxu1 %v6549_v43  ;;  %4299 = vmatprep.mubr.f32.mxu1 %v11322_v28  ;;  %v11811_v43 = vld [vmem:[#allocation72_spill] sm:$0xff] }
 0x40c   :  { %6552 = vmatprep.subr.bf16.mxu1 %v6551_v36  ;;  %vm11812_vm12 = vnez %v11811_v43  ;;  %v11813_v36 = vld [vmem:[#allocation109_spill] sm:$0xff] }
 0x40d   :  { %vm11814_vm0 = vnez %v11813_v36 }
 0x40e   :  { %4301 = vmatmul.mubr.f32.gmra.mrb[10].mxu1 %v11536_v57 }
 0x40f   :  { %6554 = vmatpush1.bf16.msra.mxu1 %v6553_v9  ;;  %4435 = vmatprep.mubr.f32.mxu1 %v11322_v28 }
 0x410   :  { %6556 = vmatprep.subr.bf16.mxu1 %v6555_v30  ;;  %v11816_v30 = vld [vmem:[#allocation78_spill] sm:$0xff] }
 0x411   :  { %vm11817_vm7 = vnez %v11816_v30 }
 0x413   :  { %6558 = vmatpush1.bf16.msra.mxu1 %v6557_v11 }
 0x414   :  { %6560 = vmatprep.subr.bf16.mxu1 %v6559_v1 }
 0x417   :  { %6562 = vmatpush1.bf16.msra.mxu1 %v6561_v53  ;;  %v11820_v53 = vand.u32 4294901760, %v9843_v27  ;;  %v11828_v27 = vand.u32 4294901760, %v9931_v25  ;;  %v11835_v25 = vand.u32 4294901760, %v9972_v45  ;;  %v11842_v45 = vand.u32 4294901760, %v10060_v54 }
 0x418   :  { %6564 = vmatprep.subr.bf16.mxu1 %v6563_v3  ;;  %v11821_v3 = vand.u32 4294901760, %v9849_v0  ;;  %v11829_v0 = vand.u32 4294901760, %v9933_v31  ;;  %v11836_v31 = vand.u32 4294901760, %v9974_v21  ;;  %v11843_v21 = vand.u32 4294901760, %v10062_v49 }
 0x419   :  { %v11849_v54 = vand.u32 4294901760, %v10211_v52 }
 0x41b   :  { %6566 = vmatpush1.bf16.msra.mxu1 %v6565_v6  ;;  %v6611_v6 = vpack.c.bf16 %v11821_v3, %v11820_v53  ;;  %v6617_v53 = vpack.c.bf16 %v11829_v0, %v11828_v27  ;;  %v6637_v49 = vpack.c.bf16 %v11849_v54, %v4220_v23 }
 0x41c   :  { %6568 = vmatprep.subr.bf16.mxu1 %v6567_v10 }
 0x41f   :  { %6570 = vmatpush1.bf16.msra.mxu1 %v6569_v7  ;;  %v11823_v7 = vand.u32 4294901760, %v9854_v37  ;;  %v11830_v37 = vand.u32 4294901760, %v9938_v63  ;;  %v11837_v63 = vand.u32 4294901760, %v9984_v8  ;;  %v11844_v8 = vand.u32 4294901760, %v10078_v5 }
 0x420   :  { %6572 = vmatprep.subr.bf16.mxu1 %v6571_v40  ;;  %v11824_v40 = vand.u32 4294901760, %v9856_v32  ;;  %v11831_v32 = vand.u32 4294901760, %v9954_v55  ;;  %v11838_v55 = vand.u32 4294901760, %v10024_v17  ;;  %v11845_v17 = vand.u32 4294901760, %v10080_v19 }
 0x421   :  { %v11850_v5 = vand.u32 4294901760, %v10287_v51  ;;  %v11851_v19 = vand.u32 4294901760, %v10305_v33 }
 0x422   :  { %v6619_v3 = vpack.c.bf16 %v11831_v32, %v11830_v37 }
 0x423   :  { %6574 = vmatpush1.bf16.msra.mxu1 %v6573_v46  ;;  %v6613_v46 = vpack.c.bf16 %v11824_v40, %v11823_v7  ;;  %v6623_v7 = vpack.c.bf16 %v11836_v31, %v11835_v25  ;;  %v6625_v40 = vpack.c.bf16 %v11838_v55, %v11837_v63 }
 0x424   :  { %6576 = vmatprep.subr.bf16.mxu1 %v6575_v14  ;;  %v11825_v14 = vand.u32 4294901760, %v9866_v2  ;;  %v11832_v2 = vld [vmem:[#allocation41_spill] sm:$0xff] }
 0x427   :  { %6578 = vmatpush1.bf16.msra.mxu1 %v6577_v24  ;;  %v11826_v24 = vand.u32 4294901760, %v9915_v39  ;;  %v11833_v39 = vand.u32 4294901760, %v9956_v35  ;;  %v11839_v35 = vand.u32 4294901760, %v10026_v42  ;;  %v11846_v42 = vand.u32 4294901760, %v10118_v58 }
 0x428   :  { %6580 = vmatprep.subr.msk.bf16.mxu1 %vm9804_vm5, %v11397_v44  ;;  %v11852_v58 = vand.u32 4294901760, %v10311_v29 }
 0x429   :  { %v6633_v27 = vpack.c.bf16 %v11846_v42, %v11845_v17 }
 0x42a   :  { %4438 = vmatmul.mubr.f32.vlgmr.msra.gmra.mrb[8].mxu1 %v11667_v18 }
 0x42b   :  { %6582 = vmatpush1.bf16.msk.msra.mxu1 %vm9826_vm6, %v11397_v44  ;;  %4443 = vmatprep.mubr.f32.mxu1 %v11322_v28 }
 0x42c   :  { %6584 = vmatprep.subr.msk.bf16.mxu1 %vm9834_vm9, %v11397_v44 }
 0x42e   :  { %4446 = vmatmul.mubr.f32.gmra.mrb[10].mxu1 %v11804_v47  ;;  %v6615_v47 = vpack.c.bf16 %v11826_v24, %v11825_v14  ;;  %v11841_v14 = vand.u32 4294901760, %v10058_v15  ;;  %v11848_v15 = vand.u32 4294901760, %v10170_v38 }
 0x42f   :  { %6586 = vmatpush1.bf16.msk.msra.mxu1 %vm9882_vm15, %v11397_v44  ;;  %4548 = vmatprep.mubr.f32.mxu1 %v11322_v28 }
 0x430   :  { %6588 = vmatprep.subr.msk.bf16.mxu1 %vm9894_vm11, %v11397_v44  ;;  %v6629_v24 = vpack.c.bf16 %v11842_v45, %v11841_v14 }
 0x433   :  { %6590 = vmatpush1.bf16.msk.msra.mxu1 %vm9946_vm14, %v11397_v44 }
 0x434   :  { %6592 = vmatprep.subr.msk.bf16.mxu1 %vm9966_vm13, %v11397_v44 }
 0x437   :  { %6594 = vmatpush1.bf16.msk.msra.mxu1 %vm9995_vm1, %v11397_v44 }
 0x438   :  { %6596 = vmatprep.subr.msk.bf16.mxu1 %vm10008_vm4, %v11397_v44 }
 0x43b   :  { %6598 = vmatpush1.bf16.msk.msra.mxu1 %vm11812_vm12, %v11397_v44 }
 0x43c   :  { %6600 = vmatprep.subr.msk.bf16.mxu1 %vm11814_vm0, %v11397_v44 }
 0x43f   :  { %6602 = vmatpush1.bf16.msk.msra.mxu1 %vm10114_vm8, %v11397_v44 }
 0x440   :  { %6604 = vmatprep.subr.msk.bf16.mxu1 %vm11817_vm7, %v11397_v44 }
 0x443   :  { %6606 = vmatpush1.bf16.msk.msra.mxu1 %vm10178_vm2, %v11397_v44 }
 0x444   :  { %6608 = vmatprep.subr.msk.bf16.mxu1 %vm10192_vm10, %v11397_v44 }
 0x447   :  { %6610 = vmatpush1.bf16.msk.msra.mxu1 %vm10222_vm3, %v11397_v44 }
 0x448   :  { %6612 = vmatprep.subr.bf16.mxu1 %v6611_v6 }
 0x44a   :  { %4552 = vmatmul.mubr.f32.vlgmr.msra.gmra.mrb[8].mxu1 %v11827_v48  ;;  %v11834_v48 = vand.u32 4294901760, %v9958_v41  ;;  %v11840_v41 = vand.u32 4294901760, %v10039_v34  ;;  %v11847_v34 = vand.u32 4294901760, %v10140_v22  ;;  %v6641_v22 = vpack.c.bf16 %v11852_v58, %v4244_v20 }
 0x44b   :  { %6614 = vmatpush1.bf16.msra.mxu1 %v6613_v46  ;;  %4557 = vmatprep.mubr.f32.mxu1 %v11322_v28 }
 0x44c   :  { %6616 = vmatprep.subr.bf16.mxu1 %v6615_v47  ;;  %v6621_v6 = vpack.c.bf16 %v11834_v48, %v11833_v39  ;;  %v6627_v46 = vpack.c.bf16 %v11840_v41, %v11839_v35  ;;  %v6631_v47 = vpack.c.bf16 %v11844_v8, %v11843_v21  ;;  %v6635_v0 = vpack.c.bf16 %v11848_v15, %v11847_v34 }
 0x44e   :  { %4561 = vmatmul.mubr.f32.gmra.mrb[10].mxu1 %v11832_v2 }
 0x44f   :  { %6618 = vmatpush1.bf16.msra.mxu1 %v6617_v53  ;;  %4727 = vmatprep.mubr.f32.mxu1 %v11322_v28  ;;  %v6639_v53 = vpack.c.bf16 %v11851_v19, %v11850_v5 }
 0x450   :  { %6620 = vmatprep.subr.bf16.mxu1 %v6619_v3 }
 0x453   :  { %6622 = vmatpush1.bf16.msra.mxu1 %v6621_v6 }
 0x454   :  { %6624 = vmatprep.subr.bf16.mxu1 %v6623_v7 }
 0x457   :  { %6626 = vmatpush1.bf16.msra.mxu1 %v6625_v40 }
 0x458   :  { %6628 = vmatprep.subr.bf16.mxu1 %v6627_v46 }
 0x45b   :  { %6630 = vmatpush1.bf16.msra.mxu1 %v6629_v24 }
 0x45c   :  { %6632 = vmatprep.subr.bf16.mxu1 %v6631_v47 }
 0x45f   :  { %6634 = vmatpush1.bf16.msra.mxu1 %v6633_v27 }
 0x460   :  { %6636 = vmatprep.subr.bf16.mxu1 %v6635_v0 }
 0x463   :  { %6638 = vmatpush1.bf16.msra.mxu1 %v6637_v49 }
 0x464   :  { %6640 = vmatprep.subr.bf16.mxu1 %v6639_v53 }
 0x467   :  { %6642 = vmatpush1.bf16.msra.mxu1 %v6641_v22 }
 0x468   :  { %6644 = vmatprep.subr.msk.bf16.mxu1 %vm9804_vm5, %v11397_v44 }
 0x46a   :  { %4729 = vmatmul.mubr.f32.vlgmr.msra.gmra.mrb[8].mxu1 %v11531_v4 }
 0x46b   :  { %6646 = vmatpush1.bf16.msk.msra.mxu1 %vm9826_vm6, %v11397_v44  ;;  %4734 = vmatprep.mubr.f32.mxu1 %v11322_v28 }
 0x46c   :  { %6648 = vmatprep.subr.msk.bf16.mxu1 %vm9834_vm9, %v11397_v44 }
 0x46e   :  { %4736 = vmatmul.mubr.f32.gmra.mrb[10].mxu1 %v11536_v57 }
 0x46f   :  { %6650 = vmatpush1.bf16.msk.msra.mxu1 %vm9882_vm15, %v11397_v44  ;;  %4838 = vmatprep.mubr.f32.mxu1 %v11322_v28 }
 0x470   :  { %6652 = vmatprep.subr.msk.bf16.mxu1 %vm9894_vm11, %v11397_v44 }
 0x473   :  { %6654 = vmatpush1.bf16.msk.msra.mxu1 %vm9946_vm14, %v11397_v44 }
 0x474   :  { %6656 = vmatprep.subr.msk.bf16.mxu1 %vm9966_vm13, %v11397_v44 }
 0x477   :  { %6658 = vmatpush1.bf16.msk.msra.mxu1 %vm9995_vm1, %v11397_v44 }
 0x478   :  { %6660 = vmatprep.subr.msk.bf16.mxu1 %vm10008_vm4, %v11397_v44 }
 0x47b   :  { %6662 = vmatpush1.bf16.msk.msra.mxu1 %vm11812_vm12, %v11397_v44 }
 0x47c   :  { %6664 = vmatprep.subr.msk.bf16.mxu1 %vm11814_vm0, %v11397_v44 }
 0x47f   :  { %6666 = vmatpush1.bf16.msk.msra.mxu1 %vm10114_vm8, %v11397_v44 }
 0x480   :  { %6668 = vmatprep.subr.msk.bf16.mxu1 %vm11817_vm7, %v11397_v44 }
 0x483   :  { %6670 = vmatpush1.bf16.msk.msra.mxu1 %vm10178_vm2, %v11397_v44 }
 0x484   :  { %6672 = vmatprep.subr.msk.bf16.mxu1 %vm10192_vm10, %v11397_v44 }
 0x487   :  { %6674 = vmatpush1.bf16.msk.msra.mxu1 %vm10222_vm3, %v11397_v44 }
 0x48a   :  { %4840 = vmatmul.mubr.f32.vlgmr.msra.gmra.mrb[8].mxu1 %v11531_v4 }
 0x48b   :  { %4845 = vmatprep.mubr.f32.mxu1 %v11322_v28 }
 0x48e   :  { %4847 = vmatmul.mubr.f32.gmra.mrb[10].mxu1 %v11536_v57 }
 0x49d   :  { %v3033_v56 = vpop.f32.mrb[4].mxu1 }
 0x49e   :  { %4855 = vst [vmem:[#allocation2 + $0x10] sm:$0xff] %v3033_v56  ;;  %v3035_v62 = vpop.f32.mrb[5].mxu1 }
 0x49f   :  { %4856 = vst [vmem:[#allocation2 + $0x18] sm:$0xff] %v3035_v62 }
 0x4a1   :  { %v3040_v59 = vpop.f32.mrb[6].mxu1 }
 0x4a2   :  { %4863 = vst [vmem:[#allocation2 + $0x50] sm:$0xff] %v3040_v59  ;;  %v3042_v38 = vpop.f32.mrb[7].mxu1 }
 0x4a3   :  { %4864 = vst [vmem:[#allocation2 + $0x58] sm:$0xff] %v3042_v38 }
 0x55d   :  { %v4841_v12 = vpop.f32.mrb[8].mxu1 }
 0x55e   :  { %4859 = vst [vmem:[#allocation2 + $0x30] sm:$0xff] %v4841_v12  ;;  %v4843_v52 = vpop.f32.mrb[9].mxu1 }
 0x55f   :  { %4860 = vst [vmem:[#allocation2 + $0x38] sm:$0xff] %v4843_v52 }
 0x561   :  { %v4848_v44 = vpop.f32.mrb[10].mxu1 }
 0x562   :  { %4867 = vst [vmem:[#allocation2 + $0x70] sm:$0xff] %v4848_v44  ;;  %v4850_v28 = vpop.f32.mrb[11].mxu1 }
 0x563   :  { %4868 = vst [vmem:[#allocation2 + $0x78] sm:$0xff] %v4850_v28 }
 0x564   :  { %6786 = shalt.err (!%p6783_p4)
}
 0x565   :  { %s6787_s8 = scalar_lea.hbm %s10576_s4, 2048 }
 0x566   :  { %p6788_p5 = scmp.ne.s32.totalorder %s10576_s4, %s6787_s8  ;;  %p6791_p6 = scmp.lt.u32.totalorder %s6787_s8, %s10576_s4 }
 0x568   :  { %p6793_p7 = pnand %p6791_p6, %p6788_p5 }
 0x56a   :  { %6796 = shalt.err (!%p6793_p7)
}
 0x56b   :  { %s6803_s13 = smov 1024   ;;  %s6804_s14 = smov 64  }
 0x56c   :  { %4880 = dma.vmem_to_hbm [thread:$0]  %s4875_s30, 2048, %s10576_s4, [#allocation3], %s6803_s13, %s6803_s13, %s6804_s14  }
 0x56d   :  { %6797 = dma.done.wait [#allocation3], 2048  }
 0x56e   :  { %6798 = vsyncadd [#allocation3], 4294965248 }
 0x56f   :  { %4884 = vsyncpa [#allocation3], 1 }

</bundles_post_ra>
